<compile_context>
chip_gen: v7x
topology: tpu7x:2x2x1
jax: 0.10.0
libtpu: 0.0.40
codegen_flags: <defaults>
</compile_context>

<pallas_src>
import jax
import jax.numpy as jnp
from jax import lax
from jax.experimental import pallas as pl
from jax.experimental.pallas import tpu as pltpu

HIDDEN = 64
INPUT = 1
OUTPUT = 1
NUM_LAYERS = 3
_PY_UNROLL_MAX_T = 32        # fully unroll in Python below this sequence length
_FORI_UNROLL = 8             # partial unroll for long sequences
_VMEM_CAP_BYTES = 48 << 20   # keep under v7x's 64 MiB physical VMEM per core


def _gru_kernel(x_ref,
                w0_r, w0_z, w0_n, b0_r, b0_z, b0_in,
                whh0_cat, b0_hn,
                wih1_cat, whh1_cat, b1_r, b1_z, b1_in, b1_hn,
                wih2_cat, whh2_cat, b2_r, b2_z, b2_in, b2_hn,
                out_ref,
                seq_ref, gi_ref):
    T, B, _ = x_ref.shape
    H = HIDDEN

    def recurrence(whh_cat_ref, bhn_ref, store_seq):
        # Loop-invariant loads / broadcasts hoisted off the serial chain
        # (JAX does not CSE broadcast_in_dim).
        w = whh_cat_ref[...]                                     # (H, 3H) bf16
        bhn = jnp.broadcast_to(bhn_ref[...], (B, H))             # (B, H) f32

        def step(t, h):
            # One fused MXU push per timestep: (B,H)x(H,3H) in bf16 with f32
            # accumulation.  Gate slices use the mostly idle VPU/XLU slots.
            gh = jnp.dot(h.astype(jnp.bfloat16), w,
                         preferred_element_type=jnp.float32)     # (B, 3H) f32
            r = jax.nn.sigmoid(gi_ref[0, t] + gh[:, :H])
            z = jax.nn.sigmoid(gi_ref[1, t] + gh[:, H:2 * H])
            n = jnp.tanh(gi_ref[2, t] + r * (gh[:, 2 * H:] + bhn))
            h_new = (1.0 - z) * n + z * h
            if store_seq:
                seq_ref[t] = h_new
            return h_new

        h = jnp.zeros((B, H), jnp.float32)
        if T <= _PY_UNROLL_MAX_T:
            for t in range(T):                       # static full unroll
                h = step(t, h)
            return h
        # Long sequences: bounded partial unroll (a full unroll explodes
        # instruction memory / vreg live ranges without adding parallelism --
        # the recurrence chain is serial anyway).
        return lax.fori_loop(0, T, step, h, unroll=_FORI_UNROLL)

    def project(wih_cat_ref, b_r_ref, b_z_ref, b_in_ref):
        # Sequence-batched input-to-hidden projection for layers 1/2: a single
        # fused (T*B, H) x (H, 3H) bf16 matmul, off the serialized path.
        src = seq_ref[...].reshape(T * B, H).astype(jnp.bfloat16)
        g = jnp.dot(src, wih_cat_ref[...],
                    preferred_element_type=jnp.float32)          # (T*B, 3H)
        gi_ref[0] = (g[:, :H] + b_r_ref[...]).reshape(T, B, H)
        gi_ref[1] = (g[:, H:2 * H] + b_z_ref[...]).reshape(T, B, H)
        gi_ref[2] = (g[:, 2 * H:] + b_in_ref[...]).reshape(T, B, H)

    # ---- layer 0: INPUT == 1, so the input projection is a pure VPU
    #      broadcast (no gi0 HBM round trip, no degenerate K=1 matmuls) ----
    x = x_ref[...]                                               # (T, B, 1) f32
    gi_ref[0] = x * w0_r[...] + b0_r[...]
    gi_ref[1] = x * w0_z[...] + b0_z[...]
    gi_ref[2] = x * w0_n[...] + b0_in[...]
    recurrence(whh0_cat, b0_hn, store_seq=True)

    # ---- layer 1 ----
    project(wih1_cat, b1_r, b1_z, b1_in)
    recurrence(whh1_cat, b1_hn, store_seq=True)

    # ---- layer 2: only the final hidden state is needed ----
    project(wih2_cat, b2_r, b2_z, b2_in)
    h_last = recurrence(whh2_cat, b2_hn, store_seq=False)

    # fc(h[-1]) is done in the XLA wrapper (lane-degenerate (B,64)x(64,1)).
    out_ref[...] = h_last.astype(out_ref.dtype)


def _round_up(v, m):
    return ((v + m - 1) // m) * m


def _vmem_bytes(T, bb):
    """Rough per-grid-step VMEM footprint for budget-aware block sizing."""
    H = HIDDEN
    gi_scr = 3 * T * bb * H * 4
    seq_scr = T * bb * H * 4
    x_blk = 2 * T * bb * 128 * 4          # (T, bb, 1) block lane-pads to 128, 2x buffered
    weights = 3 * 2 * (H * 3 * H * 2) + 20 * H * 4   # bf16 gate mats + f32 bias rows
    out_blk = 2 * bb * H * 4
    return gi_scr + seq_scr + x_blk + weights + out_blk


def _pick_b_block(B, T):
    # Big batch blocks amortize the serialized recurrence (the T-step chain
    # costs the same wall time whether 8 or 128 rows ride it) and the per-grid-
    # step overhead, but must respect the per-core VMEM budget (v7x: 64 MiB).
    bb = min(128, _round_up(max(B, 1), 8))
    while bb > 8 and _vmem_bytes(T, bb) > _VMEM_CAP_BYTES:
        bb -= 8
    return bb


@jax.jit
def gru_model_forward(x_btI, params):
    """x_btI: (B, T, INPUT) float32.  Returns (B, OUTPUT) float32."""
    B, T, _ = x_btI.shape
    H = HIDDEN
    bb = _pick_b_block(B, T)
    B_pad = _round_up(B, bb)

    x = x_btI.astype(jnp.float32)
    if B_pad != B:
        x = jnp.pad(x, ((0, B_pad - B), (0, 0), (0, 0)))
    x_tbi = jnp.transpose(x, (1, 0, 2))                     # (T, B_pad, 1)

    # ---- weight prep: gate-fused, pre-transposed, bf16 for the MXU ----
    wih0, whh0, bih0, bhh0 = params["l0"]
    w0_r = wih0[:H, 0][None, :]                              # (1, H) f32 (VPU)
    w0_z = wih0[H:2 * H, 0][None, :]
    w0_n = wih0[2 * H:, 0][None, :]
    b0_r = (bih0[:H] + bhh0[:H])[None, :]
    b0_z = (bih0[H:2 * H] + bhh0[H:2 * H])[None, :]
    b0_in = bih0[2 * H:][None, :]
    whh0_cat = whh0.T.astype(jnp.bfloat16)                   # (H, 3H) cols [r|z|n]
    b0_hn = bhh0[2 * H:][None, :]

    def prep(wih, whh, bih, bhh):
        return (wih.T.astype(jnp.bfloat16),                  # (H, 3H)
                whh.T.astype(jnp.bfloat16),                  # (H, 3H)
                (bih[:H] + bhh[:H])[None, :],
                (bih[H:2 * H] + bhh[H:2 * H])[None, :],
                bih[2 * H:][None, :],                        # b_in (outside r-gate)
                bhh[2 * H:][None, :])                        # b_hn (inside r-gate)

    l1 = prep(*params["l1"])
    l2 = prep(*params["l2"])

    flat_inputs = ([x_tbi, w0_r, w0_z, w0_n, b0_r, b0_z, b0_in, whh0_cat, b0_hn]
                   + list(l1) + list(l2))

    def full_spec(a):  # small weight/bias arrays: fully resident every step
        return pl.BlockSpec(a.shape, lambda b, _nd=a.ndim: (0,) * _nd)

    in_specs = ([pl.BlockSpec((T, bb, INPUT), lambda b: (0, b, 0))]
                + [full_spec(a) for a in flat_inputs[1:]])
    out_spec = pl.BlockSpec((bb, H), lambda b: (b, 0))

    vmem_limit = int(min(max(_vmem_bytes(T, bb) + (8 << 20), 32 << 20), 64 << 20))

    h_last = pl.pallas_call(
        _gru_kernel,
        out_shape=jax.ShapeDtypeStruct((B_pad, H), jnp.float32),
        grid=(B_pad // bb,),
        in_specs=in_specs,
        out_specs=out_spec,
        scratch_shapes=[pltpu.VMEM((T, bb, H), jnp.float32),       # layer outputs
                        pltpu.VMEM((3, T, bb, H), jnp.float32)],   # gate inputs
        compiler_params=pltpu.CompilerParams(
            dimension_semantics=("parallel",),     # >=2 grid steps feed both v7x TCs
            vmem_limit_bytes=vmem_limit),
    )(*flat_inputs)

    fcw, fcb = params["fc"]
    return h_last[:B] @ fcw.T + fcb


def init_params(key):
    """Deterministic PyTorch-style init: U(-1/sqrt(H), 1/sqrt(H))."""
    H, I, O = HIDDEN, INPUT, OUTPUT
    bound = 1.0 / (H ** 0.5)
    params = {}
    for l in range(NUM_LAYERS):
        in_sz = I if l == 0 else H
        key, k1, k2, k3, k4 = jax.random.split(key, 5)
        wih = jax.random.uniform(k1, (3 * H, in_sz), jnp.float32, -bound, bound)
        whh = jax.random.uniform(k2, (3 * H, H), jnp.float32, -bound, bound)
        bih = jax.random.uniform(k3, (3 * H,), jnp.float32, -bound, bound)
        bhh = jax.random.uniform(k4, (3 * H,), jnp.float32, -bound, bound)
        params[f"l{l}"] = (wih, whh, bih, bhh)
    key, k1, k2 = jax.random.split(key, 3)
    fc_bound = 1.0 / (H ** 0.5)
    fcw = jax.random.uniform(k1, (O, H), jnp.float32, -fc_bound, fc_bound)
    fcb = jax.random.uniform(k2, (O,), jnp.float32, -fc_bound, fc_bound)
    params["fc"] = (fcw, fcb)
    return params


def reference_forward(x_btI, params):
    """Pure-JAX f32 reference of the PyTorch forward (eval mode)."""
    B, T, _ = x_btI.shape
    H = HIDDEN
    layer_in = x_btI.astype(jnp.float32)
    h_last = None
    for l in range(NUM_LAYERS):
        wih, whh, bih, bhh = params[f"l{l}"]
        h = jnp.zeros((B, H), jnp.float32)
        outs = []
        for t in range(T):
            x_t = layer_in[:, t, :]
            gi = x_t @ wih.T + bih
            gh = h @ whh.T + bhh
            i_r, i_z, i_n = gi[:, :H], gi[:, H:2 * H], gi[:, 2 * H:]
            h_r, h_z, h_n = gh[:, :H], gh[:, H:2 * H], gh[:, 2 * H:]
            r = jax.nn.sigmoid(i_r + h_r)
            z = jax.nn.sigmoid(i_z + h_z)
            n = jnp.tanh(i_n + r * h_n)
            h = (1.0 - z) * n + z * h
            outs.append(h)
        layer_in = jnp.stack(outs, axis=1)
        h_last = h
    fcw, fcb = params["fc"]
    return h_last @ fcw.T + fcb


if __name__ == "__main__":
    B, T = 2, 8
    key = jax.random.PRNGKey(0)
    kx, kp = jax.random.split(key)
    x = jax.random.normal(kx, (B, T, INPUT), jnp.float32)
    params = init_params(kp)

    out = gru_model_forward(x, params)
    out = jax.block_until_ready(out)

    ref = reference_forward(x, params)
    assert out.shape == (B, OUTPUT)
    # bf16 MXU weights/activations (f32 accumulation) vs. the f32 reference:
    # tolerance loosened from 1e-4 accordingly.
    assert jnp.allclose(out, ref, atol=3e-2, rtol=3e-2), (out, ref)
    print("KERNEL_OK")
</pallas_src>

<mosaic_0001>
module attributes {stable_mosaic.version = 11 : i64} {
  func.func @_gru_kernel(%arg0: i32, %arg1: memref<8x8x1xf32, #tpu.memory_space<vmem>>, %arg2: memref<1x64xf32, #tpu.memory_space<vmem>>, %arg3: memref<1x64xf32, #tpu.memory_space<vmem>>, %arg4: memref<1x64xf32, #tpu.memory_space<vmem>>, %arg5: memref<1x64xf32, #tpu.memory_space<vmem>>, %arg6: memref<1x64xf32, #tpu.memory_space<vmem>>, %arg7: memref<1x64xf32, #tpu.memory_space<vmem>>, %arg8: memref<64x192xbf16, #tpu.memory_space<vmem>>, %arg9: memref<1x64xf32, #tpu.memory_space<vmem>>, %arg10: memref<64x192xbf16, #tpu.memory_space<vmem>>, %arg11: memref<64x192xbf16, #tpu.memory_space<vmem>>, %arg12: memref<1x64xf32, #tpu.memory_space<vmem>>, %arg13: memref<1x64xf32, #tpu.memory_space<vmem>>, %arg14: memref<1x64xf32, #tpu.memory_space<vmem>>, %arg15: memref<1x64xf32, #tpu.memory_space<vmem>>, %arg16: memref<64x192xbf16, #tpu.memory_space<vmem>>, %arg17: memref<64x192xbf16, #tpu.memory_space<vmem>>, %arg18: memref<1x64xf32, #tpu.memory_space<vmem>>, %arg19: memref<1x64xf32, #tpu.memory_space<vmem>>, %arg20: memref<1x64xf32, #tpu.memory_space<vmem>>, %arg21: memref<1x64xf32, #tpu.memory_space<vmem>>, %arg22: memref<8x64xf32, #tpu.memory_space<vmem>>, %arg23: memref<8x8x64xf32, #tpu.memory_space<vmem>>, %arg24: memref<3x8x8x64xf32, #tpu.memory_space<vmem>>) attributes {dimension_semantics = [#tpu.dimension_semantics<parallel>], iteration_bounds = array<i64: 1>, scalar_prefetch = 0 : i64, scratch_operands = 2 : i64, tpu.core_type = #tpu.core_type<tc>, window_params = [{transform_indices = @transform_0, window_bounds = array<i64: 8, 8, 1>}, {pipeline_mode = #tpu.pipeline_mode<synchronous>, transform_indices = @transform_1, window_bounds = array<i64: 1, 64>}, {pipeline_mode = #tpu.pipeline_mode<synchronous>, transform_indices = @transform_2, window_bounds = array<i64: 1, 64>}, {pipeline_mode = #tpu.pipeline_mode<synchronous>, transform_indices = @transform_3, window_bounds = array<i64: 1, 64>}, {pipeline_mode = #tpu.pipeline_mode<synchronous>, transform_indices = @transform_4, window_bounds = array<i64: 1, 64>}, {pipeline_mode = #tpu.pipeline_mode<synchronous>, transform_indices = @transform_5, window_bounds = array<i64: 1, 64>}, {pipeline_mode = #tpu.pipeline_mode<synchronous>, transform_indices = @transform_6, window_bounds = array<i64: 1, 64>}, {pipeline_mode = #tpu.pipeline_mode<synchronous>, transform_indices = @transform_7, window_bounds = array<i64: 64, 192>}, {pipeline_mode = #tpu.pipeline_mode<synchronous>, transform_indices = @transform_8, window_bounds = array<i64: 1, 64>}, {pipeline_mode = #tpu.pipeline_mode<synchronous>, transform_indices = @transform_9, window_bounds = array<i64: 64, 192>}, {pipeline_mode = #tpu.pipeline_mode<synchronous>, transform_indices = @transform_10, window_bounds = array<i64: 64, 192>}, {pipeline_mode = #tpu.pipeline_mode<synchronous>, transform_indices = @transform_11, window_bounds = array<i64: 1, 64>}, {pipeline_mode = #tpu.pipeline_mode<synchronous>, transform_indices = @transform_12, window_bounds = array<i64: 1, 64>}, {pipeline_mode = #tpu.pipeline_mode<synchronous>, transform_indices = @transform_13, window_bounds = array<i64: 1, 64>}, {pipeline_mode = #tpu.pipeline_mode<synchronous>, transform_indices = @transform_14, window_bounds = array<i64: 1, 64>}, {pipeline_mode = #tpu.pipeline_mode<synchronous>, transform_indices = @transform_15, window_bounds = array<i64: 64, 192>}, {pipeline_mode = #tpu.pipeline_mode<synchronous>, transform_indices = @transform_16, window_bounds = array<i64: 64, 192>}, {pipeline_mode = #tpu.pipeline_mode<synchronous>, transform_indices = @transform_17, window_bounds = array<i64: 1, 64>}, {pipeline_mode = #tpu.pipeline_mode<synchronous>, transform_indices = @transform_18, window_bounds = array<i64: 1, 64>}, {pipeline_mode = #tpu.pipeline_mode<synchronous>, transform_indices = @transform_19, window_bounds = array<i64: 1, 64>}, {pipeline_mode = #tpu.pipeline_mode<synchronous>, transform_indices = @transform_20, window_bounds = array<i64: 1, 64>}, {transform_indices = @transform_21, window_bounds = array<i64: 8, 64>}]} {
    %c0 = arith.constant 0 : index
    %c0_0 = arith.constant 0 : index
    %c0_1 = arith.constant 0 : index
    %0 = vector.load %arg1[%c0, %c0_0, %c0_1] : memref<8x8x1xf32, #tpu.memory_space<vmem>>, vector<8x8x1xf32>
    %c0_2 = arith.constant 0 : index
    %c0_3 = arith.constant 0 : index
    %1 = vector.load %arg2[%c0_2, %c0_3] : memref<1x64xf32, #tpu.memory_space<vmem>>, vector<1x64xf32>
    %2 = vector.shape_cast %1 : vector<1x64xf32> to vector<1x1x64xf32>
    %3 = vector.broadcast %0 : vector<8x8x1xf32> to vector<8x8x64xf32>
    %4 = vector.broadcast %2 : vector<1x1x64xf32> to vector<8x8x64xf32>
    %5 = arith.mulf %3, %4 : vector<8x8x64xf32>
    %c0_4 = arith.constant 0 : index
    %c0_5 = arith.constant 0 : index
    %6 = vector.load %arg5[%c0_4, %c0_5] : memref<1x64xf32, #tpu.memory_space<vmem>>, vector<1x64xf32>
    %7 = vector.shape_cast %6 : vector<1x64xf32> to vector<1x1x64xf32>
    %8 = vector.broadcast %7 : vector<1x1x64xf32> to vector<8x8x64xf32>
    %9 = arith.addf %5, %8 : vector<8x8x64xf32>
    %c0_6 = arith.constant 0 : index
    %c0_7 = arith.constant 0 : index
    %c0_8 = arith.constant 0 : index
    %c0_9 = arith.constant 0 : index
    %10 = vector.load %arg24[%c0_6, %c0_7, %c0_8, %c0_9] : memref<3x8x8x64xf32, #tpu.memory_space<vmem>>, vector<1x8x8x64xf32>
    %11 = vector.shape_cast %10 : vector<1x8x8x64xf32> to vector<8x8x64xf32>
    %12 = vector.shape_cast %9 : vector<8x8x64xf32> to vector<1x8x8x64xf32>
    tpu.vector_store %arg24[%c0_6, %c0_7, %c0_8, %c0_9], %12 {strides = array<i32>} : memref<3x8x8x64xf32, #tpu.memory_space<vmem>>, vector<1x8x8x64xf32>,
    %c0_10 = arith.constant 0 : index
    %c0_11 = arith.constant 0 : index
    %13 = vector.load %arg3[%c0_10, %c0_11] : memref<1x64xf32, #tpu.memory_space<vmem>>, vector<1x64xf32>
    %14 = vector.shape_cast %13 : vector<1x64xf32> to vector<1x1x64xf32>
    %15 = vector.broadcast %0 : vector<8x8x1xf32> to vector<8x8x64xf32>
    %16 = vector.broadcast %14 : vector<1x1x64xf32> to vector<8x8x64xf32>
    %17 = arith.mulf %15, %16 : vector<8x8x64xf32>
    %c0_12 = arith.constant 0 : index
    %c0_13 = arith.constant 0 : index
    %18 = vector.load %arg6[%c0_12, %c0_13] : memref<1x64xf32, #tpu.memory_space<vmem>>, vector<1x64xf32>
    %19 = vector.shape_cast %18 : vector<1x64xf32> to vector<1x1x64xf32>
    %20 = vector.broadcast %19 : vector<1x1x64xf32> to vector<8x8x64xf32>
    %21 = arith.addf %17, %20 : vector<8x8x64xf32>
    %c1 = arith.constant 1 : index
    %c0_14 = arith.constant 0 : index
    %c0_15 = arith.constant 0 : index
    %c0_16 = arith.constant 0 : index
    %22 = vector.load %arg24[%c1, %c0_14, %c0_15, %c0_16] : memref<3x8x8x64xf32, #tpu.memory_space<vmem>>, vector<1x8x8x64xf32>
    %23 = vector.shape_cast %22 : vector<1x8x8x64xf32> to vector<8x8x64xf32>
    %24 = vector.shape_cast %21 : vector<8x8x64xf32> to vector<1x8x8x64xf32>
    tpu.vector_store %arg24[%c1, %c0_14, %c0_15, %c0_16], %24 {strides = array<i32>} : memref<3x8x8x64xf32, #tpu.memory_space<vmem>>, vector<1x8x8x64xf32>,
    %c0_17 = arith.constant 0 : index
    %c0_18 = arith.constant 0 : index
    %25 = vector.load %arg4[%c0_17, %c0_18] : memref<1x64xf32, #tpu.memory_space<vmem>>, vector<1x64xf32>
    %26 = vector.shape_cast %25 : vector<1x64xf32> to vector<1x1x64xf32>
    %27 = vector.broadcast %0 : vector<8x8x1xf32> to vector<8x8x64xf32>
    %28 = vector.broadcast %26 : vector<1x1x64xf32> to vector<8x8x64xf32>
    %29 = arith.mulf %27, %28 : vector<8x8x64xf32>
    %c0_19 = arith.constant 0 : index
    %c0_20 = arith.constant 0 : index
    %30 = vector.load %arg7[%c0_19, %c0_20] : memref<1x64xf32, #tpu.memory_space<vmem>>, vector<1x64xf32>
    %31 = vector.shape_cast %30 : vector<1x64xf32> to vector<1x1x64xf32>
    %32 = vector.broadcast %31 : vector<1x1x64xf32> to vector<8x8x64xf32>
    %33 = arith.addf %29, %32 : vector<8x8x64xf32>
    %c2 = arith.constant 2 : index
    %c0_21 = arith.constant 0 : index
    %c0_22 = arith.constant 0 : index
    %c0_23 = arith.constant 0 : index
    %34 = vector.load %arg24[%c2, %c0_21, %c0_22, %c0_23] : memref<3x8x8x64xf32, #tpu.memory_space<vmem>>, vector<1x8x8x64xf32>
    %35 = vector.shape_cast %34 : vector<1x8x8x64xf32> to vector<8x8x64xf32>
    %36 = vector.shape_cast %33 : vector<8x8x64xf32> to vector<1x8x8x64xf32>
    tpu.vector_store %arg24[%c2, %c0_21, %c0_22, %c0_23], %36 {strides = array<i32>} : memref<3x8x8x64xf32, #tpu.memory_space<vmem>>, vector<1x8x8x64xf32>,
    %c0_24 = arith.constant 0 : index
    %c0_25 = arith.constant 0 : index
    %37 = vector.load %arg8[%c0_24, %c0_25] : memref<64x192xbf16, #tpu.memory_space<vmem>>, vector<64x192xbf16>
    %c0_26 = arith.constant 0 : index
    %c0_27 = arith.constant 0 : index
    %38 = vector.load %arg9[%c0_26, %c0_27] : memref<1x64xf32, #tpu.memory_space<vmem>>, vector<1x64xf32>
    %39 = vector.shape_cast %38 : vector<1x64xf32> to vector<1x64xf32>
    %40 = vector.broadcast %39 : vector<1x64xf32> to vector<8x64xf32>
    %cst = arith.constant 0.000000e+00 : f32
    %41 = vector.broadcast %cst : f32 to vector<8x64xf32>
    %42 = arith.truncf %41 : vector<8x64xf32> to vector<8x64xbf16>
    %cst_28 = arith.constant dense<0.000000e+00> : vector<8x192xf32>
    %43 = tpu.matmul %42, %37, %cst_28 {dimension_numbers = #tpu.dot_dimension_numbers<[1], [0], [0], [1], [0, 0, 1, 1], [], []>} : vector<8x64xbf16>, vector<64x192xbf16>, vector<8x192xf32> -> vector<8x192xf32>
    %c0_29 = arith.constant 0 : index
    %c0_30 = arith.constant 0 : index
    %c0_31 = arith.constant 0 : index
    %c0_32 = arith.constant 0 : index
    %44 = vector.load %arg24[%c0_29, %c0_30, %c0_31, %c0_32] : memref<3x8x8x64xf32, #tpu.memory_space<vmem>>, vector<1x1x8x64xf32>
    %45 = vector.shape_cast %44 : vector<1x1x8x64xf32> to vector<8x64xf32>
    %46 = vector.extract_strided_slice %43 {offsets = [0, 0], sizes = [8, 64], strides = [1, 1]} : vector<8x192xf32> to vector<8x64xf32>
    %47 = arith.addf %45, %46 : vector<8x64xf32>
    %48 = arith.negf %47 : vector<8x64xf32>
    %49 = math.exp %48 : vector<8x64xf32>
    %cst_33 = arith.constant 1.000000e+00 : f32
    %50 = vector.broadcast %cst_33 : f32 to vector<8x64xf32>
    %51 = arith.addf %50, %49 : vector<8x64xf32>
    %52 = arith.divf %50, %51 : vector<8x64xf32>
    %c1_34 = arith.constant 1 : index
    %c0_35 = arith.constant 0 : index
    %c0_36 = arith.constant 0 : index
    %c0_37 = arith.constant 0 : index
    %53 = vector.load %arg24[%c1_34, %c0_35, %c0_36, %c0_37] : memref<3x8x8x64xf32, #tpu.memory_space<vmem>>, vector<1x1x8x64xf32>
    %54 = vector.shape_cast %53 : vector<1x1x8x64xf32> to vector<8x64xf32>
    %55 = vector.extract_strided_slice %43 {offsets = [0, 64], sizes = [8, 64], strides = [1, 1]} : vector<8x192xf32> to vector<8x64xf32>
    %56 = arith.addf %54, %55 : vector<8x64xf32>
    %57 = arith.negf %56 : vector<8x64xf32>
    %58 = math.exp %57 : vector<8x64xf32>
    %cst_38 = arith.constant 1.000000e+00 : f32
    %59 = vector.broadcast %cst_38 : f32 to vector<8x64xf32>
    %60 = arith.addf %59, %58 : vector<8x64xf32>
    %61 = arith.divf %59, %60 : vector<8x64xf32>
    %c2_39 = arith.constant 2 : index
    %c0_40 = arith.constant 0 : index
    %c0_41 = arith.constant 0 : index
    %c0_42 = arith.constant 0 : index
    %62 = vector.load %arg24[%c2_39, %c0_40, %c0_41, %c0_42] : memref<3x8x8x64xf32, #tpu.memory_space<vmem>>, vector<1x1x8x64xf32>
    %63 = vector.shape_cast %62 : vector<1x1x8x64xf32> to vector<8x64xf32>
    %64 = vector.extract_strided_slice %43 {offsets = [0, 128], sizes = [8, 64], strides = [1, 1]} : vector<8x192xf32> to vector<8x64xf32>
    %65 = arith.addf %64, %40 : vector<8x64xf32>
    %66 = arith.mulf %52, %65 : vector<8x64xf32>
    %67 = arith.addf %63, %66 : vector<8x64xf32>
    %68 = math.tanh %67 : vector<8x64xf32>
    %cst_43 = arith.constant 1.000000e+00 : f32
    %69 = vector.broadcast %cst_43 : f32 to vector<8x64xf32>
    %70 = arith.subf %69, %61 : vector<8x64xf32>
    %71 = arith.mulf %70, %68 : vector<8x64xf32>
    %72 = arith.mulf %61, %41 : vector<8x64xf32>
    %73 = arith.addf %71, %72 : vector<8x64xf32>
    %c0_44 = arith.constant 0 : index
    %c0_45 = arith.constant 0 : index
    %c0_46 = arith.constant 0 : index
    %74 = vector.load %arg23[%c0_44, %c0_45, %c0_46] : memref<8x8x64xf32, #tpu.memory_space<vmem>>, vector<1x8x64xf32>
    %75 = vector.shape_cast %74 : vector<1x8x64xf32> to vector<8x64xf32>
    %76 = vector.shape_cast %73 : vector<8x64xf32> to vector<1x8x64xf32>
    tpu.vector_store %arg23[%c0_44, %c0_45, %c0_46], %76 {strides = array<i32>} : memref<8x8x64xf32, #tpu.memory_space<vmem>>, vector<1x8x64xf32>,
    %77 = arith.truncf %73 : vector<8x64xf32> to vector<8x64xbf16>
    %cst_47 = arith.constant dense<0.000000e+00> : vector<8x192xf32>
    %78 = tpu.matmul %77, %37, %cst_47 {dimension_numbers = #tpu.dot_dimension_numbers<[1], [0], [0], [1], [0, 0, 1, 1], [], []>} : vector<8x64xbf16>, vector<64x192xbf16>, vector<8x192xf32> -> vector<8x192xf32>
    %c0_48 = arith.constant 0 : index
    %c1_49 = arith.constant 1 : index
    %c0_50 = arith.constant 0 : index
    %c0_51 = arith.constant 0 : index
    %79 = vector.load %arg24[%c0_48, %c1_49, %c0_50, %c0_51] : memref<3x8x8x64xf32, #tpu.memory_space<vmem>>, vector<1x1x8x64xf32>
    %80 = vector.shape_cast %79 : vector<1x1x8x64xf32> to vector<8x64xf32>
    %81 = vector.extract_strided_slice %78 {offsets = [0, 0], sizes = [8, 64], strides = [1, 1]} : vector<8x192xf32> to vector<8x64xf32>
    %82 = arith.addf %80, %81 : vector<8x64xf32>
    %83 = arith.negf %82 : vector<8x64xf32>
    %84 = math.exp %83 : vector<8x64xf32>
    %cst_52 = arith.constant 1.000000e+00 : f32
    %85 = vector.broadcast %cst_52 : f32 to vector<8x64xf32>
    %86 = arith.addf %85, %84 : vector<8x64xf32>
    %87 = arith.divf %85, %86 : vector<8x64xf32>
    %c1_53 = arith.constant 1 : index
    %c1_54 = arith.constant 1 : index
    %c0_55 = arith.constant 0 : index
    %c0_56 = arith.constant 0 : index
    %88 = vector.load %arg24[%c1_53, %c1_54, %c0_55, %c0_56] : memref<3x8x8x64xf32, #tpu.memory_space<vmem>>, vector<1x1x8x64xf32>
    %89 = vector.shape_cast %88 : vector<1x1x8x64xf32> to vector<8x64xf32>
    %90 = vector.extract_strided_slice %78 {offsets = [0, 64], sizes = [8, 64], strides = [1, 1]} : vector<8x192xf32> to vector<8x64xf32>
    %91 = arith.addf %89, %90 : vector<8x64xf32>
    %92 = arith.negf %91 : vector<8x64xf32>
    %93 = math.exp %92 : vector<8x64xf32>
    %cst_57 = arith.constant 1.000000e+00 : f32
    %94 = vector.broadcast %cst_57 : f32 to vector<8x64xf32>
    %95 = arith.addf %94, %93 : vector<8x64xf32>
    %96 = arith.divf %94, %95 : vector<8x64xf32>
    %c2_58 = arith.constant 2 : index
    %c1_59 = arith.constant 1 : index
    %c0_60 = arith.constant 0 : index
    %c0_61 = arith.constant 0 : index
    %97 = vector.load %arg24[%c2_58, %c1_59, %c0_60, %c0_61] : memref<3x8x8x64xf32, #tpu.memory_space<vmem>>, vector<1x1x8x64xf32>
    %98 = vector.shape_cast %97 : vector<1x1x8x64xf32> to vector<8x64xf32>
    %99 = vector.extract_strided_slice %78 {offsets = [0, 128], sizes = [8, 64], strides = [1, 1]} : vector<8x192xf32> to vector<8x64xf32>
    %100 = arith.addf %99, %40 : vector<8x64xf32>
    %101 = arith.mulf %87, %100 : vector<8x64xf32>
    %102 = arith.addf %98, %101 : vector<8x64xf32>
    %103 = math.tanh %102 : vector<8x64xf32>
    %cst_62 = arith.constant 1.000000e+00 : f32
    %104 = vector.broadcast %cst_62 : f32 to vector<8x64xf32>
    %105 = arith.subf %104, %96 : vector<8x64xf32>
    %106 = arith.mulf %105, %103 : vector<8x64xf32>
    %107 = arith.mulf %96, %73 : vector<8x64xf32>
    %108 = arith.addf %106, %107 : vector<8x64xf32>
    %c1_63 = arith.constant 1 : index
    %c0_64 = arith.constant 0 : index
    %c0_65 = arith.constant 0 : index
    %109 = vector.load %arg23[%c1_63, %c0_64, %c0_65] : memref<8x8x64xf32, #tpu.memory_space<vmem>>, vector<1x8x64xf32>
    %110 = vector.shape_cast %109 : vector<1x8x64xf32> to vector<8x64xf32>
    %111 = vector.shape_cast %108 : vector<8x64xf32> to vector<1x8x64xf32>
    tpu.vector_store %arg23[%c1_63, %c0_64, %c0_65], %111 {strides = array<i32>} : memref<8x8x64xf32, #tpu.memory_space<vmem>>, vector<1x8x64xf32>,
    %112 = arith.truncf %108 : vector<8x64xf32> to vector<8x64xbf16>
    %cst_66 = arith.constant dense<0.000000e+00> : vector<8x192xf32>
    %113 = tpu.matmul %112, %37, %cst_66 {dimension_numbers = #tpu.dot_dimension_numbers<[1], [0], [0], [1], [0, 0, 1, 1], [], []>} : vector<8x64xbf16>, vector<64x192xbf16>, vector<8x192xf32> -> vector<8x192xf32>
    %c0_67 = arith.constant 0 : index
    %c2_68 = arith.constant 2 : index
    %c0_69 = arith.constant 0 : index
    %c0_70 = arith.constant 0 : index
    %114 = vector.load %arg24[%c0_67, %c2_68, %c0_69, %c0_70] : memref<3x8x8x64xf32, #tpu.memory_space<vmem>>, vector<1x1x8x64xf32>
    %115 = vector.shape_cast %114 : vector<1x1x8x64xf32> to vector<8x64xf32>
    %116 = vector.extract_strided_slice %113 {offsets = [0, 0], sizes = [8, 64], strides = [1, 1]} : vector<8x192xf32> to vector<8x64xf32>
    %117 = arith.addf %115, %116 : vector<8x64xf32>
    %118 = arith.negf %117 : vector<8x64xf32>
    %119 = math.exp %118 : vector<8x64xf32>
    %cst_71 = arith.constant 1.000000e+00 : f32
    %120 = vector.broadcast %cst_71 : f32 to vector<8x64xf32>
    %121 = arith.addf %120, %119 : vector<8x64xf32>
    %122 = arith.divf %120, %121 : vector<8x64xf32>
    %c1_72 = arith.constant 1 : index
    %c2_73 = arith.constant 2 : index
    %c0_74 = arith.constant 0 : index
    %c0_75 = arith.constant 0 : index
    %123 = vector.load %arg24[%c1_72, %c2_73, %c0_74, %c0_75] : memref<3x8x8x64xf32, #tpu.memory_space<vmem>>, vector<1x1x8x64xf32>
    %124 = vector.shape_cast %123 : vector<1x1x8x64xf32> to vector<8x64xf32>
    %125 = vector.extract_strided_slice %113 {offsets = [0, 64], sizes = [8, 64], strides = [1, 1]} : vector<8x192xf32> to vector<8x64xf32>
    %126 = arith.addf %124, %125 : vector<8x64xf32>
    %127 = arith.negf %126 : vector<8x64xf32>
    %128 = math.exp %127 : vector<8x64xf32>
    %cst_76 = arith.constant 1.000000e+00 : f32
    %129 = vector.broadcast %cst_76 : f32 to vector<8x64xf32>
    %130 = arith.addf %129, %128 : vector<8x64xf32>
    %131 = arith.divf %129, %130 : vector<8x64xf32>
    %c2_77 = arith.constant 2 : index
    %c2_78 = arith.constant 2 : index
    %c0_79 = arith.constant 0 : index
    %c0_80 = arith.constant 0 : index
    %132 = vector.load %arg24[%c2_77, %c2_78, %c0_79, %c0_80] : memref<3x8x8x64xf32, #tpu.memory_space<vmem>>, vector<1x1x8x64xf32>
    %133 = vector.shape_cast %132 : vector<1x1x8x64xf32> to vector<8x64xf32>
    %134 = vector.extract_strided_slice %113 {offsets = [0, 128], sizes = [8, 64], strides = [1, 1]} : vector<8x192xf32> to vector<8x64xf32>
    %135 = arith.addf %134, %40 : vector<8x64xf32>
    %136 = arith.mulf %122, %135 : vector<8x64xf32>
    %137 = arith.addf %133, %136 : vector<8x64xf32>
    %138 = math.tanh %137 : vector<8x64xf32>
    %cst_81 = arith.constant 1.000000e+00 : f32
    %139 = vector.broadcast %cst_81 : f32 to vector<8x64xf32>
    %140 = arith.subf %139, %131 : vector<8x64xf32>
    %141 = arith.mulf %140, %138 : vector<8x64xf32>
    %142 = arith.mulf %131, %108 : vector<8x64xf32>
    %143 = arith.addf %141, %142 : vector<8x64xf32>
    %c2_82 = arith.constant 2 : index
    %c0_83 = arith.constant 0 : index
    %c0_84 = arith.constant 0 : index
    %144 = vector.load %arg23[%c2_82, %c0_83, %c0_84] : memref<8x8x64xf32, #tpu.memory_space<vmem>>, vector<1x8x64xf32>
    %145 = vector.shape_cast %144 : vector<1x8x64xf32> to vector<8x64xf32>
    %146 = vector.shape_cast %143 : vector<8x64xf32> to vector<1x8x64xf32>
    tpu.vector_store %arg23[%c2_82, %c0_83, %c0_84], %146 {strides = array<i32>} : memref<8x8x64xf32, #tpu.memory_space<vmem>>, vector<1x8x64xf32>,
    %147 = arith.truncf %143 : vector<8x64xf32> to vector<8x64xbf16>
    %cst_85 = arith.constant dense<0.000000e+00> : vector<8x192xf32>
    %148 = tpu.matmul %147, %37, %cst_85 {dimension_numbers = #tpu.dot_dimension_numbers<[1], [0], [0], [1], [0, 0, 1, 1], [], []>} : vector<8x64xbf16>, vector<64x192xbf16>, vector<8x192xf32> -> vector<8x192xf32>
    %c0_86 = arith.constant 0 : index
    %c3 = arith.constant 3 : index
    %c0_87 = arith.constant 0 : index
    %c0_88 = arith.constant 0 : index
    %149 = vector.load %arg24[%c0_86, %c3, %c0_87, %c0_88] : memref<3x8x8x64xf32, #tpu.memory_space<vmem>>, vector<1x1x8x64xf32>
    %150 = vector.shape_cast %149 : vector<1x1x8x64xf32> to vector<8x64xf32>
    %151 = vector.extract_strided_slice %148 {offsets = [0, 0], sizes = [8, 64], strides = [1, 1]} : vector<8x192xf32> to vector<8x64xf32>
    %152 = arith.addf %150, %151 : vector<8x64xf32>
    %153 = arith.negf %152 : vector<8x64xf32>
    %154 = math.exp %153 : vector<8x64xf32>
    %cst_89 = arith.constant 1.000000e+00 : f32
    %155 = vector.broadcast %cst_89 : f32 to vector<8x64xf32>
    %156 = arith.addf %155, %154 : vector<8x64xf32>
    %157 = arith.divf %155, %156 : vector<8x64xf32>
    %c1_90 = arith.constant 1 : index
    %c3_91 = arith.constant 3 : index
    %c0_92 = arith.constant 0 : index
    %c0_93 = arith.constant 0 : index
    %158 = vector.load %arg24[%c1_90, %c3_91, %c0_92, %c0_93] : memref<3x8x8x64xf32, #tpu.memory_space<vmem>>, vector<1x1x8x64xf32>
    %159 = vector.shape_cast %158 : vector<1x1x8x64xf32> to vector<8x64xf32>
    %160 = vector.extract_strided_slice %148 {offsets = [0, 64], sizes = [8, 64], strides = [1, 1]} : vector<8x192xf32> to vector<8x64xf32>
    %161 = arith.addf %159, %160 : vector<8x64xf32>
    %162 = arith.negf %161 : vector<8x64xf32>
    %163 = math.exp %162 : vector<8x64xf32>
    %cst_94 = arith.constant 1.000000e+00 : f32
    %164 = vector.broadcast %cst_94 : f32 to vector<8x64xf32>
    %165 = arith.addf %164, %163 : vector<8x64xf32>
    %166 = arith.divf %164, %165 : vector<8x64xf32>
    %c2_95 = arith.constant 2 : index
    %c3_96 = arith.constant 3 : index
    %c0_97 = arith.constant 0 : index
    %c0_98 = arith.constant 0 : index
    %167 = vector.load %arg24[%c2_95, %c3_96, %c0_97, %c0_98] : memref<3x8x8x64xf32, #tpu.memory_space<vmem>>, vector<1x1x8x64xf32>
    %168 = vector.shape_cast %167 : vector<1x1x8x64xf32> to vector<8x64xf32>
    %169 = vector.extract_strided_slice %148 {offsets = [0, 128], sizes = [8, 64], strides = [1, 1]} : vector<8x192xf32> to vector<8x64xf32>
    %170 = arith.addf %169, %40 : vector<8x64xf32>
    %171 = arith.mulf %157, %170 : vector<8x64xf32>
    %172 = arith.addf %168, %171 : vector<8x64xf32>
    %173 = math.tanh %172 : vector<8x64xf32>
    %cst_99 = arith.constant 1.000000e+00 : f32
    %174 = vector.broadcast %cst_99 : f32 to vector<8x64xf32>
    %175 = arith.subf %174, %166 : vector<8x64xf32>
    %176 = arith.mulf %175, %173 : vector<8x64xf32>
    %177 = arith.mulf %166, %143 : vector<8x64xf32>
    %178 = arith.addf %176, %177 : vector<8x64xf32>
    %c3_100 = arith.constant 3 : index
    %c0_101 = arith.constant 0 : index
    %c0_102 = arith.constant 0 : index
    %179 = vector.load %arg23[%c3_100, %c0_101, %c0_102] : memref<8x8x64xf32, #tpu.memory_space<vmem>>, vector<1x8x64xf32>
    %180 = vector.shape_cast %179 : vector<1x8x64xf32> to vector<8x64xf32>
    %181 = vector.shape_cast %178 : vector<8x64xf32> to vector<1x8x64xf32>
    tpu.vector_store %arg23[%c3_100, %c0_101, %c0_102], %181 {strides = array<i32>} : memref<8x8x64xf32, #tpu.memory_space<vmem>>, vector<1x8x64xf32>,
    %182 = arith.truncf %178 : vector<8x64xf32> to vector<8x64xbf16>
    %cst_103 = arith.constant dense<0.000000e+00> : vector<8x192xf32>
    %183 = tpu.matmul %182, %37, %cst_103 {dimension_numbers = #tpu.dot_dimension_numbers<[1], [0], [0], [1], [0, 0, 1, 1], [], []>} : vector<8x64xbf16>, vector<64x192xbf16>, vector<8x192xf32> -> vector<8x192xf32>
    %c0_104 = arith.constant 0 : index
    %c4 = arith.constant 4 : index
    %c0_105 = arith.constant 0 : index
    %c0_106 = arith.constant 0 : index
    %184 = vector.load %arg24[%c0_104, %c4, %c0_105, %c0_106] : memref<3x8x8x64xf32, #tpu.memory_space<vmem>>, vector<1x1x8x64xf32>
    %185 = vector.shape_cast %184 : vector<1x1x8x64xf32> to vector<8x64xf32>
    %186 = vector.extract_strided_slice %183 {offsets = [0, 0], sizes = [8, 64], strides = [1, 1]} : vector<8x192xf32> to vector<8x64xf32>
    %187 = arith.addf %185, %186 : vector<8x64xf32>
    %188 = arith.negf %187 : vector<8x64xf32>
    %189 = math.exp %188 : vector<8x64xf32>
    %cst_107 = arith.constant 1.000000e+00 : f32
    %190 = vector.broadcast %cst_107 : f32 to vector<8x64xf32>
    %191 = arith.addf %190, %189 : vector<8x64xf32>
    %192 = arith.divf %190, %191 : vector<8x64xf32>
    %c1_108 = arith.constant 1 : index
    %c4_109 = arith.constant 4 : index
    %c0_110 = arith.constant 0 : index
    %c0_111 = arith.constant 0 : index
    %193 = vector.load %arg24[%c1_108, %c4_109, %c0_110, %c0_111] : memref<3x8x8x64xf32, #tpu.memory_space<vmem>>, vector<1x1x8x64xf32>
    %194 = vector.shape_cast %193 : vector<1x1x8x64xf32> to vector<8x64xf32>
    %195 = vector.extract_strided_slice %183 {offsets = [0, 64], sizes = [8, 64], strides = [1, 1]} : vector<8x192xf32> to vector<8x64xf32>
    %196 = arith.addf %194, %195 : vector<8x64xf32>
    %197 = arith.negf %196 : vector<8x64xf32>
    %198 = math.exp %197 : vector<8x64xf32>
    %cst_112 = arith.constant 1.000000e+00 : f32
    %199 = vector.broadcast %cst_112 : f32 to vector<8x64xf32>
    %200 = arith.addf %199, %198 : vector<8x64xf32>
    %201 = arith.divf %199, %200 : vector<8x64xf32>
    %c2_113 = arith.constant 2 : index
    %c4_114 = arith.constant 4 : index
    %c0_115 = arith.constant 0 : index
    %c0_116 = arith.constant 0 : index
    %202 = vector.load %arg24[%c2_113, %c4_114, %c0_115, %c0_116] : memref<3x8x8x64xf32, #tpu.memory_space<vmem>>, vector<1x1x8x64xf32>
    %203 = vector.shape_cast %202 : vector<1x1x8x64xf32> to vector<8x64xf32>
    %204 = vector.extract_strided_slice %183 {offsets = [0, 128], sizes = [8, 64], strides = [1, 1]} : vector<8x192xf32> to vector<8x64xf32>
    %205 = arith.addf %204, %40 : vector<8x64xf32>
    %206 = arith.mulf %192, %205 : vector<8x64xf32>
    %207 = arith.addf %203, %206 : vector<8x64xf32>
    %208 = math.tanh %207 : vector<8x64xf32>
    %cst_117 = arith.constant 1.000000e+00 : f32
    %209 = vector.broadcast %cst_117 : f32 to vector<8x64xf32>
    %210 = arith.subf %209, %201 : vector<8x64xf32>
    %211 = arith.mulf %210, %208 : vector<8x64xf32>
    %212 = arith.mulf %201, %178 : vector<8x64xf32>
    %213 = arith.addf %211, %212 : vector<8x64xf32>
    %c4_118 = arith.constant 4 : index
    %c0_119 = arith.constant 0 : index
    %c0_120 = arith.constant 0 : index
    %214 = vector.load %arg23[%c4_118, %c0_119, %c0_120] : memref<8x8x64xf32, #tpu.memory_space<vmem>>, vector<1x8x64xf32>
    %215 = vector.shape_cast %214 : vector<1x8x64xf32> to vector<8x64xf32>
    %216 = vector.shape_cast %213 : vector<8x64xf32> to vector<1x8x64xf32>
    tpu.vector_store %arg23[%c4_118, %c0_119, %c0_120], %216 {strides = array<i32>} : memref<8x8x64xf32, #tpu.memory_space<vmem>>, vector<1x8x64xf32>,
    %217 = arith.truncf %213 : vector<8x64xf32> to vector<8x64xbf16>
    %cst_121 = arith.constant dense<0.000000e+00> : vector<8x192xf32>
    %218 = tpu.matmul %217, %37, %cst_121 {dimension_numbers = #tpu.dot_dimension_numbers<[1], [0], [0], [1], [0, 0, 1, 1], [], []>} : vector<8x64xbf16>, vector<64x192xbf16>, vector<8x192xf32> -> vector<8x192xf32>
    %c0_122 = arith.constant 0 : index
    %c5 = arith.constant 5 : index
    %c0_123 = arith.constant 0 : index
    %c0_124 = arith.constant 0 : index
    %219 = vector.load %arg24[%c0_122, %c5, %c0_123, %c0_124] : memref<3x8x8x64xf32, #tpu.memory_space<vmem>>, vector<1x1x8x64xf32>
    %220 = vector.shape_cast %219 : vector<1x1x8x64xf32> to vector<8x64xf32>
    %221 = vector.extract_strided_slice %218 {offsets = [0, 0], sizes = [8, 64], strides = [1, 1]} : vector<8x192xf32> to vector<8x64xf32>
    %222 = arith.addf %220, %221 : vector<8x64xf32>
    %223 = arith.negf %222 : vector<8x64xf32>
    %224 = math.exp %223 : vector<8x64xf32>
    %cst_125 = arith.constant 1.000000e+00 : f32
    %225 = vector.broadcast %cst_125 : f32 to vector<8x64xf32>
    %226 = arith.addf %225, %224 : vector<8x64xf32>
    %227 = arith.divf %225, %226 : vector<8x64xf32>
    %c1_126 = arith.constant 1 : index
    %c5_127 = arith.constant 5 : index
    %c0_128 = arith.constant 0 : index
    %c0_129 = arith.constant 0 : index
    %228 = vector.load %arg24[%c1_126, %c5_127, %c0_128, %c0_129] : memref<3x8x8x64xf32, #tpu.memory_space<vmem>>, vector<1x1x8x64xf32>
    %229 = vector.shape_cast %228 : vector<1x1x8x64xf32> to vector<8x64xf32>
    %230 = vector.extract_strided_slice %218 {offsets = [0, 64], sizes = [8, 64], strides = [1, 1]} : vector<8x192xf32> to vector<8x64xf32>
    %231 = arith.addf %229, %230 : vector<8x64xf32>
    %232 = arith.negf %231 : vector<8x64xf32>
    %233 = math.exp %232 : vector<8x64xf32>
    %cst_130 = arith.constant 1.000000e+00 : f32
    %234 = vector.broadcast %cst_130 : f32 to vector<8x64xf32>
    %235 = arith.addf %234, %233 : vector<8x64xf32>
    %236 = arith.divf %234, %235 : vector<8x64xf32>
    %c2_131 = arith.constant 2 : index
    %c5_132 = arith.constant 5 : index
    %c0_133 = arith.constant 0 : index
    %c0_134 = arith.constant 0 : index
    %237 = vector.load %arg24[%c2_131, %c5_132, %c0_133, %c0_134] : memref<3x8x8x64xf32, #tpu.memory_space<vmem>>, vector<1x1x8x64xf32>
    %238 = vector.shape_cast %237 : vector<1x1x8x64xf32> to vector<8x64xf32>
    %239 = vector.extract_strided_slice %218 {offsets = [0, 128], sizes = [8, 64], strides = [1, 1]} : vector<8x192xf32> to vector<8x64xf32>
    %240 = arith.addf %239, %40 : vector<8x64xf32>
    %241 = arith.mulf %227, %240 : vector<8x64xf32>
    %242 = arith.addf %238, %241 : vector<8x64xf32>
    %243 = math.tanh %242 : vector<8x64xf32>
    %cst_135 = arith.constant 1.000000e+00 : f32
    %244 = vector.broadcast %cst_135 : f32 to vector<8x64xf32>
    %245 = arith.subf %244, %236 : vector<8x64xf32>
    %246 = arith.mulf %245, %243 : vector<8x64xf32>
    %247 = arith.mulf %236, %213 : vector<8x64xf32>
    %248 = arith.addf %246, %247 : vector<8x64xf32>
    %c5_136 = arith.constant 5 : index
    %c0_137 = arith.constant 0 : index
    %c0_138 = arith.constant 0 : index
    %249 = vector.load %arg23[%c5_136, %c0_137, %c0_138] : memref<8x8x64xf32, #tpu.memory_space<vmem>>, vector<1x8x64xf32>
    %250 = vector.shape_cast %249 : vector<1x8x64xf32> to vector<8x64xf32>
    %251 = vector.shape_cast %248 : vector<8x64xf32> to vector<1x8x64xf32>
    tpu.vector_store %arg23[%c5_136, %c0_137, %c0_138], %251 {strides = array<i32>} : memref<8x8x64xf32, #tpu.memory_space<vmem>>, vector<1x8x64xf32>,
    %252 = arith.truncf %248 : vector<8x64xf32> to vector<8x64xbf16>
    %cst_139 = arith.constant dense<0.000000e+00> : vector<8x192xf32>
    %253 = tpu.matmul %252, %37, %cst_139 {dimension_numbers = #tpu.dot_dimension_numbers<[1], [0], [0], [1], [0, 0, 1, 1], [], []>} : vector<8x64xbf16>, vector<64x192xbf16>, vector<8x192xf32> -> vector<8x192xf32>
    %c0_140 = arith.constant 0 : index
    %c6 = arith.constant 6 : index
    %c0_141 = arith.constant 0 : index
    %c0_142 = arith.constant 0 : index
    %254 = vector.load %arg24[%c0_140, %c6, %c0_141, %c0_142] : memref<3x8x8x64xf32, #tpu.memory_space<vmem>>, vector<1x1x8x64xf32>
    %255 = vector.shape_cast %254 : vector<1x1x8x64xf32> to vector<8x64xf32>
    %256 = vector.extract_strided_slice %253 {offsets = [0, 0], sizes = [8, 64], strides = [1, 1]} : vector<8x192xf32> to vector<8x64xf32>
    %257 = arith.addf %255, %256 : vector<8x64xf32>
    %258 = arith.negf %257 : vector<8x64xf32>
    %259 = math.exp %258 : vector<8x64xf32>
    %cst_143 = arith.constant 1.000000e+00 : f32
    %260 = vector.broadcast %cst_143 : f32 to vector<8x64xf32>
    %261 = arith.addf %260, %259 : vector<8x64xf32>
    %262 = arith.divf %260, %261 : vector<8x64xf32>
    %c1_144 = arith.constant 1 : index
    %c6_145 = arith.constant 6 : index
    %c0_146 = arith.constant 0 : index
    %c0_147 = arith.constant 0 : index
    %263 = vector.load %arg24[%c1_144, %c6_145, %c0_146, %c0_147] : memref<3x8x8x64xf32, #tpu.memory_space<vmem>>, vector<1x1x8x64xf32>
    %264 = vector.shape_cast %263 : vector<1x1x8x64xf32> to vector<8x64xf32>
    %265 = vector.extract_strided_slice %253 {offsets = [0, 64], sizes = [8, 64], strides = [1, 1]} : vector<8x192xf32> to vector<8x64xf32>
    %266 = arith.addf %264, %265 : vector<8x64xf32>
    %267 = arith.negf %266 : vector<8x64xf32>
    %268 = math.exp %267 : vector<8x64xf32>
    %cst_148 = arith.constant 1.000000e+00 : f32
    %269 = vector.broadcast %cst_148 : f32 to vector<8x64xf32>
    %270 = arith.addf %269, %268 : vector<8x64xf32>
    %271 = arith.divf %269, %270 : vector<8x64xf32>
    %c2_149 = arith.constant 2 : index
    %c6_150 = arith.constant 6 : index
    %c0_151 = arith.constant 0 : index
    %c0_152 = arith.constant 0 : index
    %272 = vector.load %arg24[%c2_149, %c6_150, %c0_151, %c0_152] : memref<3x8x8x64xf32, #tpu.memory_space<vmem>>, vector<1x1x8x64xf32>
    %273 = vector.shape_cast %272 : vector<1x1x8x64xf32> to vector<8x64xf32>
    %274 = vector.extract_strided_slice %253 {offsets = [0, 128], sizes = [8, 64], strides = [1, 1]} : vector<8x192xf32> to vector<8x64xf32>
    %275 = arith.addf %274, %40 : vector<8x64xf32>
    %276 = arith.mulf %262, %275 : vector<8x64xf32>
    %277 = arith.addf %273, %276 : vector<8x64xf32>
    %278 = math.tanh %277 : vector<8x64xf32>
    %cst_153 = arith.constant 1.000000e+00 : f32
    %279 = vector.broadcast %cst_153 : f32 to vector<8x64xf32>
    %280 = arith.subf %279, %271 : vector<8x64xf32>
    %281 = arith.mulf %280, %278 : vector<8x64xf32>
    %282 = arith.mulf %271, %248 : vector<8x64xf32>
    %283 = arith.addf %281, %282 : vector<8x64xf32>
    %c6_154 = arith.constant 6 : index
    %c0_155 = arith.constant 0 : index
    %c0_156 = arith.constant 0 : index
    %284 = vector.load %arg23[%c6_154, %c0_155, %c0_156] : memref<8x8x64xf32, #tpu.memory_space<vmem>>, vector<1x8x64xf32>
    %285 = vector.shape_cast %284 : vector<1x8x64xf32> to vector<8x64xf32>
    %286 = vector.shape_cast %283 : vector<8x64xf32> to vector<1x8x64xf32>
    tpu.vector_store %arg23[%c6_154, %c0_155, %c0_156], %286 {strides = array<i32>} : memref<8x8x64xf32, #tpu.memory_space<vmem>>, vector<1x8x64xf32>,
    %287 = arith.truncf %283 : vector<8x64xf32> to vector<8x64xbf16>
    %cst_157 = arith.constant dense<0.000000e+00> : vector<8x192xf32>
    %288 = tpu.matmul %287, %37, %cst_157 {dimension_numbers = #tpu.dot_dimension_numbers<[1], [0], [0], [1], [0, 0, 1, 1], [], []>} : vector<8x64xbf16>, vector<64x192xbf16>, vector<8x192xf32> -> vector<8x192xf32>
    %c0_158 = arith.constant 0 : index
    %c7 = arith.constant 7 : index
    %c0_159 = arith.constant 0 : index
    %c0_160 = arith.constant 0 : index
    %289 = vector.load %arg24[%c0_158, %c7, %c0_159, %c0_160] : memref<3x8x8x64xf32, #tpu.memory_space<vmem>>, vector<1x1x8x64xf32>
    %290 = vector.shape_cast %289 : vector<1x1x8x64xf32> to vector<8x64xf32>
    %291 = vector.extract_strided_slice %288 {offsets = [0, 0], sizes = [8, 64], strides = [1, 1]} : vector<8x192xf32> to vector<8x64xf32>
    %292 = arith.addf %290, %291 : vector<8x64xf32>
    %293 = arith.negf %292 : vector<8x64xf32>
    %294 = math.exp %293 : vector<8x64xf32>
    %cst_161 = arith.constant 1.000000e+00 : f32
    %295 = vector.broadcast %cst_161 : f32 to vector<8x64xf32>
    %296 = arith.addf %295, %294 : vector<8x64xf32>
    %297 = arith.divf %295, %296 : vector<8x64xf32>
    %c1_162 = arith.constant 1 : index
    %c7_163 = arith.constant 7 : index
    %c0_164 = arith.constant 0 : index
    %c0_165 = arith.constant 0 : index
    %298 = vector.load %arg24[%c1_162, %c7_163, %c0_164, %c0_165] : memref<3x8x8x64xf32, #tpu.memory_space<vmem>>, vector<1x1x8x64xf32>
    %299 = vector.shape_cast %298 : vector<1x1x8x64xf32> to vector<8x64xf32>
    %300 = vector.extract_strided_slice %288 {offsets = [0, 64], sizes = [8, 64], strides = [1, 1]} : vector<8x192xf32> to vector<8x64xf32>
    %301 = arith.addf %299, %300 : vector<8x64xf32>
    %302 = arith.negf %301 : vector<8x64xf32>
    %303 = math.exp %302 : vector<8x64xf32>
    %cst_166 = arith.constant 1.000000e+00 : f32
    %304 = vector.broadcast %cst_166 : f32 to vector<8x64xf32>
    %305 = arith.addf %304, %303 : vector<8x64xf32>
    %306 = arith.divf %304, %305 : vector<8x64xf32>
    %c2_167 = arith.constant 2 : index
    %c7_168 = arith.constant 7 : index
    %c0_169 = arith.constant 0 : index
    %c0_170 = arith.constant 0 : index
    %307 = vector.load %arg24[%c2_167, %c7_168, %c0_169, %c0_170] : memref<3x8x8x64xf32, #tpu.memory_space<vmem>>, vector<1x1x8x64xf32>
    %308 = vector.shape_cast %307 : vector<1x1x8x64xf32> to vector<8x64xf32>
    %309 = vector.extract_strided_slice %288 {offsets = [0, 128], sizes = [8, 64], strides = [1, 1]} : vector<8x192xf32> to vector<8x64xf32>
    %310 = arith.addf %309, %40 : vector<8x64xf32>
    %311 = arith.mulf %297, %310 : vector<8x64xf32>
    %312 = arith.addf %308, %311 : vector<8x64xf32>
    %313 = math.tanh %312 : vector<8x64xf32>
    %cst_171 = arith.constant 1.000000e+00 : f32
    %314 = vector.broadcast %cst_171 : f32 to vector<8x64xf32>
    %315 = arith.subf %314, %306 : vector<8x64xf32>
    %316 = arith.mulf %315, %313 : vector<8x64xf32>
    %317 = arith.mulf %306, %283 : vector<8x64xf32>
    %318 = arith.addf %316, %317 : vector<8x64xf32>
    %c7_172 = arith.constant 7 : index
    %c0_173 = arith.constant 0 : index
    %c0_174 = arith.constant 0 : index
    %319 = vector.load %arg23[%c7_172, %c0_173, %c0_174] : memref<8x8x64xf32, #tpu.memory_space<vmem>>, vector<1x8x64xf32>
    %320 = vector.shape_cast %319 : vector<1x8x64xf32> to vector<8x64xf32>
    %321 = vector.shape_cast %318 : vector<8x64xf32> to vector<1x8x64xf32>
    tpu.vector_store %arg23[%c7_172, %c0_173, %c0_174], %321 {strides = array<i32>} : memref<8x8x64xf32, #tpu.memory_space<vmem>>, vector<1x8x64xf32>,
    %c0_175 = arith.constant 0 : index
    %c0_176 = arith.constant 0 : index
    %c0_177 = arith.constant 0 : index
    %322 = vector.load %arg23[%c0_175, %c0_176, %c0_177] : memref<8x8x64xf32, #tpu.memory_space<vmem>>, vector<8x8x64xf32>
    %323 = vector.shape_cast %322 : vector<8x8x64xf32> to vector<64x64xf32>
    %324 = arith.truncf %323 : vector<64x64xf32> to vector<64x64xbf16>
    %c0_178 = arith.constant 0 : index
    %c0_179 = arith.constant 0 : index
    %325 = vector.load %arg10[%c0_178, %c0_179] : memref<64x192xbf16, #tpu.memory_space<vmem>>, vector<64x192xbf16>
    %cst_180 = arith.constant dense<0.000000e+00> : vector<64x192xf32>
    %326 = tpu.matmul %324, %325, %cst_180 {dimension_numbers = #tpu.dot_dimension_numbers<[1], [0], [0], [1], [0, 0, 1, 1], [], []>} : vector<64x64xbf16>, vector<64x192xbf16>, vector<64x192xf32> -> vector<64x192xf32>
    %327 = vector.extract_strided_slice %326 {offsets = [0, 0], sizes = [64, 64], strides = [1, 1]} : vector<64x192xf32> to vector<64x64xf32>
    %c0_181 = arith.constant 0 : index
    %c0_182 = arith.constant 0 : index
    %328 = vector.load %arg12[%c0_181, %c0_182] : memref<1x64xf32, #tpu.memory_space<vmem>>, vector<1x64xf32>
    %329 = vector.broadcast %328 : vector<1x64xf32> to vector<64x64xf32>
    %330 = arith.addf %327, %329 : vector<64x64xf32>
    %331 = vector.shape_cast %330 : vector<64x64xf32> to vector<8x8x64xf32>
    %c0_183 = arith.constant 0 : index
    %c0_184 = arith.constant 0 : index
    %c0_185 = arith.constant 0 : index
    %c0_186 = arith.constant 0 : index
    %332 = vector.load %arg24[%c0_183, %c0_184, %c0_185, %c0_186] : memref<3x8x8x64xf32, #tpu.memory_space<vmem>>, vector<1x8x8x64xf32>
    %333 = vector.shape_cast %332 : vector<1x8x8x64xf32> to vector<8x8x64xf32>
    %334 = vector.shape_cast %331 : vector<8x8x64xf32> to vector<1x8x8x64xf32>
    tpu.vector_store %arg24[%c0_183, %c0_184, %c0_185, %c0_186], %334 {strides = array<i32>} : memref<3x8x8x64xf32, #tpu.memory_space<vmem>>, vector<1x8x8x64xf32>,
    %335 = vector.extract_strided_slice %326 {offsets = [0, 64], sizes = [64, 64], strides = [1, 1]} : vector<64x192xf32> to vector<64x64xf32>
    %c0_187 = arith.constant 0 : index
    %c0_188 = arith.constant 0 : index
    %336 = vector.load %arg13[%c0_187, %c0_188] : memref<1x64xf32, #tpu.memory_space<vmem>>, vector<1x64xf32>
    %337 = vector.broadcast %336 : vector<1x64xf32> to vector<64x64xf32>
    %338 = arith.addf %335, %337 : vector<64x64xf32>
    %339 = vector.shape_cast %338 : vector<64x64xf32> to vector<8x8x64xf32>
    %c1_189 = arith.constant 1 : index
    %c0_190 = arith.constant 0 : index
    %c0_191 = arith.constant 0 : index
    %c0_192 = arith.constant 0 : index
    %340 = vector.load %arg24[%c1_189, %c0_190, %c0_191, %c0_192] : memref<3x8x8x64xf32, #tpu.memory_space<vmem>>, vector<1x8x8x64xf32>
    %341 = vector.shape_cast %340 : vector<1x8x8x64xf32> to vector<8x8x64xf32>
    %342 = vector.shape_cast %339 : vector<8x8x64xf32> to vector<1x8x8x64xf32>
    tpu.vector_store %arg24[%c1_189, %c0_190, %c0_191, %c0_192], %342 {strides = array<i32>} : memref<3x8x8x64xf32, #tpu.memory_space<vmem>>, vector<1x8x8x64xf32>,
    %343 = vector.extract_strided_slice %326 {offsets = [0, 128], sizes = [64, 64], strides = [1, 1]} : vector<64x192xf32> to vector<64x64xf32>
    %c0_193 = arith.constant 0 : index
    %c0_194 = arith.constant 0 : index
    %344 = vector.load %arg14[%c0_193, %c0_194] : memref<1x64xf32, #tpu.memory_space<vmem>>, vector<1x64xf32>
    %345 = vector.broadcast %344 : vector<1x64xf32> to vector<64x64xf32>
    %346 = arith.addf %343, %345 : vector<64x64xf32>
    %347 = vector.shape_cast %346 : vector<64x64xf32> to vector<8x8x64xf32>
    %c2_195 = arith.constant 2 : index
    %c0_196 = arith.constant 0 : index
    %c0_197 = arith.constant 0 : index
    %c0_198 = arith.constant 0 : index
    %348 = vector.load %arg24[%c2_195, %c0_196, %c0_197, %c0_198] : memref<3x8x8x64xf32, #tpu.memory_space<vmem>>, vector<1x8x8x64xf32>
    %349 = vector.shape_cast %348 : vector<1x8x8x64xf32> to vector<8x8x64xf32>
    %350 = vector.shape_cast %347 : vector<8x8x64xf32> to vector<1x8x8x64xf32>
    tpu.vector_store %arg24[%c2_195, %c0_196, %c0_197, %c0_198], %350 {strides = array<i32>} : memref<3x8x8x64xf32, #tpu.memory_space<vmem>>, vector<1x8x8x64xf32>,
    %c0_199 = arith.constant 0 : index
    %c0_200 = arith.constant 0 : index
    %351 = vector.load %arg11[%c0_199, %c0_200] : memref<64x192xbf16, #tpu.memory_space<vmem>>, vector<64x192xbf16>
    %c0_201 = arith.constant 0 : index
    %c0_202 = arith.constant 0 : index
    %352 = vector.load %arg15[%c0_201, %c0_202] : memref<1x64xf32, #tpu.memory_space<vmem>>, vector<1x64xf32>
    %353 = vector.shape_cast %352 : vector<1x64xf32> to vector<1x64xf32>
    %354 = vector.broadcast %353 : vector<1x64xf32> to vector<8x64xf32>
    %cst_203 = arith.constant 0.000000e+00 : f32
    %355 = vector.broadcast %cst_203 : f32 to vector<8x64xf32>
    %356 = arith.truncf %355 : vector<8x64xf32> to vector<8x64xbf16>
    %cst_204 = arith.constant dense<0.000000e+00> : vector<8x192xf32>
    %357 = tpu.matmul %356, %351, %cst_204 {dimension_numbers = #tpu.dot_dimension_numbers<[1], [0], [0], [1], [0, 0, 1, 1], [], []>} : vector<8x64xbf16>, vector<64x192xbf16>, vector<8x192xf32> -> vector<8x192xf32>
    %c0_205 = arith.constant 0 : index
    %c0_206 = arith.constant 0 : index
    %c0_207 = arith.constant 0 : index
    %c0_208 = arith.constant 0 : index
    %358 = vector.load %arg24[%c0_205, %c0_206, %c0_207, %c0_208] : memref<3x8x8x64xf32, #tpu.memory_space<vmem>>, vector<1x1x8x64xf32>
    %359 = vector.shape_cast %358 : vector<1x1x8x64xf32> to vector<8x64xf32>
    %360 = vector.extract_strided_slice %357 {offsets = [0, 0], sizes = [8, 64], strides = [1, 1]} : vector<8x192xf32> to vector<8x64xf32>
    %361 = arith.addf %359, %360 : vector<8x64xf32>
    %362 = arith.negf %361 : vector<8x64xf32>
    %363 = math.exp %362 : vector<8x64xf32>
    %cst_209 = arith.constant 1.000000e+00 : f32
    %364 = vector.broadcast %cst_209 : f32 to vector<8x64xf32>
    %365 = arith.addf %364, %363 : vector<8x64xf32>
    %366 = arith.divf %364, %365 : vector<8x64xf32>
    %c1_210 = arith.constant 1 : index
    %c0_211 = arith.constant 0 : index
    %c0_212 = arith.constant 0 : index
    %c0_213 = arith.constant 0 : index
    %367 = vector.load %arg24[%c1_210, %c0_211, %c0_212, %c0_213] : memref<3x8x8x64xf32, #tpu.memory_space<vmem>>, vector<1x1x8x64xf32>
    %368 = vector.shape_cast %367 : vector<1x1x8x64xf32> to vector<8x64xf32>
    %369 = vector.extract_strided_slice %357 {offsets = [0, 64], sizes = [8, 64], strides = [1, 1]} : vector<8x192xf32> to vector<8x64xf32>
    %370 = arith.addf %368, %369 : vector<8x64xf32>
    %371 = arith.negf %370 : vector<8x64xf32>
    %372 = math.exp %371 : vector<8x64xf32>
    %cst_214 = arith.constant 1.000000e+00 : f32
    %373 = vector.broadcast %cst_214 : f32 to vector<8x64xf32>
    %374 = arith.addf %373, %372 : vector<8x64xf32>
    %375 = arith.divf %373, %374 : vector<8x64xf32>
    %c2_215 = arith.constant 2 : index
    %c0_216 = arith.constant 0 : index
    %c0_217 = arith.constant 0 : index
    %c0_218 = arith.constant 0 : index
    %376 = vector.load %arg24[%c2_215, %c0_216, %c0_217, %c0_218] : memref<3x8x8x64xf32, #tpu.memory_space<vmem>>, vector<1x1x8x64xf32>
    %377 = vector.shape_cast %376 : vector<1x1x8x64xf32> to vector<8x64xf32>
    %378 = vector.extract_strided_slice %357 {offsets = [0, 128], sizes = [8, 64], strides = [1, 1]} : vector<8x192xf32> to vector<8x64xf32>
    %379 = arith.addf %378, %354 : vector<8x64xf32>
    %380 = arith.mulf %366, %379 : vector<8x64xf32>
    %381 = arith.addf %377, %380 : vector<8x64xf32>
    %382 = math.tanh %381 : vector<8x64xf32>
    %cst_219 = arith.constant 1.000000e+00 : f32
    %383 = vector.broadcast %cst_219 : f32 to vector<8x64xf32>
    %384 = arith.subf %383, %375 : vector<8x64xf32>
    %385 = arith.mulf %384, %382 : vector<8x64xf32>
    %386 = arith.mulf %375, %355 : vector<8x64xf32>
    %387 = arith.addf %385, %386 : vector<8x64xf32>
    %c0_220 = arith.constant 0 : index
    %c0_221 = arith.constant 0 : index
    %c0_222 = arith.constant 0 : index
    %388 = vector.load %arg23[%c0_220, %c0_221, %c0_222] : memref<8x8x64xf32, #tpu.memory_space<vmem>>, vector<1x8x64xf32>
    %389 = vector.shape_cast %388 : vector<1x8x64xf32> to vector<8x64xf32>
    %390 = vector.shape_cast %387 : vector<8x64xf32> to vector<1x8x64xf32>
    tpu.vector_store %arg23[%c0_220, %c0_221, %c0_222], %390 {strides = array<i32>} : memref<8x8x64xf32, #tpu.memory_space<vmem>>, vector<1x8x64xf32>,
    %391 = arith.truncf %387 : vector<8x64xf32> to vector<8x64xbf16>
    %cst_223 = arith.constant dense<0.000000e+00> : vector<8x192xf32>
    %392 = tpu.matmul %391, %351, %cst_223 {dimension_numbers = #tpu.dot_dimension_numbers<[1], [0], [0], [1], [0, 0, 1, 1], [], []>} : vector<8x64xbf16>, vector<64x192xbf16>, vector<8x192xf32> -> vector<8x192xf32>
    %c0_224 = arith.constant 0 : index
    %c1_225 = arith.constant 1 : index
    %c0_226 = arith.constant 0 : index
    %c0_227 = arith.constant 0 : index
    %393 = vector.load %arg24[%c0_224, %c1_225, %c0_226, %c0_227] : memref<3x8x8x64xf32, #tpu.memory_space<vmem>>, vector<1x1x8x64xf32>
    %394 = vector.shape_cast %393 : vector<1x1x8x64xf32> to vector<8x64xf32>
    %395 = vector.extract_strided_slice %392 {offsets = [0, 0], sizes = [8, 64], strides = [1, 1]} : vector<8x192xf32> to vector<8x64xf32>
    %396 = arith.addf %394, %395 : vector<8x64xf32>
    %397 = arith.negf %396 : vector<8x64xf32>
    %398 = math.exp %397 : vector<8x64xf32>
    %cst_228 = arith.constant 1.000000e+00 : f32
    %399 = vector.broadcast %cst_228 : f32 to vector<8x64xf32>
    %400 = arith.addf %399, %398 : vector<8x64xf32>
    %401 = arith.divf %399, %400 : vector<8x64xf32>
    %c1_229 = arith.constant 1 : index
    %c1_230 = arith.constant 1 : index
    %c0_231 = arith.constant 0 : index
    %c0_232 = arith.constant 0 : index
    %402 = vector.load %arg24[%c1_229, %c1_230, %c0_231, %c0_232] : memref<3x8x8x64xf32, #tpu.memory_space<vmem>>, vector<1x1x8x64xf32>
    %403 = vector.shape_cast %402 : vector<1x1x8x64xf32> to vector<8x64xf32>
    %404 = vector.extract_strided_slice %392 {offsets = [0, 64], sizes = [8, 64], strides = [1, 1]} : vector<8x192xf32> to vector<8x64xf32>
    %405 = arith.addf %403, %404 : vector<8x64xf32>
    %406 = arith.negf %405 : vector<8x64xf32>
    %407 = math.exp %406 : vector<8x64xf32>
    %cst_233 = arith.constant 1.000000e+00 : f32
    %408 = vector.broadcast %cst_233 : f32 to vector<8x64xf32>
    %409 = arith.addf %408, %407 : vector<8x64xf32>
    %410 = arith.divf %408, %409 : vector<8x64xf32>
    %c2_234 = arith.constant 2 : index
    %c1_235 = arith.constant 1 : index
    %c0_236 = arith.constant 0 : index
    %c0_237 = arith.constant 0 : index
    %411 = vector.load %arg24[%c2_234, %c1_235, %c0_236, %c0_237] : memref<3x8x8x64xf32, #tpu.memory_space<vmem>>, vector<1x1x8x64xf32>
    %412 = vector.shape_cast %411 : vector<1x1x8x64xf32> to vector<8x64xf32>
    %413 = vector.extract_strided_slice %392 {offsets = [0, 128], sizes = [8, 64], strides = [1, 1]} : vector<8x192xf32> to vector<8x64xf32>
    %414 = arith.addf %413, %354 : vector<8x64xf32>
    %415 = arith.mulf %401, %414 : vector<8x64xf32>
    %416 = arith.addf %412, %415 : vector<8x64xf32>
    %417 = math.tanh %416 : vector<8x64xf32>
    %cst_238 = arith.constant 1.000000e+00 : f32
    %418 = vector.broadcast %cst_238 : f32 to vector<8x64xf32>
    %419 = arith.subf %418, %410 : vector<8x64xf32>
    %420 = arith.mulf %419, %417 : vector<8x64xf32>
    %421 = arith.mulf %410, %387 : vector<8x64xf32>
    %422 = arith.addf %420, %421 : vector<8x64xf32>
    %c1_239 = arith.constant 1 : index
    %c0_240 = arith.constant 0 : index
    %c0_241 = arith.constant 0 : index
    %423 = vector.load %arg23[%c1_239, %c0_240, %c0_241] : memref<8x8x64xf32, #tpu.memory_space<vmem>>, vector<1x8x64xf32>
    %424 = vector.shape_cast %423 : vector<1x8x64xf32> to vector<8x64xf32>
    %425 = vector.shape_cast %422 : vector<8x64xf32> to vector<1x8x64xf32>
    tpu.vector_store %arg23[%c1_239, %c0_240, %c0_241], %425 {strides = array<i32>} : memref<8x8x64xf32, #tpu.memory_space<vmem>>, vector<1x8x64xf32>,
    %426 = arith.truncf %422 : vector<8x64xf32> to vector<8x64xbf16>
    %cst_242 = arith.constant dense<0.000000e+00> : vector<8x192xf32>
    %427 = tpu.matmul %426, %351, %cst_242 {dimension_numbers = #tpu.dot_dimension_numbers<[1], [0], [0], [1], [0, 0, 1, 1], [], []>} : vector<8x64xbf16>, vector<64x192xbf16>, vector<8x192xf32> -> vector<8x192xf32>
    %c0_243 = arith.constant 0 : index
    %c2_244 = arith.constant 2 : index
    %c0_245 = arith.constant 0 : index
    %c0_246 = arith.constant 0 : index
    %428 = vector.load %arg24[%c0_243, %c2_244, %c0_245, %c0_246] : memref<3x8x8x64xf32, #tpu.memory_space<vmem>>, vector<1x1x8x64xf32>
    %429 = vector.shape_cast %428 : vector<1x1x8x64xf32> to vector<8x64xf32>
    %430 = vector.extract_strided_slice %427 {offsets = [0, 0], sizes = [8, 64], strides = [1, 1]} : vector<8x192xf32> to vector<8x64xf32>
    %431 = arith.addf %429, %430 : vector<8x64xf32>
    %432 = arith.negf %431 : vector<8x64xf32>
    %433 = math.exp %432 : vector<8x64xf32>
    %cst_247 = arith.constant 1.000000e+00 : f32
    %434 = vector.broadcast %cst_247 : f32 to vector<8x64xf32>
    %435 = arith.addf %434, %433 : vector<8x64xf32>
    %436 = arith.divf %434, %435 : vector<8x64xf32>
    %c1_248 = arith.constant 1 : index
    %c2_249 = arith.constant 2 : index
    %c0_250 = arith.constant 0 : index
    %c0_251 = arith.constant 0 : index
    %437 = vector.load %arg24[%c1_248, %c2_249, %c0_250, %c0_251] : memref<3x8x8x64xf32, #tpu.memory_space<vmem>>, vector<1x1x8x64xf32>
    %438 = vector.shape_cast %437 : vector<1x1x8x64xf32> to vector<8x64xf32>
    %439 = vector.extract_strided_slice %427 {offsets = [0, 64], sizes = [8, 64], strides = [1, 1]} : vector<8x192xf32> to vector<8x64xf32>
    %440 = arith.addf %438, %439 : vector<8x64xf32>
    %441 = arith.negf %440 : vector<8x64xf32>
    %442 = math.exp %441 : vector<8x64xf32>
    %cst_252 = arith.constant 1.000000e+00 : f32
    %443 = vector.broadcast %cst_252 : f32 to vector<8x64xf32>
    %444 = arith.addf %443, %442 : vector<8x64xf32>
    %445 = arith.divf %443, %444 : vector<8x64xf32>
    %c2_253 = arith.constant 2 : index
    %c2_254 = arith.constant 2 : index
    %c0_255 = arith.constant 0 : index
    %c0_256 = arith.constant 0 : index
    %446 = vector.load %arg24[%c2_253, %c2_254, %c0_255, %c0_256] : memref<3x8x8x64xf32, #tpu.memory_space<vmem>>, vector<1x1x8x64xf32>
    %447 = vector.shape_cast %446 : vector<1x1x8x64xf32> to vector<8x64xf32>
    %448 = vector.extract_strided_slice %427 {offsets = [0, 128], sizes = [8, 64], strides = [1, 1]} : vector<8x192xf32> to vector<8x64xf32>
    %449 = arith.addf %448, %354 : vector<8x64xf32>
    %450 = arith.mulf %436, %449 : vector<8x64xf32>
    %451 = arith.addf %447, %450 : vector<8x64xf32>
    %452 = math.tanh %451 : vector<8x64xf32>
    %cst_257 = arith.constant 1.000000e+00 : f32
    %453 = vector.broadcast %cst_257 : f32 to vector<8x64xf32>
    %454 = arith.subf %453, %445 : vector<8x64xf32>
    %455 = arith.mulf %454, %452 : vector<8x64xf32>
    %456 = arith.mulf %445, %422 : vector<8x64xf32>
    %457 = arith.addf %455, %456 : vector<8x64xf32>
    %c2_258 = arith.constant 2 : index
    %c0_259 = arith.constant 0 : index
    %c0_260 = arith.constant 0 : index
    %458 = vector.load %arg23[%c2_258, %c0_259, %c0_260] : memref<8x8x64xf32, #tpu.memory_space<vmem>>, vector<1x8x64xf32>
    %459 = vector.shape_cast %458 : vector<1x8x64xf32> to vector<8x64xf32>
    %460 = vector.shape_cast %457 : vector<8x64xf32> to vector<1x8x64xf32>
    tpu.vector_store %arg23[%c2_258, %c0_259, %c0_260], %460 {strides = array<i32>} : memref<8x8x64xf32, #tpu.memory_space<vmem>>, vector<1x8x64xf32>,
    %461 = arith.truncf %457 : vector<8x64xf32> to vector<8x64xbf16>
    %cst_261 = arith.constant dense<0.000000e+00> : vector<8x192xf32>
    %462 = tpu.matmul %461, %351, %cst_261 {dimension_numbers = #tpu.dot_dimension_numbers<[1], [0], [0], [1], [0, 0, 1, 1], [], []>} : vector<8x64xbf16>, vector<64x192xbf16>, vector<8x192xf32> -> vector<8x192xf32>
    %c0_262 = arith.constant 0 : index
    %c3_263 = arith.constant 3 : index
    %c0_264 = arith.constant 0 : index
    %c0_265 = arith.constant 0 : index
    %463 = vector.load %arg24[%c0_262, %c3_263, %c0_264, %c0_265] : memref<3x8x8x64xf32, #tpu.memory_space<vmem>>, vector<1x1x8x64xf32>
    %464 = vector.shape_cast %463 : vector<1x1x8x64xf32> to vector<8x64xf32>
    %465 = vector.extract_strided_slice %462 {offsets = [0, 0], sizes = [8, 64], strides = [1, 1]} : vector<8x192xf32> to vector<8x64xf32>
    %466 = arith.addf %464, %465 : vector<8x64xf32>
    %467 = arith.negf %466 : vector<8x64xf32>
    %468 = math.exp %467 : vector<8x64xf32>
    %cst_266 = arith.constant 1.000000e+00 : f32
    %469 = vector.broadcast %cst_266 : f32 to vector<8x64xf32>
    %470 = arith.addf %469, %468 : vector<8x64xf32>
    %471 = arith.divf %469, %470 : vector<8x64xf32>
    %c1_267 = arith.constant 1 : index
    %c3_268 = arith.constant 3 : index
    %c0_269 = arith.constant 0 : index
    %c0_270 = arith.constant 0 : index
    %472 = vector.load %arg24[%c1_267, %c3_268, %c0_269, %c0_270] : memref<3x8x8x64xf32, #tpu.memory_space<vmem>>, vector<1x1x8x64xf32>
    %473 = vector.shape_cast %472 : vector<1x1x8x64xf32> to vector<8x64xf32>
    %474 = vector.extract_strided_slice %462 {offsets = [0, 64], sizes = [8, 64], strides = [1, 1]} : vector<8x192xf32> to vector<8x64xf32>
    %475 = arith.addf %473, %474 : vector<8x64xf32>
    %476 = arith.negf %475 : vector<8x64xf32>
    %477 = math.exp %476 : vector<8x64xf32>
    %cst_271 = arith.constant 1.000000e+00 : f32
    %478 = vector.broadcast %cst_271 : f32 to vector<8x64xf32>
    %479 = arith.addf %478, %477 : vector<8x64xf32>
    %480 = arith.divf %478, %479 : vector<8x64xf32>
    %c2_272 = arith.constant 2 : index
    %c3_273 = arith.constant 3 : index
    %c0_274 = arith.constant 0 : index
    %c0_275 = arith.constant 0 : index
    %481 = vector.load %arg24[%c2_272, %c3_273, %c0_274, %c0_275] : memref<3x8x8x64xf32, #tpu.memory_space<vmem>>, vector<1x1x8x64xf32>
    %482 = vector.shape_cast %481 : vector<1x1x8x64xf32> to vector<8x64xf32>
    %483 = vector.extract_strided_slice %462 {offsets = [0, 128], sizes = [8, 64], strides = [1, 1]} : vector<8x192xf32> to vector<8x64xf32>
    %484 = arith.addf %483, %354 : vector<8x64xf32>
    %485 = arith.mulf %471, %484 : vector<8x64xf32>
    %486 = arith.addf %482, %485 : vector<8x64xf32>
    %487 = math.tanh %486 : vector<8x64xf32>
    %cst_276 = arith.constant 1.000000e+00 : f32
    %488 = vector.broadcast %cst_276 : f32 to vector<8x64xf32>
    %489 = arith.subf %488, %480 : vector<8x64xf32>
    %490 = arith.mulf %489, %487 : vector<8x64xf32>
    %491 = arith.mulf %480, %457 : vector<8x64xf32>
    %492 = arith.addf %490, %491 : vector<8x64xf32>
    %c3_277 = arith.constant 3 : index
    %c0_278 = arith.constant 0 : index
    %c0_279 = arith.constant 0 : index
    %493 = vector.load %arg23[%c3_277, %c0_278, %c0_279] : memref<8x8x64xf32, #tpu.memory_space<vmem>>, vector<1x8x64xf32>
    %494 = vector.shape_cast %493 : vector<1x8x64xf32> to vector<8x64xf32>
    %495 = vector.shape_cast %492 : vector<8x64xf32> to vector<1x8x64xf32>
    tpu.vector_store %arg23[%c3_277, %c0_278, %c0_279], %495 {strides = array<i32>} : memref<8x8x64xf32, #tpu.memory_space<vmem>>, vector<1x8x64xf32>,
    %496 = arith.truncf %492 : vector<8x64xf32> to vector<8x64xbf16>
    %cst_280 = arith.constant dense<0.000000e+00> : vector<8x192xf32>
    %497 = tpu.matmul %496, %351, %cst_280 {dimension_numbers = #tpu.dot_dimension_numbers<[1], [0], [0], [1], [0, 0, 1, 1], [], []>} : vector<8x64xbf16>, vector<64x192xbf16>, vector<8x192xf32> -> vector<8x192xf32>
    %c0_281 = arith.constant 0 : index
    %c4_282 = arith.constant 4 : index
    %c0_283 = arith.constant 0 : index
    %c0_284 = arith.constant 0 : index
    %498 = vector.load %arg24[%c0_281, %c4_282, %c0_283, %c0_284] : memref<3x8x8x64xf32, #tpu.memory_space<vmem>>, vector<1x1x8x64xf32>
    %499 = vector.shape_cast %498 : vector<1x1x8x64xf32> to vector<8x64xf32>
    %500 = vector.extract_strided_slice %497 {offsets = [0, 0], sizes = [8, 64], strides = [1, 1]} : vector<8x192xf32> to vector<8x64xf32>
    %501 = arith.addf %499, %500 : vector<8x64xf32>
    %502 = arith.negf %501 : vector<8x64xf32>
    %503 = math.exp %502 : vector<8x64xf32>
    %cst_285 = arith.constant 1.000000e+00 : f32
    %504 = vector.broadcast %cst_285 : f32 to vector<8x64xf32>
    %505 = arith.addf %504, %503 : vector<8x64xf32>
    %506 = arith.divf %504, %505 : vector<8x64xf32>
    %c1_286 = arith.constant 1 : index
    %c4_287 = arith.constant 4 : index
    %c0_288 = arith.constant 0 : index
    %c0_289 = arith.constant 0 : index
    %507 = vector.load %arg24[%c1_286, %c4_287, %c0_288, %c0_289] : memref<3x8x8x64xf32, #tpu.memory_space<vmem>>, vector<1x1x8x64xf32>
    %508 = vector.shape_cast %507 : vector<1x1x8x64xf32> to vector<8x64xf32>
    %509 = vector.extract_strided_slice %497 {offsets = [0, 64], sizes = [8, 64], strides = [1, 1]} : vector<8x192xf32> to vector<8x64xf32>
    %510 = arith.addf %508, %509 : vector<8x64xf32>
    %511 = arith.negf %510 : vector<8x64xf32>
    %512 = math.exp %511 : vector<8x64xf32>
    %cst_290 = arith.constant 1.000000e+00 : f32
    %513 = vector.broadcast %cst_290 : f32 to vector<8x64xf32>
    %514 = arith.addf %513, %512 : vector<8x64xf32>
    %515 = arith.divf %513, %514 : vector<8x64xf32>
    %c2_291 = arith.constant 2 : index
    %c4_292 = arith.constant 4 : index
    %c0_293 = arith.constant 0 : index
    %c0_294 = arith.constant 0 : index
    %516 = vector.load %arg24[%c2_291, %c4_292, %c0_293, %c0_294] : memref<3x8x8x64xf32, #tpu.memory_space<vmem>>, vector<1x1x8x64xf32>
    %517 = vector.shape_cast %516 : vector<1x1x8x64xf32> to vector<8x64xf32>
    %518 = vector.extract_strided_slice %497 {offsets = [0, 128], sizes = [8, 64], strides = [1, 1]} : vector<8x192xf32> to vector<8x64xf32>
    %519 = arith.addf %518, %354 : vector<8x64xf32>
    %520 = arith.mulf %506, %519 : vector<8x64xf32>
    %521 = arith.addf %517, %520 : vector<8x64xf32>
    %522 = math.tanh %521 : vector<8x64xf32>
    %cst_295 = arith.constant 1.000000e+00 : f32
    %523 = vector.broadcast %cst_295 : f32 to vector<8x64xf32>
    %524 = arith.subf %523, %515 : vector<8x64xf32>
    %525 = arith.mulf %524, %522 : vector<8x64xf32>
    %526 = arith.mulf %515, %492 : vector<8x64xf32>
    %527 = arith.addf %525, %526 : vector<8x64xf32>
    %c4_296 = arith.constant 4 : index
    %c0_297 = arith.constant 0 : index
    %c0_298 = arith.constant 0 : index
    %528 = vector.load %arg23[%c4_296, %c0_297, %c0_298] : memref<8x8x64xf32, #tpu.memory_space<vmem>>, vector<1x8x64xf32>
    %529 = vector.shape_cast %528 : vector<1x8x64xf32> to vector<8x64xf32>
    %530 = vector.shape_cast %527 : vector<8x64xf32> to vector<1x8x64xf32>
    tpu.vector_store %arg23[%c4_296, %c0_297, %c0_298], %530 {strides = array<i32>} : memref<8x8x64xf32, #tpu.memory_space<vmem>>, vector<1x8x64xf32>,
    %531 = arith.truncf %527 : vector<8x64xf32> to vector<8x64xbf16>
    %cst_299 = arith.constant dense<0.000000e+00> : vector<8x192xf32>
    %532 = tpu.matmul %531, %351, %cst_299 {dimension_numbers = #tpu.dot_dimension_numbers<[1], [0], [0], [1], [0, 0, 1, 1], [], []>} : vector<8x64xbf16>, vector<64x192xbf16>, vector<8x192xf32> -> vector<8x192xf32>
    %c0_300 = arith.constant 0 : index
    %c5_301 = arith.constant 5 : index
    %c0_302 = arith.constant 0 : index
    %c0_303 = arith.constant 0 : index
    %533 = vector.load %arg24[%c0_300, %c5_301, %c0_302, %c0_303] : memref<3x8x8x64xf32, #tpu.memory_space<vmem>>, vector<1x1x8x64xf32>
    %534 = vector.shape_cast %533 : vector<1x1x8x64xf32> to vector<8x64xf32>
    %535 = vector.extract_strided_slice %532 {offsets = [0, 0], sizes = [8, 64], strides = [1, 1]} : vector<8x192xf32> to vector<8x64xf32>
    %536 = arith.addf %534, %535 : vector<8x64xf32>
    %537 = arith.negf %536 : vector<8x64xf32>
    %538 = math.exp %537 : vector<8x64xf32>
    %cst_304 = arith.constant 1.000000e+00 : f32
    %539 = vector.broadcast %cst_304 : f32 to vector<8x64xf32>
    %540 = arith.addf %539, %538 : vector<8x64xf32>
    %541 = arith.divf %539, %540 : vector<8x64xf32>
    %c1_305 = arith.constant 1 : index
    %c5_306 = arith.constant 5 : index
    %c0_307 = arith.constant 0 : index
    %c0_308 = arith.constant 0 : index
    %542 = vector.load %arg24[%c1_305, %c5_306, %c0_307, %c0_308] : memref<3x8x8x64xf32, #tpu.memory_space<vmem>>, vector<1x1x8x64xf32>
    %543 = vector.shape_cast %542 : vector<1x1x8x64xf32> to vector<8x64xf32>
    %544 = vector.extract_strided_slice %532 {offsets = [0, 64], sizes = [8, 64], strides = [1, 1]} : vector<8x192xf32> to vector<8x64xf32>
    %545 = arith.addf %543, %544 : vector<8x64xf32>
    %546 = arith.negf %545 : vector<8x64xf32>
    %547 = math.exp %546 : vector<8x64xf32>
    %cst_309 = arith.constant 1.000000e+00 : f32
    %548 = vector.broadcast %cst_309 : f32 to vector<8x64xf32>
    %549 = arith.addf %548, %547 : vector<8x64xf32>
    %550 = arith.divf %548, %549 : vector<8x64xf32>
    %c2_310 = arith.constant 2 : index
    %c5_311 = arith.constant 5 : index
    %c0_312 = arith.constant 0 : index
    %c0_313 = arith.constant 0 : index
    %551 = vector.load %arg24[%c2_310, %c5_311, %c0_312, %c0_313] : memref<3x8x8x64xf32, #tpu.memory_space<vmem>>, vector<1x1x8x64xf32>
    %552 = vector.shape_cast %551 : vector<1x1x8x64xf32> to vector<8x64xf32>
    %553 = vector.extract_strided_slice %532 {offsets = [0, 128], sizes = [8, 64], strides = [1, 1]} : vector<8x192xf32> to vector<8x64xf32>
    %554 = arith.addf %553, %354 : vector<8x64xf32>
    %555 = arith.mulf %541, %554 : vector<8x64xf32>
    %556 = arith.addf %552, %555 : vector<8x64xf32>
    %557 = math.tanh %556 : vector<8x64xf32>
    %cst_314 = arith.constant 1.000000e+00 : f32
    %558 = vector.broadcast %cst_314 : f32 to vector<8x64xf32>
    %559 = arith.subf %558, %550 : vector<8x64xf32>
    %560 = arith.mulf %559, %557 : vector<8x64xf32>
    %561 = arith.mulf %550, %527 : vector<8x64xf32>
    %562 = arith.addf %560, %561 : vector<8x64xf32>
    %c5_315 = arith.constant 5 : index
    %c0_316 = arith.constant 0 : index
    %c0_317 = arith.constant 0 : index
    %563 = vector.load %arg23[%c5_315, %c0_316, %c0_317] : memref<8x8x64xf32, #tpu.memory_space<vmem>>, vector<1x8x64xf32>
    %564 = vector.shape_cast %563 : vector<1x8x64xf32> to vector<8x64xf32>
    %565 = vector.shape_cast %562 : vector<8x64xf32> to vector<1x8x64xf32>
    tpu.vector_store %arg23[%c5_315, %c0_316, %c0_317], %565 {strides = array<i32>} : memref<8x8x64xf32, #tpu.memory_space<vmem>>, vector<1x8x64xf32>,
    %566 = arith.truncf %562 : vector<8x64xf32> to vector<8x64xbf16>
    %cst_318 = arith.constant dense<0.000000e+00> : vector<8x192xf32>
    %567 = tpu.matmul %566, %351, %cst_318 {dimension_numbers = #tpu.dot_dimension_numbers<[1], [0], [0], [1], [0, 0, 1, 1], [], []>} : vector<8x64xbf16>, vector<64x192xbf16>, vector<8x192xf32> -> vector<8x192xf32>
    %c0_319 = arith.constant 0 : index
    %c6_320 = arith.constant 6 : index
    %c0_321 = arith.constant 0 : index
    %c0_322 = arith.constant 0 : index
    %568 = vector.load %arg24[%c0_319, %c6_320, %c0_321, %c0_322] : memref<3x8x8x64xf32, #tpu.memory_space<vmem>>, vector<1x1x8x64xf32>
    %569 = vector.shape_cast %568 : vector<1x1x8x64xf32> to vector<8x64xf32>
    %570 = vector.extract_strided_slice %567 {offsets = [0, 0], sizes = [8, 64], strides = [1, 1]} : vector<8x192xf32> to vector<8x64xf32>
    %571 = arith.addf %569, %570 : vector<8x64xf32>
    %572 = arith.negf %571 : vector<8x64xf32>
    %573 = math.exp %572 : vector<8x64xf32>
    %cst_323 = arith.constant 1.000000e+00 : f32
    %574 = vector.broadcast %cst_323 : f32 to vector<8x64xf32>
    %575 = arith.addf %574, %573 : vector<8x64xf32>
    %576 = arith.divf %574, %575 : vector<8x64xf32>
    %c1_324 = arith.constant 1 : index
    %c6_325 = arith.constant 6 : index
    %c0_326 = arith.constant 0 : index
    %c0_327 = arith.constant 0 : index
    %577 = vector.load %arg24[%c1_324, %c6_325, %c0_326, %c0_327] : memref<3x8x8x64xf32, #tpu.memory_space<vmem>>, vector<1x1x8x64xf32>
    %578 = vector.shape_cast %577 : vector<1x1x8x64xf32> to vector<8x64xf32>
    %579 = vector.extract_strided_slice %567 {offsets = [0, 64], sizes = [8, 64], strides = [1, 1]} : vector<8x192xf32> to vector<8x64xf32>
    %580 = arith.addf %578, %579 : vector<8x64xf32>
    %581 = arith.negf %580 : vector<8x64xf32>
    %582 = math.exp %581 : vector<8x64xf32>
    %cst_328 = arith.constant 1.000000e+00 : f32
    %583 = vector.broadcast %cst_328 : f32 to vector<8x64xf32>
    %584 = arith.addf %583, %582 : vector<8x64xf32>
    %585 = arith.divf %583, %584 : vector<8x64xf32>
    %c2_329 = arith.constant 2 : index
    %c6_330 = arith.constant 6 : index
    %c0_331 = arith.constant 0 : index
    %c0_332 = arith.constant 0 : index
    %586 = vector.load %arg24[%c2_329, %c6_330, %c0_331, %c0_332] : memref<3x8x8x64xf32, #tpu.memory_space<vmem>>, vector<1x1x8x64xf32>
    %587 = vector.shape_cast %586 : vector<1x1x8x64xf32> to vector<8x64xf32>
    %588 = vector.extract_strided_slice %567 {offsets = [0, 128], sizes = [8, 64], strides = [1, 1]} : vector<8x192xf32> to vector<8x64xf32>
    %589 = arith.addf %588, %354 : vector<8x64xf32>
    %590 = arith.mulf %576, %589 : vector<8x64xf32>
    %591 = arith.addf %587, %590 : vector<8x64xf32>
    %592 = math.tanh %591 : vector<8x64xf32>
    %cst_333 = arith.constant 1.000000e+00 : f32
    %593 = vector.broadcast %cst_333 : f32 to vector<8x64xf32>
    %594 = arith.subf %593, %585 : vector<8x64xf32>
    %595 = arith.mulf %594, %592 : vector<8x64xf32>
    %596 = arith.mulf %585, %562 : vector<8x64xf32>
    %597 = arith.addf %595, %596 : vector<8x64xf32>
    %c6_334 = arith.constant 6 : index
    %c0_335 = arith.constant 0 : index
    %c0_336 = arith.constant 0 : index
    %598 = vector.load %arg23[%c6_334, %c0_335, %c0_336] : memref<8x8x64xf32, #tpu.memory_space<vmem>>, vector<1x8x64xf32>
    %599 = vector.shape_cast %598 : vector<1x8x64xf32> to vector<8x64xf32>
    %600 = vector.shape_cast %597 : vector<8x64xf32> to vector<1x8x64xf32>
    tpu.vector_store %arg23[%c6_334, %c0_335, %c0_336], %600 {strides = array<i32>} : memref<8x8x64xf32, #tpu.memory_space<vmem>>, vector<1x8x64xf32>,
    %601 = arith.truncf %597 : vector<8x64xf32> to vector<8x64xbf16>
    %cst_337 = arith.constant dense<0.000000e+00> : vector<8x192xf32>
    %602 = tpu.matmul %601, %351, %cst_337 {dimension_numbers = #tpu.dot_dimension_numbers<[1], [0], [0], [1], [0, 0, 1, 1], [], []>} : vector<8x64xbf16>, vector<64x192xbf16>, vector<8x192xf32> -> vector<8x192xf32>
    %c0_338 = arith.constant 0 : index
    %c7_339 = arith.constant 7 : index
    %c0_340 = arith.constant 0 : index
    %c0_341 = arith.constant 0 : index
    %603 = vector.load %arg24[%c0_338, %c7_339, %c0_340, %c0_341] : memref<3x8x8x64xf32, #tpu.memory_space<vmem>>, vector<1x1x8x64xf32>
    %604 = vector.shape_cast %603 : vector<1x1x8x64xf32> to vector<8x64xf32>
    %605 = vector.extract_strided_slice %602 {offsets = [0, 0], sizes = [8, 64], strides = [1, 1]} : vector<8x192xf32> to vector<8x64xf32>
    %606 = arith.addf %604, %605 : vector<8x64xf32>
    %607 = arith.negf %606 : vector<8x64xf32>
    %608 = math.exp %607 : vector<8x64xf32>
    %cst_342 = arith.constant 1.000000e+00 : f32
    %609 = vector.broadcast %cst_342 : f32 to vector<8x64xf32>
    %610 = arith.addf %609, %608 : vector<8x64xf32>
    %611 = arith.divf %609, %610 : vector<8x64xf32>
    %c1_343 = arith.constant 1 : index
    %c7_344 = arith.constant 7 : index
    %c0_345 = arith.constant 0 : index
    %c0_346 = arith.constant 0 : index
    %612 = vector.load %arg24[%c1_343, %c7_344, %c0_345, %c0_346] : memref<3x8x8x64xf32, #tpu.memory_space<vmem>>, vector<1x1x8x64xf32>
    %613 = vector.shape_cast %612 : vector<1x1x8x64xf32> to vector<8x64xf32>
    %614 = vector.extract_strided_slice %602 {offsets = [0, 64], sizes = [8, 64], strides = [1, 1]} : vector<8x192xf32> to vector<8x64xf32>
    %615 = arith.addf %613, %614 : vector<8x64xf32>
    %616 = arith.negf %615 : vector<8x64xf32>
    %617 = math.exp %616 : vector<8x64xf32>
    %cst_347 = arith.constant 1.000000e+00 : f32
    %618 = vector.broadcast %cst_347 : f32 to vector<8x64xf32>
    %619 = arith.addf %618, %617 : vector<8x64xf32>
    %620 = arith.divf %618, %619 : vector<8x64xf32>
    %c2_348 = arith.constant 2 : index
    %c7_349 = arith.constant 7 : index
    %c0_350 = arith.constant 0 : index
    %c0_351 = arith.constant 0 : index
    %621 = vector.load %arg24[%c2_348, %c7_349, %c0_350, %c0_351] : memref<3x8x8x64xf32, #tpu.memory_space<vmem>>, vector<1x1x8x64xf32>
    %622 = vector.shape_cast %621 : vector<1x1x8x64xf32> to vector<8x64xf32>
    %623 = vector.extract_strided_slice %602 {offsets = [0, 128], sizes = [8, 64], strides = [1, 1]} : vector<8x192xf32> to vector<8x64xf32>
    %624 = arith.addf %623, %354 : vector<8x64xf32>
    %625 = arith.mulf %611, %624 : vector<8x64xf32>
    %626 = arith.addf %622, %625 : vector<8x64xf32>
    %627 = math.tanh %626 : vector<8x64xf32>
    %cst_352 = arith.constant 1.000000e+00 : f32
    %628 = vector.broadcast %cst_352 : f32 to vector<8x64xf32>
    %629 = arith.subf %628, %620 : vector<8x64xf32>
    %630 = arith.mulf %629, %627 : vector<8x64xf32>
    %631 = arith.mulf %620, %597 : vector<8x64xf32>
    %632 = arith.addf %630, %631 : vector<8x64xf32>
    %c7_353 = arith.constant 7 : index
    %c0_354 = arith.constant 0 : index
    %c0_355 = arith.constant 0 : index
    %633 = vector.load %arg23[%c7_353, %c0_354, %c0_355] : memref<8x8x64xf32, #tpu.memory_space<vmem>>, vector<1x8x64xf32>
    %634 = vector.shape_cast %633 : vector<1x8x64xf32> to vector<8x64xf32>
    %635 = vector.shape_cast %632 : vector<8x64xf32> to vector<1x8x64xf32>
    tpu.vector_store %arg23[%c7_353, %c0_354, %c0_355], %635 {strides = array<i32>} : memref<8x8x64xf32, #tpu.memory_space<vmem>>, vector<1x8x64xf32>,
    %c0_356 = arith.constant 0 : index
    %c0_357 = arith.constant 0 : index
    %c0_358 = arith.constant 0 : index
    %636 = vector.load %arg23[%c0_356, %c0_357, %c0_358] : memref<8x8x64xf32, #tpu.memory_space<vmem>>, vector<8x8x64xf32>
    %637 = vector.shape_cast %636 : vector<8x8x64xf32> to vector<64x64xf32>
    %638 = arith.truncf %637 : vector<64x64xf32> to vector<64x64xbf16>
    %c0_359 = arith.constant 0 : index
    %c0_360 = arith.constant 0 : index
    %639 = vector.load %arg16[%c0_359, %c0_360] : memref<64x192xbf16, #tpu.memory_space<vmem>>, vector<64x192xbf16>
    %cst_361 = arith.constant dense<0.000000e+00> : vector<64x192xf32>
    %640 = tpu.matmul %638, %639, %cst_361 {dimension_numbers = #tpu.dot_dimension_numbers<[1], [0], [0], [1], [0, 0, 1, 1], [], []>} : vector<64x64xbf16>, vector<64x192xbf16>, vector<64x192xf32> -> vector<64x192xf32>
    %641 = vector.extract_strided_slice %640 {offsets = [0, 0], sizes = [64, 64], strides = [1, 1]} : vector<64x192xf32> to vector<64x64xf32>
    %c0_362 = arith.constant 0 : index
    %c0_363 = arith.constant 0 : index
    %642 = vector.load %arg18[%c0_362, %c0_363] : memref<1x64xf32, #tpu.memory_space<vmem>>, vector<1x64xf32>
    %643 = vector.broadcast %642 : vector<1x64xf32> to vector<64x64xf32>
    %644 = arith.addf %641, %643 : vector<64x64xf32>
    %645 = vector.shape_cast %644 : vector<64x64xf32> to vector<8x8x64xf32>
    %c0_364 = arith.constant 0 : index
    %c0_365 = arith.constant 0 : index
    %c0_366 = arith.constant 0 : index
    %c0_367 = arith.constant 0 : index
    %646 = vector.load %arg24[%c0_364, %c0_365, %c0_366, %c0_367] : memref<3x8x8x64xf32, #tpu.memory_space<vmem>>, vector<1x8x8x64xf32>
    %647 = vector.shape_cast %646 : vector<1x8x8x64xf32> to vector<8x8x64xf32>
    %648 = vector.shape_cast %645 : vector<8x8x64xf32> to vector<1x8x8x64xf32>
    tpu.vector_store %arg24[%c0_364, %c0_365, %c0_366, %c0_367], %648 {strides = array<i32>} : memref<3x8x8x64xf32, #tpu.memory_space<vmem>>, vector<1x8x8x64xf32>,
    %649 = vector.extract_strided_slice %640 {offsets = [0, 64], sizes = [64, 64], strides = [1, 1]} : vector<64x192xf32> to vector<64x64xf32>
    %c0_368 = arith.constant 0 : index
    %c0_369 = arith.constant 0 : index
    %650 = vector.load %arg19[%c0_368, %c0_369] : memref<1x64xf32, #tpu.memory_space<vmem>>, vector<1x64xf32>
    %651 = vector.broadcast %650 : vector<1x64xf32> to vector<64x64xf32>
    %652 = arith.addf %649, %651 : vector<64x64xf32>
    %653 = vector.shape_cast %652 : vector<64x64xf32> to vector<8x8x64xf32>
    %c1_370 = arith.constant 1 : index
    %c0_371 = arith.constant 0 : index
    %c0_372 = arith.constant 0 : index
    %c0_373 = arith.constant 0 : index
    %654 = vector.load %arg24[%c1_370, %c0_371, %c0_372, %c0_373] : memref<3x8x8x64xf32, #tpu.memory_space<vmem>>, vector<1x8x8x64xf32>
    %655 = vector.shape_cast %654 : vector<1x8x8x64xf32> to vector<8x8x64xf32>
    %656 = vector.shape_cast %653 : vector<8x8x64xf32> to vector<1x8x8x64xf32>
    tpu.vector_store %arg24[%c1_370, %c0_371, %c0_372, %c0_373], %656 {strides = array<i32>} : memref<3x8x8x64xf32, #tpu.memory_space<vmem>>, vector<1x8x8x64xf32>,
    %657 = vector.extract_strided_slice %640 {offsets = [0, 128], sizes = [64, 64], strides = [1, 1]} : vector<64x192xf32> to vector<64x64xf32>
    %c0_374 = arith.constant 0 : index
    %c0_375 = arith.constant 0 : index
    %658 = vector.load %arg20[%c0_374, %c0_375] : memref<1x64xf32, #tpu.memory_space<vmem>>, vector<1x64xf32>
    %659 = vector.broadcast %658 : vector<1x64xf32> to vector<64x64xf32>
    %660 = arith.addf %657, %659 : vector<64x64xf32>
    %661 = vector.shape_cast %660 : vector<64x64xf32> to vector<8x8x64xf32>
    %c2_376 = arith.constant 2 : index
    %c0_377 = arith.constant 0 : index
    %c0_378 = arith.constant 0 : index
    %c0_379 = arith.constant 0 : index
    %662 = vector.load %arg24[%c2_376, %c0_377, %c0_378, %c0_379] : memref<3x8x8x64xf32, #tpu.memory_space<vmem>>, vector<1x8x8x64xf32>
    %663 = vector.shape_cast %662 : vector<1x8x8x64xf32> to vector<8x8x64xf32>
    %664 = vector.shape_cast %661 : vector<8x8x64xf32> to vector<1x8x8x64xf32>
    tpu.vector_store %arg24[%c2_376, %c0_377, %c0_378, %c0_379], %664 {strides = array<i32>} : memref<3x8x8x64xf32, #tpu.memory_space<vmem>>, vector<1x8x8x64xf32>,
    %c0_380 = arith.constant 0 : index
    %c0_381 = arith.constant 0 : index
    %665 = vector.load %arg17[%c0_380, %c0_381] : memref<64x192xbf16, #tpu.memory_space<vmem>>, vector<64x192xbf16>
    %c0_382 = arith.constant 0 : index
    %c0_383 = arith.constant 0 : index
    %666 = vector.load %arg21[%c0_382, %c0_383] : memref<1x64xf32, #tpu.memory_space<vmem>>, vector<1x64xf32>
    %667 = vector.shape_cast %666 : vector<1x64xf32> to vector<1x64xf32>
    %668 = vector.broadcast %667 : vector<1x64xf32> to vector<8x64xf32>
    %cst_384 = arith.constant 0.000000e+00 : f32
    %669 = vector.broadcast %cst_384 : f32 to vector<8x64xf32>
    %670 = arith.truncf %669 : vector<8x64xf32> to vector<8x64xbf16>
    %cst_385 = arith.constant dense<0.000000e+00> : vector<8x192xf32>
    %671 = tpu.matmul %670, %665, %cst_385 {dimension_numbers = #tpu.dot_dimension_numbers<[1], [0], [0], [1], [0, 0, 1, 1], [], []>} : vector<8x64xbf16>, vector<64x192xbf16>, vector<8x192xf32> -> vector<8x192xf32>
    %c0_386 = arith.constant 0 : index
    %c0_387 = arith.constant 0 : index
    %c0_388 = arith.constant 0 : index
    %c0_389 = arith.constant 0 : index
    %672 = vector.load %arg24[%c0_386, %c0_387, %c0_388, %c0_389] : memref<3x8x8x64xf32, #tpu.memory_space<vmem>>, vector<1x1x8x64xf32>
    %673 = vector.shape_cast %672 : vector<1x1x8x64xf32> to vector<8x64xf32>
    %674 = vector.extract_strided_slice %671 {offsets = [0, 0], sizes = [8, 64], strides = [1, 1]} : vector<8x192xf32> to vector<8x64xf32>
    %675 = arith.addf %673, %674 : vector<8x64xf32>
    %676 = arith.negf %675 : vector<8x64xf32>
    %677 = math.exp %676 : vector<8x64xf32>
    %cst_390 = arith.constant 1.000000e+00 : f32
    %678 = vector.broadcast %cst_390 : f32 to vector<8x64xf32>
    %679 = arith.addf %678, %677 : vector<8x64xf32>
    %680 = arith.divf %678, %679 : vector<8x64xf32>
    %c1_391 = arith.constant 1 : index
    %c0_392 = arith.constant 0 : index
    %c0_393 = arith.constant 0 : index
    %c0_394 = arith.constant 0 : index
    %681 = vector.load %arg24[%c1_391, %c0_392, %c0_393, %c0_394] : memref<3x8x8x64xf32, #tpu.memory_space<vmem>>, vector<1x1x8x64xf32>
    %682 = vector.shape_cast %681 : vector<1x1x8x64xf32> to vector<8x64xf32>
    %683 = vector.extract_strided_slice %671 {offsets = [0, 64], sizes = [8, 64], strides = [1, 1]} : vector<8x192xf32> to vector<8x64xf32>
    %684 = arith.addf %682, %683 : vector<8x64xf32>
    %685 = arith.negf %684 : vector<8x64xf32>
    %686 = math.exp %685 : vector<8x64xf32>
    %cst_395 = arith.constant 1.000000e+00 : f32
    %687 = vector.broadcast %cst_395 : f32 to vector<8x64xf32>
    %688 = arith.addf %687, %686 : vector<8x64xf32>
    %689 = arith.divf %687, %688 : vector<8x64xf32>
    %c2_396 = arith.constant 2 : index
    %c0_397 = arith.constant 0 : index
    %c0_398 = arith.constant 0 : index
    %c0_399 = arith.constant 0 : index
    %690 = vector.load %arg24[%c2_396, %c0_397, %c0_398, %c0_399] : memref<3x8x8x64xf32, #tpu.memory_space<vmem>>, vector<1x1x8x64xf32>
    %691 = vector.shape_cast %690 : vector<1x1x8x64xf32> to vector<8x64xf32>
    %692 = vector.extract_strided_slice %671 {offsets = [0, 128], sizes = [8, 64], strides = [1, 1]} : vector<8x192xf32> to vector<8x64xf32>
    %693 = arith.addf %692, %668 : vector<8x64xf32>
    %694 = arith.mulf %680, %693 : vector<8x64xf32>
    %695 = arith.addf %691, %694 : vector<8x64xf32>
    %696 = math.tanh %695 : vector<8x64xf32>
    %cst_400 = arith.constant 1.000000e+00 : f32
    %697 = vector.broadcast %cst_400 : f32 to vector<8x64xf32>
    %698 = arith.subf %697, %689 : vector<8x64xf32>
    %699 = arith.mulf %698, %696 : vector<8x64xf32>
    %700 = arith.mulf %689, %669 : vector<8x64xf32>
    %701 = arith.addf %699, %700 : vector<8x64xf32>
    %702 = arith.truncf %701 : vector<8x64xf32> to vector<8x64xbf16>
    %cst_401 = arith.constant dense<0.000000e+00> : vector<8x192xf32>
    %703 = tpu.matmul %702, %665, %cst_401 {dimension_numbers = #tpu.dot_dimension_numbers<[1], [0], [0], [1], [0, 0, 1, 1], [], []>} : vector<8x64xbf16>, vector<64x192xbf16>, vector<8x192xf32> -> vector<8x192xf32>
    %c0_402 = arith.constant 0 : index
    %c1_403 = arith.constant 1 : index
    %c0_404 = arith.constant 0 : index
    %c0_405 = arith.constant 0 : index
    %704 = vector.load %arg24[%c0_402, %c1_403, %c0_404, %c0_405] : memref<3x8x8x64xf32, #tpu.memory_space<vmem>>, vector<1x1x8x64xf32>
    %705 = vector.shape_cast %704 : vector<1x1x8x64xf32> to vector<8x64xf32>
    %706 = vector.extract_strided_slice %703 {offsets = [0, 0], sizes = [8, 64], strides = [1, 1]} : vector<8x192xf32> to vector<8x64xf32>
    %707 = arith.addf %705, %706 : vector<8x64xf32>
    %708 = arith.negf %707 : vector<8x64xf32>
    %709 = math.exp %708 : vector<8x64xf32>
    %cst_406 = arith.constant 1.000000e+00 : f32
    %710 = vector.broadcast %cst_406 : f32 to vector<8x64xf32>
    %711 = arith.addf %710, %709 : vector<8x64xf32>
    %712 = arith.divf %710, %711 : vector<8x64xf32>
    %c1_407 = arith.constant 1 : index
    %c1_408 = arith.constant 1 : index
    %c0_409 = arith.constant 0 : index
    %c0_410 = arith.constant 0 : index
    %713 = vector.load %arg24[%c1_407, %c1_408, %c0_409, %c0_410] : memref<3x8x8x64xf32, #tpu.memory_space<vmem>>, vector<1x1x8x64xf32>
    %714 = vector.shape_cast %713 : vector<1x1x8x64xf32> to vector<8x64xf32>
    %715 = vector.extract_strided_slice %703 {offsets = [0, 64], sizes = [8, 64], strides = [1, 1]} : vector<8x192xf32> to vector<8x64xf32>
    %716 = arith.addf %714, %715 : vector<8x64xf32>
    %717 = arith.negf %716 : vector<8x64xf32>
    %718 = math.exp %717 : vector<8x64xf32>
    %cst_411 = arith.constant 1.000000e+00 : f32
    %719 = vector.broadcast %cst_411 : f32 to vector<8x64xf32>
    %720 = arith.addf %719, %718 : vector<8x64xf32>
    %721 = arith.divf %719, %720 : vector<8x64xf32>
    %c2_412 = arith.constant 2 : index
    %c1_413 = arith.constant 1 : index
    %c0_414 = arith.constant 0 : index
    %c0_415 = arith.constant 0 : index
    %722 = vector.load %arg24[%c2_412, %c1_413, %c0_414, %c0_415] : memref<3x8x8x64xf32, #tpu.memory_space<vmem>>, vector<1x1x8x64xf32>
    %723 = vector.shape_cast %722 : vector<1x1x8x64xf32> to vector<8x64xf32>
    %724 = vector.extract_strided_slice %703 {offsets = [0, 128], sizes = [8, 64], strides = [1, 1]} : vector<8x192xf32> to vector<8x64xf32>
    %725 = arith.addf %724, %668 : vector<8x64xf32>
    %726 = arith.mulf %712, %725 : vector<8x64xf32>
    %727 = arith.addf %723, %726 : vector<8x64xf32>
    %728 = math.tanh %727 : vector<8x64xf32>
    %cst_416 = arith.constant 1.000000e+00 : f32
    %729 = vector.broadcast %cst_416 : f32 to vector<8x64xf32>
    %730 = arith.subf %729, %721 : vector<8x64xf32>
    %731 = arith.mulf %730, %728 : vector<8x64xf32>
    %732 = arith.mulf %721, %701 : vector<8x64xf32>
    %733 = arith.addf %731, %732 : vector<8x64xf32>
    %734 = arith.truncf %733 : vector<8x64xf32> to vector<8x64xbf16>
    %cst_417 = arith.constant dense<0.000000e+00> : vector<8x192xf32>
    %735 = tpu.matmul %734, %665, %cst_417 {dimension_numbers = #tpu.dot_dimension_numbers<[1], [0], [0], [1], [0, 0, 1, 1], [], []>} : vector<8x64xbf16>, vector<64x192xbf16>, vector<8x192xf32> -> vector<8x192xf32>
    %c0_418 = arith.constant 0 : index
    %c2_419 = arith.constant 2 : index
    %c0_420 = arith.constant 0 : index
    %c0_421 = arith.constant 0 : index
    %736 = vector.load %arg24[%c0_418, %c2_419, %c0_420, %c0_421] : memref<3x8x8x64xf32, #tpu.memory_space<vmem>>, vector<1x1x8x64xf32>
    %737 = vector.shape_cast %736 : vector<1x1x8x64xf32> to vector<8x64xf32>
    %738 = vector.extract_strided_slice %735 {offsets = [0, 0], sizes = [8, 64], strides = [1, 1]} : vector<8x192xf32> to vector<8x64xf32>
    %739 = arith.addf %737, %738 : vector<8x64xf32>
    %740 = arith.negf %739 : vector<8x64xf32>
    %741 = math.exp %740 : vector<8x64xf32>
    %cst_422 = arith.constant 1.000000e+00 : f32
    %742 = vector.broadcast %cst_422 : f32 to vector<8x64xf32>
    %743 = arith.addf %742, %741 : vector<8x64xf32>
    %744 = arith.divf %742, %743 : vector<8x64xf32>
    %c1_423 = arith.constant 1 : index
    %c2_424 = arith.constant 2 : index
    %c0_425 = arith.constant 0 : index
    %c0_426 = arith.constant 0 : index
    %745 = vector.load %arg24[%c1_423, %c2_424, %c0_425, %c0_426] : memref<3x8x8x64xf32, #tpu.memory_space<vmem>>, vector<1x1x8x64xf32>
    %746 = vector.shape_cast %745 : vector<1x1x8x64xf32> to vector<8x64xf32>
    %747 = vector.extract_strided_slice %735 {offsets = [0, 64], sizes = [8, 64], strides = [1, 1]} : vector<8x192xf32> to vector<8x64xf32>
    %748 = arith.addf %746, %747 : vector<8x64xf32>
    %749 = arith.negf %748 : vector<8x64xf32>
    %750 = math.exp %749 : vector<8x64xf32>
    %cst_427 = arith.constant 1.000000e+00 : f32
    %751 = vector.broadcast %cst_427 : f32 to vector<8x64xf32>
    %752 = arith.addf %751, %750 : vector<8x64xf32>
    %753 = arith.divf %751, %752 : vector<8x64xf32>
    %c2_428 = arith.constant 2 : index
    %c2_429 = arith.constant 2 : index
    %c0_430 = arith.constant 0 : index
    %c0_431 = arith.constant 0 : index
    %754 = vector.load %arg24[%c2_428, %c2_429, %c0_430, %c0_431] : memref<3x8x8x64xf32, #tpu.memory_space<vmem>>, vector<1x1x8x64xf32>
    %755 = vector.shape_cast %754 : vector<1x1x8x64xf32> to vector<8x64xf32>
    %756 = vector.extract_strided_slice %735 {offsets = [0, 128], sizes = [8, 64], strides = [1, 1]} : vector<8x192xf32> to vector<8x64xf32>
    %757 = arith.addf %756, %668 : vector<8x64xf32>
    %758 = arith.mulf %744, %757 : vector<8x64xf32>
    %759 = arith.addf %755, %758 : vector<8x64xf32>
    %760 = math.tanh %759 : vector<8x64xf32>
    %cst_432 = arith.constant 1.000000e+00 : f32
    %761 = vector.broadcast %cst_432 : f32 to vector<8x64xf32>
    %762 = arith.subf %761, %753 : vector<8x64xf32>
    %763 = arith.mulf %762, %760 : vector<8x64xf32>
    %764 = arith.mulf %753, %733 : vector<8x64xf32>
    %765 = arith.addf %763, %764 : vector<8x64xf32>
    %766 = arith.truncf %765 : vector<8x64xf32> to vector<8x64xbf16>
    %cst_433 = arith.constant dense<0.000000e+00> : vector<8x192xf32>
    %767 = tpu.matmul %766, %665, %cst_433 {dimension_numbers = #tpu.dot_dimension_numbers<[1], [0], [0], [1], [0, 0, 1, 1], [], []>} : vector<8x64xbf16>, vector<64x192xbf16>, vector<8x192xf32> -> vector<8x192xf32>
    %c0_434 = arith.constant 0 : index
    %c3_435 = arith.constant 3 : index
    %c0_436 = arith.constant 0 : index
    %c0_437 = arith.constant 0 : index
    %768 = vector.load %arg24[%c0_434, %c3_435, %c0_436, %c0_437] : memref<3x8x8x64xf32, #tpu.memory_space<vmem>>, vector<1x1x8x64xf32>
    %769 = vector.shape_cast %768 : vector<1x1x8x64xf32> to vector<8x64xf32>
    %770 = vector.extract_strided_slice %767 {offsets = [0, 0], sizes = [8, 64], strides = [1, 1]} : vector<8x192xf32> to vector<8x64xf32>
    %771 = arith.addf %769, %770 : vector<8x64xf32>
    %772 = arith.negf %771 : vector<8x64xf32>
    %773 = math.exp %772 : vector<8x64xf32>
    %cst_438 = arith.constant 1.000000e+00 : f32
    %774 = vector.broadcast %cst_438 : f32 to vector<8x64xf32>
    %775 = arith.addf %774, %773 : vector<8x64xf32>
    %776 = arith.divf %774, %775 : vector<8x64xf32>
    %c1_439 = arith.constant 1 : index
    %c3_440 = arith.constant 3 : index
    %c0_441 = arith.constant 0 : index
    %c0_442 = arith.constant 0 : index
    %777 = vector.load %arg24[%c1_439, %c3_440, %c0_441, %c0_442] : memref<3x8x8x64xf32, #tpu.memory_space<vmem>>, vector<1x1x8x64xf32>
    %778 = vector.shape_cast %777 : vector<1x1x8x64xf32> to vector<8x64xf32>
    %779 = vector.extract_strided_slice %767 {offsets = [0, 64], sizes = [8, 64], strides = [1, 1]} : vector<8x192xf32> to vector<8x64xf32>
    %780 = arith.addf %778, %779 : vector<8x64xf32>
    %781 = arith.negf %780 : vector<8x64xf32>
    %782 = math.exp %781 : vector<8x64xf32>
    %cst_443 = arith.constant 1.000000e+00 : f32
    %783 = vector.broadcast %cst_443 : f32 to vector<8x64xf32>
    %784 = arith.addf %783, %782 : vector<8x64xf32>
    %785 = arith.divf %783, %784 : vector<8x64xf32>
    %c2_444 = arith.constant 2 : index
    %c3_445 = arith.constant 3 : index
    %c0_446 = arith.constant 0 : index
    %c0_447 = arith.constant 0 : index
    %786 = vector.load %arg24[%c2_444, %c3_445, %c0_446, %c0_447] : memref<3x8x8x64xf32, #tpu.memory_space<vmem>>, vector<1x1x8x64xf32>
    %787 = vector.shape_cast %786 : vector<1x1x8x64xf32> to vector<8x64xf32>
    %788 = vector.extract_strided_slice %767 {offsets = [0, 128], sizes = [8, 64], strides = [1, 1]} : vector<8x192xf32> to vector<8x64xf32>
    %789 = arith.addf %788, %668 : vector<8x64xf32>
    %790 = arith.mulf %776, %789 : vector<8x64xf32>
    %791 = arith.addf %787, %790 : vector<8x64xf32>
    %792 = math.tanh %791 : vector<8x64xf32>
    %cst_448 = arith.constant 1.000000e+00 : f32
    %793 = vector.broadcast %cst_448 : f32 to vector<8x64xf32>
    %794 = arith.subf %793, %785 : vector<8x64xf32>
    %795 = arith.mulf %794, %792 : vector<8x64xf32>
    %796 = arith.mulf %785, %765 : vector<8x64xf32>
    %797 = arith.addf %795, %796 : vector<8x64xf32>
    %798 = arith.truncf %797 : vector<8x64xf32> to vector<8x64xbf16>
    %cst_449 = arith.constant dense<0.000000e+00> : vector<8x192xf32>
    %799 = tpu.matmul %798, %665, %cst_449 {dimension_numbers = #tpu.dot_dimension_numbers<[1], [0], [0], [1], [0, 0, 1, 1], [], []>} : vector<8x64xbf16>, vector<64x192xbf16>, vector<8x192xf32> -> vector<8x192xf32>
    %c0_450 = arith.constant 0 : index
    %c4_451 = arith.constant 4 : index
    %c0_452 = arith.constant 0 : index
    %c0_453 = arith.constant 0 : index
    %800 = vector.load %arg24[%c0_450, %c4_451, %c0_452, %c0_453] : memref<3x8x8x64xf32, #tpu.memory_space<vmem>>, vector<1x1x8x64xf32>
    %801 = vector.shape_cast %800 : vector<1x1x8x64xf32> to vector<8x64xf32>
    %802 = vector.extract_strided_slice %799 {offsets = [0, 0], sizes = [8, 64], strides = [1, 1]} : vector<8x192xf32> to vector<8x64xf32>
    %803 = arith.addf %801, %802 : vector<8x64xf32>
    %804 = arith.negf %803 : vector<8x64xf32>
    %805 = math.exp %804 : vector<8x64xf32>
    %cst_454 = arith.constant 1.000000e+00 : f32
    %806 = vector.broadcast %cst_454 : f32 to vector<8x64xf32>
    %807 = arith.addf %806, %805 : vector<8x64xf32>
    %808 = arith.divf %806, %807 : vector<8x64xf32>
    %c1_455 = arith.constant 1 : index
    %c4_456 = arith.constant 4 : index
    %c0_457 = arith.constant 0 : index
    %c0_458 = arith.constant 0 : index
    %809 = vector.load %arg24[%c1_455, %c4_456, %c0_457, %c0_458] : memref<3x8x8x64xf32, #tpu.memory_space<vmem>>, vector<1x1x8x64xf32>
    %810 = vector.shape_cast %809 : vector<1x1x8x64xf32> to vector<8x64xf32>
    %811 = vector.extract_strided_slice %799 {offsets = [0, 64], sizes = [8, 64], strides = [1, 1]} : vector<8x192xf32> to vector<8x64xf32>
    %812 = arith.addf %810, %811 : vector<8x64xf32>
    %813 = arith.negf %812 : vector<8x64xf32>
    %814 = math.exp %813 : vector<8x64xf32>
    %cst_459 = arith.constant 1.000000e+00 : f32
    %815 = vector.broadcast %cst_459 : f32 to vector<8x64xf32>
    %816 = arith.addf %815, %814 : vector<8x64xf32>
    %817 = arith.divf %815, %816 : vector<8x64xf32>
    %c2_460 = arith.constant 2 : index
    %c4_461 = arith.constant 4 : index
    %c0_462 = arith.constant 0 : index
    %c0_463 = arith.constant 0 : index
    %818 = vector.load %arg24[%c2_460, %c4_461, %c0_462, %c0_463] : memref<3x8x8x64xf32, #tpu.memory_space<vmem>>, vector<1x1x8x64xf32>
    %819 = vector.shape_cast %818 : vector<1x1x8x64xf32> to vector<8x64xf32>
    %820 = vector.extract_strided_slice %799 {offsets = [0, 128], sizes = [8, 64], strides = [1, 1]} : vector<8x192xf32> to vector<8x64xf32>
    %821 = arith.addf %820, %668 : vector<8x64xf32>
    %822 = arith.mulf %808, %821 : vector<8x64xf32>
    %823 = arith.addf %819, %822 : vector<8x64xf32>
    %824 = math.tanh %823 : vector<8x64xf32>
    %cst_464 = arith.constant 1.000000e+00 : f32
    %825 = vector.broadcast %cst_464 : f32 to vector<8x64xf32>
    %826 = arith.subf %825, %817 : vector<8x64xf32>
    %827 = arith.mulf %826, %824 : vector<8x64xf32>
    %828 = arith.mulf %817, %797 : vector<8x64xf32>
    %829 = arith.addf %827, %828 : vector<8x64xf32>
    %830 = arith.truncf %829 : vector<8x64xf32> to vector<8x64xbf16>
    %cst_465 = arith.constant dense<0.000000e+00> : vector<8x192xf32>
    %831 = tpu.matmul %830, %665, %cst_465 {dimension_numbers = #tpu.dot_dimension_numbers<[1], [0], [0], [1], [0, 0, 1, 1], [], []>} : vector<8x64xbf16>, vector<64x192xbf16>, vector<8x192xf32> -> vector<8x192xf32>
    %c0_466 = arith.constant 0 : index
    %c5_467 = arith.constant 5 : index
    %c0_468 = arith.constant 0 : index
    %c0_469 = arith.constant 0 : index
    %832 = vector.load %arg24[%c0_466, %c5_467, %c0_468, %c0_469] : memref<3x8x8x64xf32, #tpu.memory_space<vmem>>, vector<1x1x8x64xf32>
    %833 = vector.shape_cast %832 : vector<1x1x8x64xf32> to vector<8x64xf32>
    %834 = vector.extract_strided_slice %831 {offsets = [0, 0], sizes = [8, 64], strides = [1, 1]} : vector<8x192xf32> to vector<8x64xf32>
    %835 = arith.addf %833, %834 : vector<8x64xf32>
    %836 = arith.negf %835 : vector<8x64xf32>
    %837 = math.exp %836 : vector<8x64xf32>
    %cst_470 = arith.constant 1.000000e+00 : f32
    %838 = vector.broadcast %cst_470 : f32 to vector<8x64xf32>
    %839 = arith.addf %838, %837 : vector<8x64xf32>
    %840 = arith.divf %838, %839 : vector<8x64xf32>
    %c1_471 = arith.constant 1 : index
    %c5_472 = arith.constant 5 : index
    %c0_473 = arith.constant 0 : index
    %c0_474 = arith.constant 0 : index
    %841 = vector.load %arg24[%c1_471, %c5_472, %c0_473, %c0_474] : memref<3x8x8x64xf32, #tpu.memory_space<vmem>>, vector<1x1x8x64xf32>
    %842 = vector.shape_cast %841 : vector<1x1x8x64xf32> to vector<8x64xf32>
    %843 = vector.extract_strided_slice %831 {offsets = [0, 64], sizes = [8, 64], strides = [1, 1]} : vector<8x192xf32> to vector<8x64xf32>
    %844 = arith.addf %842, %843 : vector<8x64xf32>
    %845 = arith.negf %844 : vector<8x64xf32>
    %846 = math.exp %845 : vector<8x64xf32>
    %cst_475 = arith.constant 1.000000e+00 : f32
    %847 = vector.broadcast %cst_475 : f32 to vector<8x64xf32>
    %848 = arith.addf %847, %846 : vector<8x64xf32>
    %849 = arith.divf %847, %848 : vector<8x64xf32>
    %c2_476 = arith.constant 2 : index
    %c5_477 = arith.constant 5 : index
    %c0_478 = arith.constant 0 : index
    %c0_479 = arith.constant 0 : index
    %850 = vector.load %arg24[%c2_476, %c5_477, %c0_478, %c0_479] : memref<3x8x8x64xf32, #tpu.memory_space<vmem>>, vector<1x1x8x64xf32>
    %851 = vector.shape_cast %850 : vector<1x1x8x64xf32> to vector<8x64xf32>
    %852 = vector.extract_strided_slice %831 {offsets = [0, 128], sizes = [8, 64], strides = [1, 1]} : vector<8x192xf32> to vector<8x64xf32>
    %853 = arith.addf %852, %668 : vector<8x64xf32>
    %854 = arith.mulf %840, %853 : vector<8x64xf32>
    %855 = arith.addf %851, %854 : vector<8x64xf32>
    %856 = math.tanh %855 : vector<8x64xf32>
    %cst_480 = arith.constant 1.000000e+00 : f32
    %857 = vector.broadcast %cst_480 : f32 to vector<8x64xf32>
    %858 = arith.subf %857, %849 : vector<8x64xf32>
    %859 = arith.mulf %858, %856 : vector<8x64xf32>
    %860 = arith.mulf %849, %829 : vector<8x64xf32>
    %861 = arith.addf %859, %860 : vector<8x64xf32>
    %862 = arith.truncf %861 : vector<8x64xf32> to vector<8x64xbf16>
    %cst_481 = arith.constant dense<0.000000e+00> : vector<8x192xf32>
    %863 = tpu.matmul %862, %665, %cst_481 {dimension_numbers = #tpu.dot_dimension_numbers<[1], [0], [0], [1], [0, 0, 1, 1], [], []>} : vector<8x64xbf16>, vector<64x192xbf16>, vector<8x192xf32> -> vector<8x192xf32>
    %c0_482 = arith.constant 0 : index
    %c6_483 = arith.constant 6 : index
    %c0_484 = arith.constant 0 : index
    %c0_485 = arith.constant 0 : index
    %864 = vector.load %arg24[%c0_482, %c6_483, %c0_484, %c0_485] : memref<3x8x8x64xf32, #tpu.memory_space<vmem>>, vector<1x1x8x64xf32>
    %865 = vector.shape_cast %864 : vector<1x1x8x64xf32> to vector<8x64xf32>
    %866 = vector.extract_strided_slice %863 {offsets = [0, 0], sizes = [8, 64], strides = [1, 1]} : vector<8x192xf32> to vector<8x64xf32>
    %867 = arith.addf %865, %866 : vector<8x64xf32>
    %868 = arith.negf %867 : vector<8x64xf32>
    %869 = math.exp %868 : vector<8x64xf32>
    %cst_486 = arith.constant 1.000000e+00 : f32
    %870 = vector.broadcast %cst_486 : f32 to vector<8x64xf32>
    %871 = arith.addf %870, %869 : vector<8x64xf32>
    %872 = arith.divf %870, %871 : vector<8x64xf32>
    %c1_487 = arith.constant 1 : index
    %c6_488 = arith.constant 6 : index
    %c0_489 = arith.constant 0 : index
    %c0_490 = arith.constant 0 : index
    %873 = vector.load %arg24[%c1_487, %c6_488, %c0_489, %c0_490] : memref<3x8x8x64xf32, #tpu.memory_space<vmem>>, vector<1x1x8x64xf32>
    %874 = vector.shape_cast %873 : vector<1x1x8x64xf32> to vector<8x64xf32>
    %875 = vector.extract_strided_slice %863 {offsets = [0, 64], sizes = [8, 64], strides = [1, 1]} : vector<8x192xf32> to vector<8x64xf32>
    %876 = arith.addf %874, %875 : vector<8x64xf32>
    %877 = arith.negf %876 : vector<8x64xf32>
    %878 = math.exp %877 : vector<8x64xf32>
    %cst_491 = arith.constant 1.000000e+00 : f32
    %879 = vector.broadcast %cst_491 : f32 to vector<8x64xf32>
    %880 = arith.addf %879, %878 : vector<8x64xf32>
    %881 = arith.divf %879, %880 : vector<8x64xf32>
    %c2_492 = arith.constant 2 : index
    %c6_493 = arith.constant 6 : index
    %c0_494 = arith.constant 0 : index
    %c0_495 = arith.constant 0 : index
    %882 = vector.load %arg24[%c2_492, %c6_493, %c0_494, %c0_495] : memref<3x8x8x64xf32, #tpu.memory_space<vmem>>, vector<1x1x8x64xf32>
    %883 = vector.shape_cast %882 : vector<1x1x8x64xf32> to vector<8x64xf32>
    %884 = vector.extract_strided_slice %863 {offsets = [0, 128], sizes = [8, 64], strides = [1, 1]} : vector<8x192xf32> to vector<8x64xf32>
    %885 = arith.addf %884, %668 : vector<8x64xf32>
    %886 = arith.mulf %872, %885 : vector<8x64xf32>
    %887 = arith.addf %883, %886 : vector<8x64xf32>
    %888 = math.tanh %887 : vector<8x64xf32>
    %cst_496 = arith.constant 1.000000e+00 : f32
    %889 = vector.broadcast %cst_496 : f32 to vector<8x64xf32>
    %890 = arith.subf %889, %881 : vector<8x64xf32>
    %891 = arith.mulf %890, %888 : vector<8x64xf32>
    %892 = arith.mulf %881, %861 : vector<8x64xf32>
    %893 = arith.addf %891, %892 : vector<8x64xf32>
    %894 = arith.truncf %893 : vector<8x64xf32> to vector<8x64xbf16>
    %cst_497 = arith.constant dense<0.000000e+00> : vector<8x192xf32>
    %895 = tpu.matmul %894, %665, %cst_497 {dimension_numbers = #tpu.dot_dimension_numbers<[1], [0], [0], [1], [0, 0, 1, 1], [], []>} : vector<8x64xbf16>, vector<64x192xbf16>, vector<8x192xf32> -> vector<8x192xf32>
    %c0_498 = arith.constant 0 : index
    %c7_499 = arith.constant 7 : index
    %c0_500 = arith.constant 0 : index
    %c0_501 = arith.constant 0 : index
    %896 = vector.load %arg24[%c0_498, %c7_499, %c0_500, %c0_501] : memref<3x8x8x64xf32, #tpu.memory_space<vmem>>, vector<1x1x8x64xf32>
    %897 = vector.shape_cast %896 : vector<1x1x8x64xf32> to vector<8x64xf32>
    %898 = vector.extract_strided_slice %895 {offsets = [0, 0], sizes = [8, 64], strides = [1, 1]} : vector<8x192xf32> to vector<8x64xf32>
    %899 = arith.addf %897, %898 : vector<8x64xf32>
    %900 = arith.negf %899 : vector<8x64xf32>
    %901 = math.exp %900 : vector<8x64xf32>
    %cst_502 = arith.constant 1.000000e+00 : f32
    %902 = vector.broadcast %cst_502 : f32 to vector<8x64xf32>
    %903 = arith.addf %902, %901 : vector<8x64xf32>
    %904 = arith.divf %902, %903 : vector<8x64xf32>
    %c1_503 = arith.constant 1 : index
    %c7_504 = arith.constant 7 : index
    %c0_505 = arith.constant 0 : index
    %c0_506 = arith.constant 0 : index
    %905 = vector.load %arg24[%c1_503, %c7_504, %c0_505, %c0_506] : memref<3x8x8x64xf32, #tpu.memory_space<vmem>>, vector<1x1x8x64xf32>
    %906 = vector.shape_cast %905 : vector<1x1x8x64xf32> to vector<8x64xf32>
    %907 = vector.extract_strided_slice %895 {offsets = [0, 64], sizes = [8, 64], strides = [1, 1]} : vector<8x192xf32> to vector<8x64xf32>
    %908 = arith.addf %906, %907 : vector<8x64xf32>
    %909 = arith.negf %908 : vector<8x64xf32>
    %910 = math.exp %909 : vector<8x64xf32>
    %cst_507 = arith.constant 1.000000e+00 : f32
    %911 = vector.broadcast %cst_507 : f32 to vector<8x64xf32>
    %912 = arith.addf %911, %910 : vector<8x64xf32>
    %913 = arith.divf %911, %912 : vector<8x64xf32>
    %c2_508 = arith.constant 2 : index
    %c7_509 = arith.constant 7 : index
    %c0_510 = arith.constant 0 : index
    %c0_511 = arith.constant 0 : index
    %914 = vector.load %arg24[%c2_508, %c7_509, %c0_510, %c0_511] : memref<3x8x8x64xf32, #tpu.memory_space<vmem>>, vector<1x1x8x64xf32>
    %915 = vector.shape_cast %914 : vector<1x1x8x64xf32> to vector<8x64xf32>
    %916 = vector.extract_strided_slice %895 {offsets = [0, 128], sizes = [8, 64], strides = [1, 1]} : vector<8x192xf32> to vector<8x64xf32>
    %917 = arith.addf %916, %668 : vector<8x64xf32>
    %918 = arith.mulf %904, %917 : vector<8x64xf32>
    %919 = arith.addf %915, %918 : vector<8x64xf32>
    %920 = math.tanh %919 : vector<8x64xf32>
    %cst_512 = arith.constant 1.000000e+00 : f32
    %921 = vector.broadcast %cst_512 : f32 to vector<8x64xf32>
    %922 = arith.subf %921, %913 : vector<8x64xf32>
    %923 = arith.mulf %922, %920 : vector<8x64xf32>
    %924 = arith.mulf %913, %893 : vector<8x64xf32>
    %925 = arith.addf %923, %924 : vector<8x64xf32>
    %c0_513 = arith.constant 0 : index
    %c0_514 = arith.constant 0 : index
    %926 = vector.load %arg22[%c0_513, %c0_514] : memref<8x64xf32, #tpu.memory_space<vmem>>, vector<8x64xf32>
    tpu.vector_store %arg22[%c0_513, %c0_514], %925 {strides = array<i32>} : memref<8x64xf32, #tpu.memory_space<vmem>>, vector<8x64xf32>,
    return
  }
  func.func @transform_0(%arg0: i32) -> (i32, i32, i32) {
    %c0_i32 = arith.constant 0 : i32
    %c0_i32_0 = arith.constant 0 : i32
    %c0_i32_1 = arith.constant 0 : i32
    return %c0_i32, %arg0, %c0_i32_0 : i32, i32, i32
  }
  func.func @transform_1(%arg0: i32) -> (i32, i32) {
    %c0_i32 = arith.constant 0 : i32
    %c0_i32_0 = arith.constant 0 : i32
    %c0_i32_1 = arith.constant 0 : i32
    return %c0_i32, %c0_i32_0 : i32, i32
  }
  func.func @transform_2(%arg0: i32) -> (i32, i32) {
    %c0_i32 = arith.constant 0 : i32
    %c0_i32_0 = arith.constant 0 : i32
    %c0_i32_1 = arith.constant 0 : i32
    return %c0_i32, %c0_i32_0 : i32, i32
  }
  func.func @transform_3(%arg0: i32) -> (i32, i32) {
    %c0_i32 = arith.constant 0 : i32
    %c0_i32_0 = arith.constant 0 : i32
    %c0_i32_1 = arith.constant 0 : i32
    return %c0_i32, %c0_i32_0 : i32, i32
  }
  func.func @transform_4(%arg0: i32) -> (i32, i32) {
    %c0_i32 = arith.constant 0 : i32
    %c0_i32_0 = arith.constant 0 : i32
    %c0_i32_1 = arith.constant 0 : i32
    return %c0_i32, %c0_i32_0 : i32, i32
  }
  func.func @transform_5(%arg0: i32) -> (i32, i32) {
    %c0_i32 = arith.constant 0 : i32
    %c0_i32_0 = arith.constant 0 : i32
    %c0_i32_1 = arith.constant 0 : i32
    return %c0_i32, %c0_i32_0 : i32, i32
  }
  func.func @transform_6(%arg0: i32) -> (i32, i32) {
    %c0_i32 = arith.constant 0 : i32
    %c0_i32_0 = arith.constant 0 : i32
    %c0_i32_1 = arith.constant 0 : i32
    return %c0_i32, %c0_i32_0 : i32, i32
  }
  func.func @transform_7(%arg0: i32) -> (i32, i32) {
    %c0_i32 = arith.constant 0 : i32
    %c0_i32_0 = arith.constant 0 : i32
    %c0_i32_1 = arith.constant 0 : i32
    return %c0_i32, %c0_i32_0 : i32, i32
  }
  func.func @transform_8(%arg0: i32) -> (i32, i32) {
    %c0_i32 = arith.constant 0 : i32
    %c0_i32_0 = arith.constant 0 : i32
    %c0_i32_1 = arith.constant 0 : i32
    return %c0_i32, %c0_i32_0 : i32, i32
  }
  func.func @transform_9(%arg0: i32) -> (i32, i32) {
    %c0_i32 = arith.constant 0 : i32
    %c0_i32_0 = arith.constant 0 : i32
    %c0_i32_1 = arith.constant 0 : i32
    return %c0_i32, %c0_i32_0 : i32, i32
  }
  func.func @transform_10(%arg0: i32) -> (i32, i32) {
    %c0_i32 = arith.constant 0 : i32
    %c0_i32_0 = arith.constant 0 : i32
    %c0_i32_1 = arith.constant 0 : i32
    return %c0_i32, %c0_i32_0 : i32, i32
  }
  func.func @transform_11(%arg0: i32) -> (i32, i32) {
    %c0_i32 = arith.constant 0 : i32
    %c0_i32_0 = arith.constant 0 : i32
    %c0_i32_1 = arith.constant 0 : i32
    return %c0_i32, %c0_i32_0 : i32, i32
  }
  func.func @transform_12(%arg0: i32) -> (i32, i32) {
    %c0_i32 = arith.constant 0 : i32
    %c0_i32_0 = arith.constant 0 : i32
    %c0_i32_1 = arith.constant 0 : i32
    return %c0_i32, %c0_i32_0 : i32, i32
  }
  func.func @transform_13(%arg0: i32) -> (i32, i32) {
    %c0_i32 = arith.constant 0 : i32
    %c0_i32_0 = arith.constant 0 : i32
    %c0_i32_1 = arith.constant 0 : i32
    return %c0_i32, %c0_i32_0 : i32, i32
  }
  func.func @transform_14(%arg0: i32) -> (i32, i32) {
    %c0_i32 = arith.constant 0 : i32
    %c0_i32_0 = arith.constant 0 : i32
    %c0_i32_1 = arith.constant 0 : i32
    return %c0_i32, %c0_i32_0 : i32, i32
  }
  func.func @transform_15(%arg0: i32) -> (i32, i32) {
    %c0_i32 = arith.constant 0 : i32
    %c0_i32_0 = arith.constant 0 : i32
    %c0_i32_1 = arith.constant 0 : i32
    return %c0_i32, %c0_i32_0 : i32, i32
  }
  func.func @transform_16(%arg0: i32) -> (i32, i32) {
    %c0_i32 = arith.constant 0 : i32
    %c0_i32_0 = arith.constant 0 : i32
    %c0_i32_1 = arith.constant 0 : i32
    return %c0_i32, %c0_i32_0 : i32, i32
  }
  func.func @transform_17(%arg0: i32) -> (i32, i32) {
    %c0_i32 = arith.constant 0 : i32
    %c0_i32_0 = arith.constant 0 : i32
    %c0_i32_1 = arith.constant 0 : i32
    return %c0_i32, %c0_i32_0 : i32, i32
  }
  func.func @transform_18(%arg0: i32) -> (i32, i32) {
    %c0_i32 = arith.constant 0 : i32
    %c0_i32_0 = arith.constant 0 : i32
    %c0_i32_1 = arith.constant 0 : i32
    return %c0_i32, %c0_i32_0 : i32, i32
  }
  func.func @transform_19(%arg0: i32) -> (i32, i32) {
    %c0_i32 = arith.constant 0 : i32
    %c0_i32_0 = arith.constant 0 : i32
    %c0_i32_1 = arith.constant 0 : i32
    return %c0_i32, %c0_i32_0 : i32, i32
  }
  func.func @transform_20(%arg0: i32) -> (i32, i32) {
    %c0_i32 = arith.constant 0 : i32
    %c0_i32_0 = arith.constant 0 : i32
    %c0_i32_1 = arith.constant 0 : i32
    return %c0_i32, %c0_i32_0 : i32, i32
  }
  func.func @transform_21(%arg0: i32) -> (i32, i32) {
    %c0_i32 = arith.constant 0 : i32
    %c0_i32_0 = arith.constant 0 : i32
    return %arg0, %c0_i32 : i32, i32
  }
}

</mosaic_0001>

<bundles_post_ra>
// kernel: gru_model_forward.1
= control target key start
LH: loop header
LB: loop body
LE: loop exit
PB: predicated region body
PF: predicated region fallthrough
CT: control target
= control target key end

     0   :  { %v3146_v1 = vmov 0   ;;  %vm147_vm0 = vcmask 523264   ;;  %s4090_s7 = inlined_call_operand.vmem [shape: bf16[64,192], index: 7, kind: input, shape index: {}]   ;;  %s4091_s0 = inlined_call_operand.vmem [shape: f32[8,8,1], index: 0, kind: input, shape index: {}]   ;;  %s4092_s1 = inlined_call_operand.vmem [shape: f32[1,64], index: 1, kind: input, shape index: {}]   ;;  %s4093_s2 = inlined_call_operand.vmem [shape: f32[1,64], index: 2, kind: input, shape index: {}]   ;;  %s4094_s3 = inlined_call_operand.vmem [shape: f32[1,64], index: 3, kind: input, shape index: {}]   ;;  %s4095_s4 = inlined_call_operand.vmem [shape: f32[1,64], index: 4, kind: input, shape index: {}]   ;;  %s4096_s5 = inlined_call_operand.vmem [shape: f32[1,64], index: 5, kind: input, shape index: {}]   ;;  %s4097_s6 = inlined_call_operand.vmem [shape: f32[1,64], index: 6, kind: input, shape index: {}]   ;;  %s4098_s8 = inlined_call_operand.vmem [shape: f32[1,64], index: 8, kind: input, shape index: {}]   ;;  %s4099_s9 = inlined_call_operand.vmem [shape: bf16[64,192], index: 9, kind: input, shape index: {}]   ;;  %s4100_s12 = inlined_call_operand.vmem [shape: f32[1,64], index: 12, kind: input, shape index: {}]   ;;  %s4101_s11 = inlined_call_operand.vmem [shape: f32[1,64], index: 11, kind: input, shape index: {}]   ;;  %s4102_s13 = inlined_call_operand.vmem [shape: f32[1,64], index: 13, kind: input, shape index: {}]   ;;  %s4103_s10 = inlined_call_operand.vmem [shape: bf16[64,192], index: 10, kind: input, shape index: {}]   ;;  %s4104_s14 = inlined_call_operand.vmem [shape: f32[1,64], index: 14, kind: input, shape index: {}]   ;;  %s4105_s15 = inlined_call_operand.vmem [shape: bf16[64,192], index: 15, kind: input, shape index: {}]   ;;  %s4106_s18 = inlined_call_operand.vmem [shape: f32[1,64], index: 18, kind: input, shape index: {}]   ;;  %s4107_s17 = inlined_call_operand.vmem [shape: f32[1,64], index: 17, kind: input, shape index: {}]   ;;  %s4108_s19 = inlined_call_operand.vmem [shape: f32[1,64], index: 19, kind: input, shape index: {}]   ;;  %s4109_s16 = inlined_call_operand.vmem [shape: bf16[64,192], index: 16, kind: input, shape index: {}]   ;;  %s4110_s20 = inlined_call_operand.vmem [shape: f32[1,64], index: 20, kind: input, shape index: {}]   ;;  %s4111_s21 = inlined_call_operand.vmem [shape: f32[8,64], index: 21, kind: output, shape index: {}]  }
   0x1   :  { %4114 = sst [smem:[#allocation4_spill]] %s4090_s7  ;;  %324 = vmatprep.mubr.bf16.mxu0 %v3146_v1  ;;  %2845 = vset.pattern.permute.xlu0 %v3146_v1  ;;  %v3356_v14 = vld [vmem:[%s4096_s5] ss:$0 sm:$0xff]  ;;  %s3147_s5 = smov 64  }
   0x2   :  { %4115 = sst [smem:[#allocation5_spill]] %s4091_s0  ;;  %s4120_s26 = sld [smem:[#allocation4_spill]]  ;;  %399 = vmatprep.mubr.bf16.mxu1 %v3146_v1  ;;  %2846 = vset.pattern.permute.xlu1 %v3146_v1  ;;  %v3361_v15 = vld [vmem:[%s4097_s6] ss:$0 sm:$0xff] }
   0x3   :  { %4116 = sst [smem:[#allocation6_spill]] %s4092_s1  ;;  %s4121_s0 = sld [smem:[#allocation5_spill]]  ;;  %v3391_v37 = vld [vmem:[%s4098_s8] ss:$0 sm:$0xff] }
   0x4   :  { %4117 = sst [smem:[#allocation7_spill]] %s4093_s2  ;;  %s4122_s29 = sld [smem:[#allocation6_spill]] }
   0x5   :  { %4118 = sst [smem:[#allocation8_spill]] %s4094_s3 }
   0x6   :  { %4119 = sst [smem:[#allocation9_spill]] %s4095_s4  ;;  %s4123_s4 = sld [smem:[#allocation7_spill]] }
   0x7   :  { %s4124_s24 = sld [smem:[#allocation8_spill]]  ;;  %s4125_s27 = sld [smem:[#allocation9_spill]] }
   0x8   :  { %v3261_v0 = vld [vmem:[%s4120_s26 + $0x4] ss:$8 sps:$4 sm:$0xff]   ;;  %v3268_v2 = vld [vmem:[%s4120_s26] ss:$8 sps:$4 sm:$0xff]   ;;  %v3276_v3 = vld [vmem:[%s4120_s26 + $0x14] ss:$8 sps:$4 sm:$0xff]  }
   0x9   :  { %292 = vmatprep.subr.bf16.mxu0 %v3261_v0  ;;  %367 = vmatprep.subr.bf16.mxu1 %v3261_v0  ;;  %v3283_v4 = vld [vmem:[%s4120_s26 + $0x10] ss:$8 sps:$4 sm:$0xff]   ;;  %v3290_v5 = vld [vmem:[%s4120_s26 + $0x24] ss:$8 sps:$4 sm:$0xff]   ;;  %v3300_v7 = vld [vmem:[%s4120_s26 + $0x20] ss:$8 sps:$4 sm:$0xff]  }
   0xa   :  { %293 = vmatpush1.bf16.msra.mxu0 %v3268_v2  ;;  %368 = vmatpush1.bf16.msra.mxu1 %v3268_v2  ;;  %v69_v6 = vld [vmem:[%s4121_s0] sm:$0xff]  ;;  %v3307_v8 = vld [vmem:[%s4120_s26 + $0x34] ss:$8 sps:$4 sm:$0xff]   ;;  %v3314_v9 = vld [vmem:[%s4120_s26 + $0x30] ss:$8 sps:$4 sm:$0xff]  }
   0xb   :  { %294 = vmatprep.subr.bf16.mxu0 %v3276_v3  ;;  %369 = vmatprep.subr.bf16.mxu1 %v3276_v3  ;;  %v3336_v10 = vld [vmem:[%s4122_s29] ss:$0 sm:$0xff]  ;;  %v71_v28 = vld [vmem:[%s4121_s0 + $0x10] sm:$0xff]  ;;  %v72_v31 = vld [vmem:[%s4121_s0 + $0x18] sm:$0xff] }
   0xc   :  { %80 = vperm.xlu0 %2845, %v69_v6   ;;  %v3341_v11 = vld [vmem:[%s4123_s4] ss:$0 sm:$0xff]  ;;  %v74_v33 = vld [vmem:[%s4121_s0 + $0x28] sm:$0xff]  ;;  %v75_v36 = vld [vmem:[%s4121_s0 + $0x30] sm:$0xff] }
   0xd   :  { %v3346_v12 = vld [vmem:[%s4124_s24] ss:$0 sm:$0xff]  ;;  %v70_v38 = vld [vmem:[%s4121_s0 + $0x8] sm:$0xff] }
   0xe   :  { %295 = vmatpush1.bf16.msra.mxu0 %v3283_v4  ;;  %370 = vmatpush1.bf16.msra.mxu1 %v3283_v4  ;;  %v3351_v13 = vld [vmem:[%s4125_s27] ss:$0 sm:$0xff] }
   0xf   :  { %296 = vmatprep.subr.bf16.mxu0 %v3290_v5  ;;  %371 = vmatprep.subr.bf16.mxu1 %v3290_v5  ;;  %v73_v32 = vld [vmem:[%s4121_s0 + $0x20] sm:$0xff] }
  0x10   :  { %85 = vperm.xlu1 %2846, %v70_v38  }
  0x12   :  { %297 = vmatpush1.bf16.msra.mxu0 %v3300_v7  ;;  %372 = vmatpush1.bf16.msra.mxu1 %v3300_v7 }
  0x13   :  { %298 = vmatprep.subr.bf16.mxu0 %v3307_v8  ;;  %373 = vmatprep.subr.bf16.mxu1 %v3307_v8 }
  0x16   :  { %299 = vmatpush1.bf16.msra.mxu0 %v3314_v9  ;;  %374 = vmatpush1.bf16.msra.mxu1 %v3314_v9 }
  0x17   :  { %446 = vmatprep.subr.bf16.mxu0 %v3261_v0  ;;  %525 = vmatprep.subr.bf16.mxu1 %v3261_v0 }
  0x19   :  { %325 = vmatmul.mubr.bf16.vlgmr.msra.gmra.mrb[0].mxu0 %v3146_v1 }
  0x1a   :  { %447 = vmatpush1.bf16.msra.mxu0 %v3268_v2  ;;  %478 = vmatprep.mubr.bf16.mxu0 %v3146_v1 }
  0x1b   :  { %448 = vmatprep.subr.bf16.mxu0 %v3276_v3 }
  0x1e   :  { %449 = vmatpush1.bf16.msra.mxu0 %v3283_v4 }
  0x1f   :  { %450 = vmatprep.subr.bf16.mxu0 %v3290_v5 }
  0x22   :  { %451 = vmatpush1.bf16.msra.mxu0 %v3300_v7 }
  0x23   :  { %452 = vmatprep.subr.bf16.mxu0 %v3307_v8 }
  0x26   :  { %453 = vmatpush1.bf16.msra.mxu0 %v3314_v9 }
  0x27   :  { %604 = vmatprep.subr.bf16.mxu0 %v3261_v0 }
  0x8b   :  { %v81_v16 = vpop.permute.xlu0 %80 }
  0x8c   :  { %v124_v17 = vmul.f32 %v3336_v10, %v81_v16  ;;  %v163_v18 = vmul.f32 %v3341_v11, %v81_v16  ;;  %v202_v19 = vmul.f32 %v3346_v12, %v81_v16 }
  0x8e   :  { %v139_v20 = vadd.f32 %v3351_v13, %v124_v17  ;;  %v178_v21 = vadd.f32 %v3356_v14, %v163_v18  ;;  %v217_v22 = vadd.f32 %v3361_v15, %v202_v19 }
  0x90   :  { %148 = vst.msk [vmem:[#allocation3] sm:$0xff] %vm147_vm0, %v139_v20  ;;  %187 = vst.msk [vmem:[#allocation3 + $0x40] sm:$0xff] %vm147_vm0, %v178_v21 }
  0x91   :  { %226 = vst.msk [vmem:[#allocation3 + $0x80] sm:$0xff] %vm147_vm0, %v217_v22 }
  0x97   :  { %v333_v23 = vld [vmem:[#allocation3] sm:$0xff] }
  0x98   :  { %v341_v42 = vld [vmem:[#allocation3 + $0x40] sm:$0xff] }
  0x99   :  { %v353_v46 = vld [vmem:[#allocation3 + $0x80] sm:$0xff] }
  0xec   :  { %v326_v24 = vpop.f32.mrb[0].mxu0 }
  0xed   :  { %v334_v25 = vadd.f32 %v333_v23, %v326_v24  ;;  %v328_v26 = vpop.f32.mrb[1].mxu0  ;;  %343 = vrot.lane.b32.xlu0 %v326_v24, %s3147_s5 }
  0xee   :  { %v330_v27 = vpop.f32.mrb[2].mxu0  ;;  %v354_v39 = vadd.f32 %v3391_v37, %v328_v26 }
  0xef   :  { %v2726_v29 = vmul.f32 -1.442695, %v334_v25  ;;  %v331_v30 = vpop.f32.mrb[3].mxu0 }
  0xf1   :  { %2905 = vpow2.f32 %v2726_v29  ;;  %90 = vperm.xlu0 %2845, %v71_v28  }
  0xf5   :  { %95 = vperm.xlu0 %2845, %v72_v31  }
  0xf9   :  { %100 = vperm.xlu0 %2845, %v73_v32  }
  0xfb   :  { %v2906_v34 = vpop.eup %2905 }
  0xfc   :  { %v338_v35 = vadd.f32 1.0, %v2906_v34 }
  0xfd   :  { %105 = vperm.xlu0 %2845, %v74_v33  }
  0xfe   :  { %2907 = vrcp.f32 %v338_v35 }
 0x101   :  { %110 = vperm.xlu0 %2845, %v75_v36  }
 0x108   :  { %v2908_v40 = vpop.eup %2907 }
 0x109   :  { %v355_v41 = vmul.f32 %v2908_v40, %v354_v39 }
 0x10b   :  { %v356_v48 = vadd.f32 %v355_v41, %v353_v46 }
 0x15f   :  { %v344_v43 = vpop.permute.xlu0 %343 }
 0x160   :  { %v346_v44 = vadd.f32 %v344_v43, %v341_v42 }
 0x162   :  { %v2727_v45 = vmul.f32 -1.442695, %v346_v44  ;;  %v86_v44 = vpop.permute.xlu1 %85 }
 0x163   :  { %v164_v46 = vmul.f32 %v3341_v11, %v86_v44 }
 0x164   :  { %2909 = vpow2.f32 %v2727_v45  ;;  %v125_v45 = vmul.f32 %v3336_v10, %v86_v44 }
 0x16e   :  { %v2910_v47 = vpop.eup %2909 }
 0x16f   :  { %v350_v49 = vadd.f32 1.0, %v2910_v47  ;;  %v203_v47 = vmul.f32 %v3346_v12, %v86_v44 }
 0x170   :  { %v91_v50 = vpop.permute.xlu0 %90 }
 0x171   :  { %2911 = vrcp.f32 %v350_v49  ;;  %v126_v51 = vmul.f32 %v3336_v10, %v91_v50  ;;  %v165_v52 = vmul.f32 %v3341_v11, %v91_v50  ;;  %v204_v53 = vmul.f32 %v3346_v12, %v91_v50 }
 0x172   :  { %2913 = vtanh.f32 %v356_v48  ;;  %v140_v48 = vadd.f32 %v3351_v13, %v125_v45  ;;  %v179_v49 = vadd.f32 %v3356_v14, %v164_v46  ;;  %v218_v50 = vadd.f32 %v3361_v15, %v203_v47 }
 0x173   :  { %v141_v54 = vadd.f32 %v3351_v13, %v126_v51  ;;  %v180_v55 = vadd.f32 %v3356_v14, %v165_v52  ;;  %v219_v56 = vadd.f32 %v3361_v15, %v204_v53 }
 0x174   :  { %v96_v57 = vpop.permute.xlu0 %95  ;;  %149 = vst.msk [vmem:[#allocation3 + $0x8] sm:$0xff] %vm147_vm0, %v140_v48  ;;  %188 = vst.msk [vmem:[#allocation3 + $0x48] sm:$0xff] %vm147_vm0, %v179_v49 }
 0x175   :  { %150 = vst.msk [vmem:[#allocation3 + $0x10] sm:$0xff] %vm147_vm0, %v141_v54  ;;  %189 = vst.msk [vmem:[#allocation3 + $0x50] sm:$0xff] %vm147_vm0, %v180_v55  ;;  %v127_v58 = vmul.f32 %v3336_v10, %v96_v57  ;;  %v166_v59 = vmul.f32 %v3341_v11, %v96_v57  ;;  %v205_v60 = vmul.f32 %v3346_v12, %v96_v57 }
 0x176   :  { %228 = vst.msk [vmem:[#allocation3 + $0x90] sm:$0xff] %vm147_vm0, %v219_v56  ;;  %227 = vst.msk [vmem:[#allocation3 + $0x88] sm:$0xff] %vm147_vm0, %v218_v50 }
 0x177   :  { %v142_v61 = vadd.f32 %v3351_v13, %v127_v58  ;;  %v181_v62 = vadd.f32 %v3356_v14, %v166_v59  ;;  %v220_v63 = vadd.f32 %v3361_v15, %v205_v60 }
 0x178   :  { %v101_v6 = vpop.permute.xlu0 %100 }
 0x179   :  { %151 = vst.msk [vmem:[#allocation3 + $0x18] sm:$0xff] %vm147_vm0, %v142_v61  ;;  %190 = vst.msk [vmem:[#allocation3 + $0x58] sm:$0xff] %vm147_vm0, %v181_v62  ;;  %v128_v16 = vmul.f32 %v3336_v10, %v101_v6  ;;  %v167_v17 = vmul.f32 %v3341_v11, %v101_v6  ;;  %v206_v18 = vmul.f32 %v3346_v12, %v101_v6 }
 0x17a   :  { %229 = vst.msk [vmem:[#allocation3 + $0x98] sm:$0xff] %vm147_vm0, %v220_v63 }
 0x17b   :  { %v2912_v19 = vpop.eup %2911  ;;  %v143_v20 = vadd.f32 %v3351_v13, %v128_v16  ;;  %v182_v21 = vadd.f32 %v3356_v14, %v167_v17  ;;  %v221_v22 = vadd.f32 %v3361_v15, %v206_v18  ;;  %v409_v51 = vld [vmem:[#allocation3 + $0x8] sm:$0xff] }
 0x17c   :  { %v358_v23 = vsub.f32 1.0, %v2912_v19  ;;  %v106_v24 = vpop.permute.xlu0 %105  ;;  %v2914_v25 = vpop.eup %2913  ;;  %v360_v30 = vmul.f32 0.0, %v2912_v19  ;;  %v418_v63 = vld [vmem:[#allocation3 + $0x48] sm:$0xff] }
 0x17d   :  { %152 = vst.msk [vmem:[#allocation3 + $0x20] sm:$0xff] %vm147_vm0, %v143_v20  ;;  %191 = vst.msk [vmem:[#allocation3 + $0x60] sm:$0xff] %vm147_vm0, %v182_v21  ;;  %v129_v26 = vmul.f32 %v3336_v10, %v106_v24  ;;  %v168_v27 = vmul.f32 %v3341_v11, %v106_v24  ;;  %v207_v28 = vmul.f32 %v3346_v12, %v106_v24  ;;  %v431_v18 = vld [vmem:[#allocation3 + $0x88] sm:$0xff]  ;;  %v510_v47 = vld [vmem:[#allocation3 + $0x90] sm:$0xff] }
 0x17e   :  { %230 = vst.msk [vmem:[#allocation3 + $0xa0] sm:$0xff] %vm147_vm0, %v221_v22  ;;  %v359_v29 = vmul.f32 %v2914_v25, %v358_v23 }
 0x17f   :  { %v144_v31 = vadd.f32 %v3351_v13, %v129_v26  ;;  %v183_v32 = vadd.f32 %v3356_v14, %v168_v27  ;;  %v222_v33 = vadd.f32 %v3361_v15, %v207_v28 }
 0x180   :  { %v111_v34 = vpop.permute.xlu0 %110  ;;  %v3430_v35 = vadd.f32 %v360_v30, %v359_v29  ;;  %v488_v30 = vld [vmem:[#allocation3 + $0x10] sm:$0xff] }
 0x181   :  { %153 = vst.msk [vmem:[#allocation3 + $0x28] sm:$0xff] %vm147_vm0, %v144_v31  ;;  %192 = vst.msk [vmem:[#allocation3 + $0x68] sm:$0xff] %vm147_vm0, %v183_v32  ;;  %v130_v36 = vmul.f32 %v3336_v10, %v111_v34  ;;  %v169_v38 = vmul.f32 %v3341_v11, %v111_v34  ;;  %v208_v39 = vmul.f32 %v3346_v12, %v111_v34 }
 0x182   :  { %231 = vst.msk [vmem:[#allocation3 + $0xa8] sm:$0xff] %vm147_vm0, %v222_v33  ;;  %362 = vst.msk [vmem:[#allocation2] sm:$0xff] %vm147_vm0, %v3430_v35  ;;  %v363_v40 = vpack.c.bf16 %v3430_v35, %v3430_v35 }
 0x183   :  { %v145_v41 = vadd.f32 %v3351_v13, %v130_v36  ;;  %v184_v42 = vadd.f32 %v3356_v14, %v169_v38  ;;  %v223_v43 = vadd.f32 %v3361_v15, %v208_v39 }
 0x184   :  { %2728 = vmatmul.mubr.msk.bf16.vlgmr.msra.gmra.mrb[0].mxu1 %vm147_vm0, %v363_v40 }
 0x185   :  { %154 = vst.msk [vmem:[#allocation3 + $0x30] sm:$0xff] %vm147_vm0, %v145_v41  ;;  %193 = vst.msk [vmem:[#allocation3 + $0x70] sm:$0xff] %vm147_vm0, %v184_v42  ;;  %526 = vmatpush1.bf16.msra.mxu1 %v3268_v2  ;;  %557 = vmatprep.mubr.bf16.mxu1 %v3146_v1 }
 0x186   :  { %232 = vst.msk [vmem:[#allocation3 + $0xb0] sm:$0xff] %vm147_vm0, %v223_v43  ;;  %527 = vmatprep.subr.bf16.mxu1 %v3276_v3  ;;  %v497_v43 = vld [vmem:[#allocation3 + $0x50] sm:$0xff] }
 0x189   :  { %528 = vmatpush1.bf16.msra.mxu1 %v3283_v4 }
 0x18a   :  { %529 = vmatprep.subr.bf16.mxu1 %v3290_v5 }
 0x18d   :  { %530 = vmatpush1.bf16.msra.mxu1 %v3300_v7 }
 0x18e   :  { %531 = vmatprep.subr.bf16.mxu1 %v3307_v8 }
 0x191   :  { %532 = vmatpush1.bf16.msra.mxu1 %v3314_v9 }
 0x192   :  { %683 = vmatprep.subr.bf16.mxu1 %v3261_v0 }
 0x257   :  { %v401_v52 = vpop.f32.mrb[0].mxu1 }
 0x258   :  { %v410_v53 = vadd.f32 %v409_v51, %v401_v52  ;;  %420 = vrot.lane.b32.xlu1 %v401_v52, %s3147_s5  ;;  %v403_v54 = vpop.f32.mrb[1].mxu1 }
 0x259   :  { %v405_v55 = vpop.f32.mrb[2].mxu1  ;;  %v432_v60 = vadd.f32 %v3391_v37, %v403_v54 }
 0x25a   :  { %v2729_v56 = vmul.f32 -1.442695, %v410_v53  ;;  %v406_v57 = vpop.f32.mrb[3].mxu1 }
 0x25c   :  { %2915 = vpow2.f32 %v2729_v56 }
 0x266   :  { %v2916_v58 = vpop.eup %2915 }
 0x267   :  { %v414_v59 = vadd.f32 1.0, %v2916_v58  ;;  %v567_v58 = vld [vmem:[#allocation3 + $0x18] sm:$0xff] }
 0x269   :  { %2917 = vrcp.f32 %v414_v59 }
 0x273   :  { %v2918_v61 = vpop.eup %2917 }
 0x274   :  { %v433_v62 = vmul.f32 %v2918_v61, %v432_v60 }
 0x276   :  { %v434_v20 = vadd.f32 %v433_v62, %v431_v18 }
 0x2ca   :  { %v421_v6 = vpop.permute.xlu1 %420 }
 0x2cb   :  { %v423_v16 = vadd.f32 %v421_v6, %v418_v63 }
 0x2cd   :  { %v2730_v17 = vmul.f32 -1.442695, %v423_v16 }
 0x2cf   :  { %2919 = vpow2.f32 %v2730_v17 }
 0x2d9   :  { %v2920_v19 = vpop.eup %2919 }
 0x2da   :  { %v427_v21 = vadd.f32 1.0, %v2920_v19 }
 0x2dc   :  { %2921 = vrcp.f32 %v427_v21  ;;  %v576_v21 = vld [vmem:[#allocation3 + $0x58] sm:$0xff] }
 0x2dd   :  { %2923 = vtanh.f32 %v434_v20 }
 0x2e6   :  { %v2922_v22 = vpop.eup %2921 }
 0x2e7   :  { %v436_v23 = vsub.f32 1.0, %v2922_v22  ;;  %v2924_v24 = vpop.eup %2923  ;;  %v438_v26 = vmul.f32 %v2922_v22, %v3430_v35 }
 0x2e9   :  { %v437_v25 = vmul.f32 %v2924_v24, %v436_v23  ;;  %v589_v24 = vld [vmem:[#allocation3 + $0x98] sm:$0xff] }
 0x2eb   :  { %v439_v27 = vadd.f32 %v438_v26, %v437_v25 }
 0x2ed   :  { %441 = vst.msk [vmem:[#allocation2 + $0x8] sm:$0xff] %vm147_vm0, %v439_v27  ;;  %v442_v28 = vpack.c.bf16 %v439_v27, %v439_v27 }
 0x2ef   :  { %2731 = vmatmul.mubr.msk.bf16.vlgmr.msra.gmra.mrb[4].mxu0 %vm147_vm0, %v442_v28 }
 0x2f0   :  { %605 = vmatpush1.bf16.msra.mxu0 %v3268_v2  ;;  %636 = vmatprep.mubr.bf16.mxu0 %v3146_v1 }
 0x2f1   :  { %606 = vmatprep.subr.bf16.mxu0 %v3276_v3 }
 0x2f4   :  { %607 = vmatpush1.bf16.msra.mxu0 %v3283_v4 }
 0x2f5   :  { %608 = vmatprep.subr.bf16.mxu0 %v3290_v5 }
 0x2f8   :  { %609 = vmatpush1.bf16.msra.mxu0 %v3300_v7 }
 0x2f9   :  { %610 = vmatprep.subr.bf16.mxu0 %v3307_v8 }
 0x2fc   :  { %611 = vmatpush1.bf16.msra.mxu0 %v3314_v9 }
 0x2fd   :  { %762 = vmatprep.subr.bf16.mxu0 %v3261_v0 }
 0x3c2   :  { %v480_v29 = vpop.f32.mrb[4].mxu0 }
 0x3c3   :  { %v489_v31 = vadd.f32 %v488_v30, %v480_v29  ;;  %499 = vrot.lane.b32.xlu1 %v480_v29, %s3147_s5  ;;  %v482_v32 = vpop.f32.mrb[5].mxu0 }
 0x3c4   :  { %v484_v33 = vpop.f32.mrb[6].mxu0  ;;  %v511_v39 = vadd.f32 %v3391_v37, %v482_v32 }
 0x3c5   :  { %v2732_v34 = vmul.f32 -1.442695, %v489_v31  ;;  %v485_v35 = vpop.f32.mrb[7].mxu0 }
 0x3c6   :  { %v646_v35 = vld [vmem:[#allocation3 + $0x20] sm:$0xff] }
 0x3c7   :  { %2925 = vpow2.f32 %v2732_v34 }
 0x3d1   :  { %v2926_v36 = vpop.eup %2925 }
 0x3d2   :  { %v493_v38 = vadd.f32 1.0, %v2926_v36 }
 0x3d4   :  { %2927 = vrcp.f32 %v493_v38 }
 0x3de   :  { %v2928_v40 = vpop.eup %2927 }
 0x3df   :  { %v512_v41 = vmul.f32 %v2928_v40, %v511_v39 }
 0x3e1   :  { %v513_v48 = vadd.f32 %v512_v41, %v510_v47 }
 0x435   :  { %v500_v42 = vpop.permute.xlu1 %499 }
 0x436   :  { %v502_v44 = vadd.f32 %v500_v42, %v497_v43 }
 0x438   :  { %v2733_v45 = vmul.f32 -1.442695, %v502_v44 }
 0x43a   :  { %2929 = vpow2.f32 %v2733_v45 }
 0x444   :  { %v2930_v46 = vpop.eup %2929 }
 0x445   :  { %v506_v49 = vadd.f32 1.0, %v2930_v46 }
 0x447   :  { %2931 = vrcp.f32 %v506_v49 }
 0x448   :  { %2933 = vtanh.f32 %v513_v48  ;;  %v655_v48 = vld [vmem:[#allocation3 + $0x60] sm:$0xff] }
 0x451   :  { %v2932_v50 = vpop.eup %2931 }
 0x452   :  { %v515_v51 = vsub.f32 1.0, %v2932_v50  ;;  %v2934_v52 = vpop.eup %2933  ;;  %v517_v54 = vmul.f32 %v2932_v50, %v439_v27 }
 0x454   :  { %v516_v53 = vmul.f32 %v2934_v52, %v515_v51  ;;  %v668_v52 = vld [vmem:[#allocation3 + $0xa0] sm:$0xff] }
 0x456   :  { %v518_v55 = vadd.f32 %v517_v54, %v516_v53 }
 0x458   :  { %520 = vst.msk [vmem:[#allocation2 + $0x10] sm:$0xff] %vm147_vm0, %v518_v55  ;;  %v521_v56 = vpack.c.bf16 %v518_v55, %v518_v55 }
 0x45a   :  { %2734 = vmatmul.mubr.msk.bf16.vlgmr.msra.gmra.mrb[4].mxu1 %vm147_vm0, %v521_v56 }
 0x45b   :  { %684 = vmatpush1.bf16.msra.mxu1 %v3268_v2  ;;  %715 = vmatprep.mubr.bf16.mxu1 %v3146_v1 }
 0x45c   :  { %685 = vmatprep.subr.bf16.mxu1 %v3276_v3 }
 0x45f   :  { %686 = vmatpush1.bf16.msra.mxu1 %v3283_v4 }
 0x460   :  { %687 = vmatprep.subr.bf16.mxu1 %v3290_v5 }
 0x463   :  { %688 = vmatpush1.bf16.msra.mxu1 %v3300_v7 }
 0x464   :  { %689 = vmatprep.subr.bf16.mxu1 %v3307_v8 }
 0x467   :  { %690 = vmatpush1.bf16.msra.mxu1 %v3314_v9 }
 0x468   :  { %841 = vmatprep.subr.bf16.mxu1 %v3261_v0 }
 0x52d   :  { %v559_v57 = vpop.f32.mrb[4].mxu1 }
 0x52e   :  { %v568_v59 = vadd.f32 %v567_v58, %v559_v57  ;;  %578 = vrot.lane.b32.xlu1 %v559_v57, %s3147_s5  ;;  %v561_v60 = vpop.f32.mrb[5].mxu1 }
 0x52f   :  { %v563_v61 = vpop.f32.mrb[6].mxu1  ;;  %v590_v17 = vadd.f32 %v3391_v37, %v561_v60 }
 0x530   :  { %v2735_v62 = vmul.f32 -1.442695, %v568_v59  ;;  %v564_v63 = vpop.f32.mrb[7].mxu1 }
 0x531   :  { %v725_v63 = vld [vmem:[#allocation3 + $0x28] sm:$0xff] }
 0x532   :  { %2935 = vpow2.f32 %v2735_v62 }
 0x53c   :  { %v2936_v6 = vpop.eup %2935 }
 0x53d   :  { %v572_v16 = vadd.f32 1.0, %v2936_v6 }
 0x53f   :  { %2937 = vrcp.f32 %v572_v16 }
 0x549   :  { %v2938_v18 = vpop.eup %2937 }
 0x54a   :  { %v591_v19 = vmul.f32 %v2938_v18, %v590_v17 }
 0x54c   :  { %v592_v25 = vadd.f32 %v591_v19, %v589_v24  ;;  %v2762_v19 = vld [vmem:[%s4100_s12] ss:$0 sm:$0xff]  ;;  %v747_v24 = vld [vmem:[#allocation3 + $0xa8] sm:$0xff] }
 0x54d   :  { %1090 = vrot.lane.b32.xlu0 %v2762_v19, %s3147_s5  ;;  %v3597_v19 = vld [vmem:[%s4103_s10 + $0x4] ss:$8 sps:$4 sm:$0xff]  }
 0x5a0   :  { %v579_v20 = vpop.permute.xlu1 %578 }
 0x5a1   :  { %v581_v0 = vadd.f32 %v579_v20, %v576_v21  ;;  %v734_v21 = vld [vmem:[#allocation3 + $0x68] sm:$0xff] }
 0x5a3   :  { %v2736_v22 = vmul.f32 -1.442695, %v581_v0 }
 0x5a5   :  { %2939 = vpow2.f32 %v2736_v22 }
 0x5af   :  { %v2940_v23 = vpop.eup %2939 }
 0x5b0   :  { %v585_v26 = vadd.f32 1.0, %v2940_v23 }
 0x5b2   :  { %2941 = vrcp.f32 %v585_v26 }
 0x5b3   :  { %2943 = vtanh.f32 %v592_v25 }
 0x5bc   :  { %v2942_v27 = vpop.eup %2941 }
 0x5bd   :  { %v594_v28 = vsub.f32 1.0, %v2942_v27  ;;  %v2944_v29 = vpop.eup %2943  ;;  %v596_v31 = vmul.f32 %v2942_v27, %v518_v55 }
 0x5bf   :  { %v595_v30 = vmul.f32 %v2944_v29, %v594_v28 }
 0x5c1   :  { %v597_v32 = vadd.f32 %v596_v31, %v595_v30 }
 0x5c3   :  { %599 = vst.msk [vmem:[#allocation2 + $0x18] sm:$0xff] %vm147_vm0, %v597_v32  ;;  %v600_v33 = vpack.c.bf16 %v597_v32, %v597_v32 }
 0x5c5   :  { %2737 = vmatmul.mubr.msk.bf16.vlgmr.msra.gmra.mrb[8].mxu0 %vm147_vm0, %v600_v33  ;;  %v2859_v33 = vld [vmem:[%s4099_s9] ss:$8 sps:$4 sm:$0xff]  }
 0x5c6   :  { %763 = vmatpush1.bf16.msra.mxu0 %v3268_v2  ;;  %794 = vmatprep.mubr.bf16.mxu0 %v3146_v1 }
 0x5c7   :  { %764 = vmatprep.subr.bf16.mxu0 %v3276_v3 }
 0x5ca   :  { %765 = vmatpush1.bf16.msra.mxu0 %v3283_v4 }
 0x5cb   :  { %766 = vmatprep.subr.bf16.mxu0 %v3290_v5 }
 0x5ce   :  { %767 = vmatpush1.bf16.msra.mxu0 %v3300_v7 }
 0x5cf   :  { %768 = vmatprep.subr.bf16.mxu0 %v3307_v8 }
 0x5d2   :  { %769 = vmatpush1.bf16.msra.mxu0 %v3314_v9 }
 0x698   :  { %v638_v34 = vpop.f32.mrb[8].mxu0 }
 0x699   :  { %v647_v36 = vadd.f32 %v646_v35, %v638_v34  ;;  %657 = vrot.lane.b32.xlu1 %v638_v34, %s3147_s5  ;;  %v640_v38 = vpop.f32.mrb[9].mxu0  ;;  %v2864_v35 = vld [vmem:[%s4099_s9 + $0x14] ss:$8 sps:$4 sm:$0xff]  }
 0x69a   :  { %v642_v39 = vpop.f32.mrb[10].mxu0  ;;  %v669_v44 = vadd.f32 %v3391_v37, %v640_v38  ;;  %v2867_v38 = vld [vmem:[%s4099_s9 + $0x24] ss:$8 sps:$4 sm:$0xff]  }
 0x69b   :  { %v2738_v40 = vmul.f32 -1.442695, %v647_v36  ;;  %v643_v41 = vpop.f32.mrb[11].mxu0  ;;  %v2862_v36 = vld [vmem:[%s4099_s9 + $0x10] ss:$8 sps:$4 sm:$0xff]  }
 0x69c   :  { %v2865_v39 = vld [vmem:[%s4099_s9 + $0x20] ss:$8 sps:$4 sm:$0xff]   ;;  %v2868_v41 = vld [vmem:[%s4099_s9 + $0x30] ss:$8 sps:$4 sm:$0xff]  }
 0x69d   :  { %2945 = vpow2.f32 %v2738_v40  ;;  %v2870_v40 = vld [vmem:[%s4099_s9 + $0x34] ss:$8 sps:$4 sm:$0xff]  }
 0x6a7   :  { %v2946_v42 = vpop.eup %2945 }
 0x6a8   :  { %v651_v43 = vadd.f32 1.0, %v2946_v42  ;;  %v917_v42 = vld [vmem:[#allocation2 + $0x8] sm:$0xff] }
 0x6aa   :  { %2947 = vrcp.f32 %v651_v43  ;;  %v916_v43 = vld [vmem:[#allocation2] sm:$0xff] }
 0x6b4   :  { %v2948_v45 = vpop.eup %2947 }
 0x6b5   :  { %v670_v46 = vmul.f32 %v2948_v45, %v669_v44  ;;  %v924_v44 = vpack.c.bf16 %v917_v42, %v916_v43  ;;  %v919_v45 = vld [vmem:[#allocation2 + $0x18] sm:$0xff] }
 0x6b7   :  { %v671_v53 = vadd.f32 %v670_v46, %v668_v52  ;;  %v918_v46 = vld [vmem:[#allocation2 + $0x10] sm:$0xff] }
 0x6b8   :  { %v804_v52 = vld [vmem:[#allocation3 + $0x30] sm:$0xff] }
 0x70b   :  { %v658_v47 = vpop.permute.xlu1 %657 }
 0x70c   :  { %v660_v49 = vadd.f32 %v658_v47, %v655_v48  ;;  %v925_v47 = vpack.c.bf16 %v919_v45, %v918_v46 }
 0x70e   :  { %v2739_v50 = vmul.f32 -1.442695, %v660_v49 }
 0x710   :  { %2949 = vpow2.f32 %v2739_v50 }
 0x71a   :  { %v2950_v51 = vpop.eup %2949 }
 0x71b   :  { %v664_v54 = vadd.f32 1.0, %v2950_v51 }
 0x71d   :  { %2951 = vrcp.f32 %v664_v54 }
 0x71e   :  { %2953 = vtanh.f32 %v671_v53 }
 0x727   :  { %v2952_v55 = vpop.eup %2951 }
 0x728   :  { %v673_v56 = vsub.f32 1.0, %v2952_v55  ;;  %v2954_v57 = vpop.eup %2953  ;;  %v675_v59 = vmul.f32 %v2952_v55, %v597_v32 }
 0x72a   :  { %v674_v58 = vmul.f32 %v2954_v57, %v673_v56 }
 0x72c   :  { %v676_v60 = vadd.f32 %v675_v59, %v674_v58  ;;  %v3566_v58 = vld [vmem:[%s4101_s11] ss:$0 sm:$0xff]  ;;  %v3568_v59 = vpop.permute.xlu0 %1090 }
 0x72e   :  { %678 = vst.msk [vmem:[#allocation2 + $0x20] sm:$0xff] %vm147_vm0, %v676_v60  ;;  %v679_v61 = vpack.c.bf16 %v676_v60, %v676_v60 }
 0x730   :  { %2740 = vmatmul.mubr.msk.bf16.vlgmr.msra.gmra.mrb[8].mxu1 %vm147_vm0, %v679_v61  ;;  %v3573_v61 = vld [vmem:[%s4102_s13] ss:$0 sm:$0xff] }
 0x731   :  { %842 = vmatpush1.bf16.msra.mxu1 %v3268_v2  ;;  %873 = vmatprep.mubr.bf16.mxu1 %v3146_v1 }
 0x732   :  { %843 = vmatprep.subr.bf16.mxu1 %v3276_v3 }
 0x735   :  { %844 = vmatpush1.bf16.msra.mxu1 %v3283_v4  ;;  %v920_v49 = vld [vmem:[#allocation2 + $0x20] sm:$0xff] }
 0x736   :  { %845 = vmatprep.subr.bf16.mxu1 %v3290_v5  ;;  %v2861_v5 = vld [vmem:[%s4099_s9 + $0x4] ss:$8 sps:$4 sm:$0xff]  }
 0x737   :  { %988 = vmatprep.subr.bf16.mxu0 %v2861_v5 }
 0x739   :  { %846 = vmatpush1.bf16.msra.mxu1 %v3300_v7 }
 0x73a   :  { %847 = vmatprep.subr.bf16.mxu1 %v3307_v8 }
 0x73d   :  { %848 = vmatpush1.bf16.msra.mxu1 %v3314_v9 }
 0x73e   :  { %1219 = vmatprep.subr.bf16.mxu1 %v3597_v19 }
 0x803   :  { %v717_v62 = vpop.f32.mrb[8].mxu1 }
 0x804   :  { %v726_v6 = vadd.f32 %v725_v63, %v717_v62  ;;  %736 = vrot.lane.b32.xlu1 %v717_v62, %s3147_s5  ;;  %v719_v2 = vpop.f32.mrb[9].mxu1 }
 0x805   :  { %v721_v16 = vpop.f32.mrb[10].mxu1  ;;  %v748_v7 = vadd.f32 %v3391_v37, %v719_v2 }
 0x806   :  { %v2741_v17 = vmul.f32 -1.442695, %v726_v6  ;;  %v722_v18 = vpop.f32.mrb[11].mxu1 }
 0x808   :  { %2955 = vpow2.f32 %v2741_v17 }
 0x812   :  { %v2956_v3 = vpop.eup %2955 }
 0x813   :  { %v730_v4 = vadd.f32 1.0, %v2956_v3 }
 0x815   :  { %2957 = vrcp.f32 %v730_v4 }
 0x81f   :  { %v2958_v8 = vpop.eup %2957 }
 0x820   :  { %v749_v9 = vmul.f32 %v2958_v8, %v748_v7  ;;  %v76_v7 = vld [vmem:[%s4121_s0 + $0x38] sm:$0xff]  ;;  %v1164_v8 = vld [vmem:[%s4103_s10] sm:$0xff] }
 0x822   :  { %v750_v25 = vadd.f32 %v749_v9, %v747_v24  ;;  %v1165_v9 = vld [vmem:[%s4103_s10 + $0x8] sm:$0xff] }
 0x876   :  { %v737_v20 = vpop.permute.xlu1 %736 }
 0x877   :  { %v739_v0 = vadd.f32 %v737_v20, %v734_v21  ;;  %v3599_v20 = vcombine.low %v1164_v8, %v1165_v9 }
 0x879   :  { %v2742_v22 = vmul.f32 -1.442695, %v739_v0 }
 0x87b   :  { %2959 = vpow2.f32 %v2742_v22 }
 0x885   :  { %v2960_v23 = vpop.eup %2959 }
 0x886   :  { %v743_v26 = vadd.f32 1.0, %v2960_v23 }
 0x888   :  { %2961 = vrcp.f32 %v743_v26  ;;  %v3610_v26 = vld [vmem:[%s4103_s10 + $0x14] ss:$8 sps:$4 sm:$0xff]  }
 0x889   :  { %2963 = vtanh.f32 %v750_v25 }
 0x892   :  { %v2962_v27 = vpop.eup %2961 }
 0x893   :  { %v752_v28 = vsub.f32 1.0, %v2962_v27  ;;  %v2964_v29 = vpop.eup %2963  ;;  %v754_v31 = vmul.f32 %v2962_v27, %v676_v60 }
 0x895   :  { %v753_v30 = vmul.f32 %v2964_v29, %v752_v28 }
 0x897   :  { %v3527_v32 = vadd.f32 %v754_v31, %v753_v30  ;;  %v3619_v30 = vld [vmem:[%s4103_s10 + $0x10] ss:$8 sps:$4 sm:$0xff]  }
 0x899   :  { %757 = vst.msk [vmem:[#allocation2 + $0x28] sm:$0xff] %vm147_vm0, %v3527_v32  ;;  %v758_v34 = vpack.c.bf16 %v3527_v32, %v3527_v32 }
 0x89b   :  { %2743 = vmatmul.mubr.msk.bf16.vlgmr.msra.gmra.mrb[12].mxu0 %vm147_vm0, %v758_v34 }
 0x89c   :  { %989 = vmatpush1.bf16.msra.mxu0 %v2859_v33  ;;  %1020 = vmatprep.mubr.bf16.mxu0 %v3146_v1 }
 0x89d   :  { %990 = vmatprep.subr.bf16.mxu0 %v2864_v35  ;;  %v3631_v35 = vld [vmem:[%s4103_s10 + $0x24] ss:$8 sps:$4 sm:$0xff]  }
 0x8a0   :  { %991 = vmatpush1.bf16.msra.mxu0 %v2862_v36  ;;  %v921_v48 = vld [vmem:[#allocation2 + $0x28] sm:$0xff] }
 0x8a1   :  { %992 = vmatprep.subr.bf16.mxu0 %v2867_v38  ;;  %v926_v50 = vpack.c.bf16 %v921_v48, %v920_v49  ;;  %v3637_v36 = vld [vmem:[%s4103_s10 + $0x20] ss:$8 sps:$4 sm:$0xff]  }
 0x8a4   :  { %993 = vmatpush1.bf16.msra.mxu0 %v2865_v39 }
 0x8a5   :  { %994 = vmatprep.subr.bf16.mxu0 %v2870_v40 }
 0x8a8   :  { %995 = vmatpush1.bf16.msra.mxu0 %v2868_v41 }
 0x8a9   :  { %1369 = vmatprep.subr.bf16.mxu0 %v3597_v19 }
 0x8ab   :  { %2757 = vmatmul.mubr.msk.bf16.vlgmr.msra.gmra.mrb[16].mxu0 %vm147_vm0, %v924_v44  ;;  %v3647_v44 = vld [vmem:[%s4103_s10 + $0x34] ss:$8 sps:$4 sm:$0xff]  }
 0x8ac   :  { %1030 = vmatprep.mubr.bf16.mxu0 %v3146_v1  ;;  %1370 = vmatpush1.bf16.msra.mxu0 %v3599_v20 }
 0x8ad   :  { %1371 = vmatprep.subr.bf16.mxu0 %v3610_v26 }
 0x8b0   :  { %1372 = vmatpush1.bf16.msra.mxu0 %v3619_v30 }
 0x8b1   :  { %1373 = vmatprep.subr.bf16.mxu0 %v3631_v35 }
 0x8b3   :  { %2758 = vmatmul.mubr.msk.bf16.gmra.mrb[20].mxu0 %vm147_vm0, %v925_v47  ;;  %v3655_v47 = vld [vmem:[%s4103_s10 + $0x30] ss:$8 sps:$4 sm:$0xff]  }
 0x8b4   :  { %1040 = vmatprep.mubr.bf16.mxu0 %v3146_v1  ;;  %1374 = vmatpush1.bf16.msra.mxu0 %v3637_v36 }
 0x8b5   :  { %1375 = vmatprep.subr.bf16.mxu0 %v3647_v44 }
 0x8b8   :  { %1376 = vmatpush1.bf16.msra.mxu0 %v3655_v47 }
 0x8b9   :  { %1519 = vmatprep.subr.bf16.mxu0 %v3597_v19 }
 0x8bb   :  { %2759 = vmatmul.mubr.msk.bf16.gmra.mrb[24].mxu0 %vm147_vm0, %v926_v50 }
 0x8bc   :  { %1050 = vmatprep.mubr.bf16.mxu0 %v3146_v1 }
 0x96e   :  { %v796_v51 = vpop.f32.mrb[12].mxu0 }
 0x96f   :  { %v805_v53 = vadd.f32 %v804_v52, %v796_v51  ;;  %815 = vrot.lane.b32.xlu1 %v796_v51, %s3147_s5  ;;  %v798_v54 = vpop.f32.mrb[13].mxu0  ;;  %v813_v52 = vld [vmem:[#allocation3 + $0x70] sm:$0xff] }
 0x970   :  { %v800_v55 = vpop.f32.mrb[14].mxu0  ;;  %v827_v27 = vadd.f32 %v3391_v37, %v798_v54 }
 0x971   :  { %v2744_v56 = vmul.f32 -1.442695, %v805_v53  ;;  %v801_v57 = vpop.f32.mrb[15].mxu0 }
 0x973   :  { %2965 = vpow2.f32 %v2744_v56  ;;  %v826_v56 = vld [vmem:[#allocation3 + $0xb0] sm:$0xff] }
 0x97d   :  { %v2966_v60 = vpop.eup %2965 }
 0x97e   :  { %v809_v62 = vadd.f32 1.0, %v2966_v60  ;;  %v1022_v63 = vpop.f32.mrb[16].mxu0 }
 0x97f   :  { %v1068_v6 = vadd.f32 %v3566_v58, %v1022_v63  ;;  %v1024_v2 = vpop.f32.mrb[17].mxu0  ;;  %v1093_v16 = vadd.f32 %v3568_v59, %v1022_v63 }
 0x980   :  { %2967 = vrcp.f32 %v809_v62  ;;  %v1148_v17 = vadd.f32 %v3573_v61, %v1024_v2  ;;  %v1026_v18 = vpop.f32.mrb[18].mxu0 }
 0x981   :  { %1076 = vst.msk [vmem:[#allocation3] sm:$0xff] %vm147_vm0, %v1068_v6  ;;  %v1069_v3 = vadd.f32 %v3566_v58, %v1026_v18  ;;  %v1028_v4 = vpop.f32.mrb[19].mxu0  ;;  %1109 = vrot.lane.b32.xlu1 %v1093_v16, %s3147_s5  ;;  %v1094_v0 = vadd.f32 %v3568_v59, %v1026_v18 }
 0x982   :  { %1156 = vst.msk [vmem:[#allocation3 + $0x80] sm:$0xff] %vm147_vm0, %v1148_v17  ;;  %v1149_v5 = vadd.f32 %v3573_v61, %v1028_v4 }
 0x983   :  { %1077 = vst.msk [vmem:[#allocation3 + $0x8] sm:$0xff] %vm147_vm0, %v1069_v3 }
 0x984   :  { %1157 = vst.msk [vmem:[#allocation3 + $0x88] sm:$0xff] %vm147_vm0, %v1149_v5 }
 0x985   :  { %115 = vperm.xlu1 %2846, %v76_v7  }
 0x986   :  { %v1032_v21 = vpop.f32.mrb[20].mxu0 }
 0x987   :  { %v1070_v22 = vadd.f32 %v3566_v58, %v1032_v21  ;;  %v1034_v23 = vpop.f32.mrb[21].mxu0  ;;  %v1095_v34 = vadd.f32 %v3568_v59, %v1032_v21 }
 0x988   :  { %v1150_v24 = vadd.f32 %v3573_v61, %v1034_v23  ;;  %v1036_v25 = vpop.f32.mrb[22].mxu0 }
 0x989   :  { %1078 = vst.msk [vmem:[#allocation3 + $0x10] sm:$0xff] %vm147_vm0, %v1070_v22  ;;  %v1071_v28 = vadd.f32 %v3566_v58, %v1036_v25  ;;  %v1038_v29 = vpop.f32.mrb[23].mxu0  ;;  %1111 = vrot.lane.b32.xlu1 %v1094_v0, %s3147_s5  ;;  %v1096_v39 = vadd.f32 %v3568_v59, %v1036_v25 }
 0x98a   :  { %v2968_v31 = vpop.eup %2967  ;;  %1158 = vst.msk [vmem:[#allocation3 + $0x90] sm:$0xff] %vm147_vm0, %v1150_v24  ;;  %v1151_v33 = vadd.f32 %v3573_v61, %v1038_v29 }
 0x98b   :  { %v828_v37 = vmul.f32 %v2968_v31, %v827_v27  ;;  %1079 = vst.msk [vmem:[#allocation3 + $0x18] sm:$0xff] %vm147_vm0, %v1071_v28 }
 0x98c   :  { %1159 = vst.msk [vmem:[#allocation3 + $0x98] sm:$0xff] %vm147_vm0, %v1151_v33  ;;  %v1260_v33 = vld [vmem:[#allocation3] sm:$0xff] }
 0x98d   :  { %1113 = vrot.lane.b32.xlu1 %v1095_v34, %s3147_s5  ;;  %v829_v57 = vadd.f32 %v828_v37, %v826_v56 }
 0x98e   :  { %v1042_v38 = vpop.f32.mrb[24].mxu0 }
 0x98f   :  { %v1072_v40 = vadd.f32 %v3566_v58, %v1042_v38  ;;  %v1044_v41 = vpop.f32.mrb[25].mxu0  ;;  %v1097_v49 = vadd.f32 %v3568_v59, %v1042_v38 }
 0x990   :  { %v1152_v42 = vadd.f32 %v3573_v61, %v1044_v41  ;;  %v1046_v43 = vpop.f32.mrb[26].mxu0  ;;  %v3145_v41 = vld [vmem:[%s4098_s8] ss:$0 sm:$0xff] }
 0x991   :  { %1080 = vst.msk [vmem:[#allocation3 + $0x20] sm:$0xff] %vm147_vm0, %v1072_v40  ;;  %v1073_v45 = vadd.f32 %v3566_v58, %v1046_v43  ;;  %v1048_v46 = vpop.f32.mrb[27].mxu0  ;;  %1115 = vrot.lane.b32.xlu1 %v1096_v39, %s3147_s5  ;;  %v1098_v50 = vadd.f32 %v3568_v59, %v1046_v43 }
 0x992   :  { %1160 = vst.msk [vmem:[#allocation3 + $0xa0] sm:$0xff] %vm147_vm0, %v1152_v42  ;;  %v1153_v48 = vadd.f32 %v3573_v61, %v1048_v46 }
 0x993   :  { %1081 = vst.msk [vmem:[#allocation3 + $0x28] sm:$0xff] %vm147_vm0, %v1073_v45 }
 0x994   :  { %1161 = vst.msk [vmem:[#allocation3 + $0xa8] sm:$0xff] %vm147_vm0, %v1153_v48 }
 0x995   :  { %1117 = vrot.lane.b32.xlu1 %v1097_v49, %s3147_s5  ;;  %v3718_v49 = vld [vmem:[%s4104_s14] ss:$0 sm:$0xff] }
 0x999   :  { %1119 = vrot.lane.b32.xlu1 %v1098_v50, %s3147_s5 }
 0x9e1   :  { %v816_v51 = vpop.permute.xlu1 %815 }
 0x9e2   :  { %v818_v53 = vadd.f32 %v816_v51, %v813_v52 }
 0x9e4   :  { %v2745_v54 = vmul.f32 -1.442695, %v818_v53 }
 0x9e6   :  { %2969 = vpow2.f32 %v2745_v54 }
 0x9f0   :  { %v2970_v55 = vpop.eup %2969 }
 0x9f1   :  { %v822_v60 = vadd.f32 1.0, %v2970_v55 }
 0x9f3   :  { %2971 = vrcp.f32 %v822_v60  ;;  %v1110_v62 = vpop.permute.xlu1 %1109 }
 0x9f4   :  { %1133 = vst.msk [vmem:[#allocation3 + $0x40] sm:$0xff] %vm147_vm0, %v1110_v62  ;;  %2973 = vtanh.f32 %v829_v57 }
 0x9fb   :  { %v1268_v53 = vld [vmem:[#allocation3 + $0x40] sm:$0xff] }
 0x9fd   :  { %v2972_v63 = vpop.eup %2971 }
 0x9fe   :  { %v831_v6 = vsub.f32 1.0, %v2972_v63  ;;  %v2974_v2 = vpop.eup %2973  ;;  %v833_v17 = vmul.f32 %v2972_v63, %v3527_v32 }
 0xa00   :  { %v832_v16 = vmul.f32 %v2974_v2, %v831_v6  ;;  %v1280_v2 = vld [vmem:[#allocation3 + $0x80] sm:$0xff] }
 0xa02   :  { %v3670_v18 = vadd.f32 %v833_v17, %v832_v16 }
 0xa04   :  { %v116_v3 = vpop.permute.xlu1 %115  ;;  %836 = vst.msk [vmem:[#allocation2 + $0x30] sm:$0xff] %vm147_vm0, %v3670_v18  ;;  %v837_v4 = vpack.c.bf16 %v3670_v18, %v3670_v18 }
 0xa05   :  { %v131_v5 = vmul.f32 %v3336_v10, %v116_v3  ;;  %v170_v7 = vmul.f32 %v3341_v11, %v116_v3  ;;  %v209_v8 = vmul.f32 %v3346_v12, %v116_v3 }
 0xa06   :  { %2746 = vmatmul.mubr.msk.bf16.vlgmr.msra.gmra.mrb[12].mxu1 %vm147_vm0, %v837_v4 }
 0xa07   :  { %v146_v9 = vadd.f32 %v3351_v13, %v131_v5  ;;  %v185_v32 = vadd.f32 %v3356_v14, %v170_v7  ;;  %v224_v21 = vadd.f32 %v3361_v15, %v209_v8  ;;  %1220 = vmatpush1.bf16.msra.mxu1 %v3599_v20  ;;  %1251 = vmatprep.mubr.bf16.mxu1 %v3146_v1 }
 0xa08   :  { %v1112_v0 = vpop.permute.xlu1 %1111  ;;  %1221 = vmatprep.subr.bf16.mxu1 %v3610_v26 }
 0xa09   :  { %155 = vst.msk [vmem:[#allocation3 + $0x38] sm:$0xff] %vm147_vm0, %v146_v9  ;;  %194 = vst.msk [vmem:[#allocation3 + $0x78] sm:$0xff] %vm147_vm0, %v185_v32 }
 0xa0a   :  { %233 = vst.msk [vmem:[#allocation3 + $0xb8] sm:$0xff] %vm147_vm0, %v224_v21  ;;  %1134 = vst.msk [vmem:[#allocation3 + $0x48] sm:$0xff] %vm147_vm0, %v1112_v0 }
 0xa0b   :  { %1222 = vmatpush1.bf16.msra.mxu1 %v3619_v30 }
 0xa0c   :  { %v1114_v10 = vpop.permute.xlu1 %1113  ;;  %1223 = vmatprep.subr.bf16.mxu1 %v3631_v35 }
 0xa0d   :  { %1135 = vst.msk [vmem:[#allocation3 + $0x50] sm:$0xff] %vm147_vm0, %v1114_v10 }
 0xa0f   :  { %1224 = vmatpush1.bf16.msra.mxu1 %v3637_v36 }
 0xa10   :  { %v1116_v11 = vpop.permute.xlu1 %1115  ;;  %1225 = vmatprep.subr.bf16.mxu1 %v3647_v44  ;;  %v883_v15 = vld [vmem:[#allocation3 + $0x38] sm:$0xff] }
 0xa11   :  { %1136 = vst.msk [vmem:[#allocation3 + $0x58] sm:$0xff] %vm147_vm0, %v1116_v11  ;;  %v892_v57 = vld [vmem:[#allocation3 + $0x78] sm:$0xff] }
 0xa12   :  { %v905_v4 = vld [vmem:[#allocation3 + $0xb8] sm:$0xff] }
 0xa13   :  { %1226 = vmatpush1.bf16.msra.mxu1 %v3655_v47 }
 0xa14   :  { %v1118_v12 = vpop.permute.xlu1 %1117  ;;  %1294 = vmatprep.subr.bf16.mxu1 %v3597_v19 }
 0xa15   :  { %1137 = vst.msk [vmem:[#allocation3 + $0x60] sm:$0xff] %vm147_vm0, %v1118_v12 }
 0xa16   :  { %1252 = vmatmul.mubr.bf16.vlgmr.msra.gmra.mrb[16].mxu1 %v3146_v1 }
 0xa17   :  { %1295 = vmatpush1.bf16.msra.mxu1 %v3599_v20  ;;  %1326 = vmatprep.mubr.bf16.mxu1 %v3146_v1 }
 0xa18   :  { %v1120_v13 = vpop.permute.xlu1 %1119  ;;  %1296 = vmatprep.subr.bf16.mxu1 %v3610_v26 }
 0xa19   :  { %1138 = vst.msk [vmem:[#allocation3 + $0x68] sm:$0xff] %vm147_vm0, %v1120_v13 }
 0xa1b   :  { %1297 = vmatpush1.bf16.msra.mxu1 %v3619_v30 }
 0xa1c   :  { %1298 = vmatprep.subr.bf16.mxu1 %v3631_v35 }
 0xa1f   :  { %1299 = vmatpush1.bf16.msra.mxu1 %v3637_v36 }
 0xa20   :  { %1300 = vmatprep.subr.bf16.mxu1 %v3647_v44 }
 0xa23   :  { %1301 = vmatpush1.bf16.msra.mxu1 %v3655_v47 }
 0xa24   :  { %1444 = vmatprep.subr.bf16.mxu1 %v3597_v19 }
 0xad9   :  { %v875_v14 = vpop.f32.mrb[12].mxu1 }
 0xada   :  { %v884_v22 = vadd.f32 %v883_v15, %v875_v14  ;;  %v877_v23 = vpop.f32.mrb[13].mxu1 }
 0xadb   :  { %v879_v24 = vpop.f32.mrb[14].mxu1  ;;  %v906_v42 = vadd.f32 %v3145_v41, %v877_v23 }
 0xadc   :  { %v2747_v25 = vmul.f32 -1.442695, %v884_v22  ;;  %v880_v27 = vpop.f32.mrb[15].mxu1 }
 0xade   :  { %2975 = vpow2.f32 %v2747_v25 }
 0xae8   :  { %v2976_v28 = vpop.eup %2975 }
 0xae9   :  { %v888_v29 = vadd.f32 1.0, %v2976_v28  ;;  %v1253_v31 = vpop.f32.mrb[16].mxu1  ;;  %v1335_v28 = vld [vmem:[#allocation3 + $0x8] sm:$0xff] }
 0xaea   :  { %v1261_v37 = vadd.f32 %v1260_v33, %v1253_v31  ;;  %1270 = vrot.lane.b32.xlu0 %v1253_v31, %s3147_s5  ;;  %v1255_v34 = vpop.f32.mrb[17].mxu1 }
 0xaeb   :  { %2977 = vrcp.f32 %v888_v29  ;;  %v1257_v38 = vpop.f32.mrb[18].mxu1  ;;  %v1281_v50 = vadd.f32 %v3718_v49, %v1255_v34 }
 0xaec   :  { %v2773_v39 = vmul.f32 -1.442695, %v1261_v37  ;;  %v1258_v40 = vpop.f32.mrb[19].mxu1 }
 0xaee   :  { %2979 = vpow2.f32 %v2773_v39  ;;  %894 = vrot.lane.b32.xlu0 %v875_v14, %s3147_s5 }
 0xaf5   :  { %v2978_v43 = vpop.eup %2977 }
 0xaf6   :  { %v907_v45 = vmul.f32 %v2978_v43, %v906_v42 }
 0xaf8   :  { %v2980_v46 = vpop.eup %2979  ;;  %v908_v5 = vadd.f32 %v907_v45, %v905_v4 }
 0xaf9   :  { %v1265_v48 = vadd.f32 1.0, %v2980_v46 }
 0xafb   :  { %2981 = vrcp.f32 %v1265_v48 }
 0xb05   :  { %v2982_v51 = vpop.eup %2981 }
 0xb06   :  { %v1282_v52 = vmul.f32 %v2982_v51, %v1281_v50 }
 0xb08   :  { %v1283_v16 = vadd.f32 %v1282_v52, %v1280_v2 }
 0xb5c   :  { %v1271_v54 = vpop.permute.xlu0 %1270 }
 0xb5d   :  { %v1273_v55 = vadd.f32 %v1271_v54, %v1268_v53 }
 0xb5f   :  { %v2774_v56 = vmul.f32 -1.442695, %v1273_v55  ;;  %v1343_v55 = vld [vmem:[#allocation3 + $0x48] sm:$0xff] }
 0xb60   :  { %v895_v60 = vpop.permute.xlu0 %894 }
 0xb61   :  { %2983 = vpow2.f32 %v2774_v56  ;;  %v897_v62 = vadd.f32 %v895_v60, %v892_v57 }
 0xb63   :  { %v2748_v63 = vmul.f32 -1.442695, %v897_v62 }
 0xb65   :  { %2985 = vpow2.f32 %v2748_v63  ;;  %v1355_v63 = vld [vmem:[#allocation3 + $0x88] sm:$0xff] }
 0xb6b   :  { %v2984_v6 = vpop.eup %2983 }
 0xb6c   :  { %v1277_v17 = vadd.f32 1.0, %v2984_v6 }
 0xb6e   :  { %2987 = vrcp.f32 %v1277_v17 }
 0xb6f   :  { %v2986_v3 = vpop.eup %2985  ;;  %2989 = vtanh.f32 %v1283_v16 }
 0xb70   :  { %v901_v7 = vadd.f32 1.0, %v2986_v3 }
 0xb72   :  { %2991 = vrcp.f32 %v901_v7 }
 0xb73   :  { %2993 = vtanh.f32 %v908_v5 }
 0xb78   :  { %v2988_v8 = vpop.eup %2987 }
 0xb79   :  { %v1285_v9 = vsub.f32 1.0, %v2988_v8  ;;  %v2990_v32 = vpop.eup %2989  ;;  %v1287_v0 = vmul.f32 0.0, %v2988_v8 }
 0xb7b   :  { %v1286_v21 = vmul.f32 %v2990_v32, %v1285_v9  ;;  %v1410_v9 = vld [vmem:[#allocation3 + $0x10] sm:$0xff] }
 0xb7c   :  { %v2992_v10 = vpop.eup %2991 }
 0xb7d   :  { %v910_v11 = vsub.f32 1.0, %v2992_v10  ;;  %v3721_v12 = vadd.f32 %v1287_v0, %v1286_v21  ;;  %v2994_v13 = vpop.eup %2993  ;;  %v912_v15 = vmul.f32 %v2992_v10, %v3670_v18  ;;  %v922_v18 = vld [vmem:[#allocation2 + $0x30] sm:$0xff] }
 0xb7f   :  { %v911_v14 = vmul.f32 %v2994_v13, %v910_v11  ;;  %1289 = vst.msk [vmem:[#allocation2] sm:$0xff] %vm147_vm0, %v3721_v12  ;;  %v1290_v22 = vpack.c.bf16 %v3721_v12, %v3721_v12 }
 0xb81   :  { %v913_v23 = vadd.f32 %v912_v15, %v911_v14  ;;  %2775 = vmatmul.mubr.msk.bf16.vlgmr.msra.gmra.mrb[20].mxu1 %vm147_vm0, %v1290_v22 }
 0xb82   :  { %1445 = vmatpush1.bf16.msra.mxu1 %v3599_v20  ;;  %1476 = vmatprep.mubr.bf16.mxu1 %v3146_v1 }
 0xb83   :  { %915 = vst.msk [vmem:[#allocation2 + $0x38] sm:$0xff] %vm147_vm0, %v913_v23  ;;  %1446 = vmatprep.subr.bf16.mxu1 %v3610_v26  ;;  %v1418_v23 = vld [vmem:[#allocation3 + $0x50] sm:$0xff] }
 0xb86   :  { %1447 = vmatpush1.bf16.msra.mxu1 %v3619_v30 }
 0xb87   :  { %1448 = vmatprep.subr.bf16.mxu1 %v3631_v35 }
 0xb8a   :  { %v923_v24 = vld [vmem:[#allocation2 + $0x38] sm:$0xff]  ;;  %1449 = vmatpush1.bf16.msra.mxu1 %v3637_v36 }
 0xb8b   :  { %v927_v25 = vpack.c.bf16 %v923_v24, %v922_v18  ;;  %1450 = vmatprep.subr.bf16.mxu1 %v3647_v44 }
 0xb8d   :  { %2760 = vmatmul.mubr.msk.bf16.gmra.mrb[28].mxu0 %vm147_vm0, %v927_v25 }
 0xb8e   :  { %1401 = vmatprep.mubr.bf16.mxu0 %v3146_v1  ;;  %1451 = vmatpush1.bf16.msra.mxu1 %v3655_v47 }
 0xb8f   :  { %1594 = vmatprep.subr.bf16.mxu1 %v3597_v19 }
 0xc54   :  { %v1328_v27 = vpop.f32.mrb[20].mxu1 }
 0xc55   :  { %v1336_v29 = vadd.f32 %v1335_v28, %v1328_v27  ;;  %1345 = vrot.lane.b32.xlu0 %v1328_v27, %s3147_s5  ;;  %v1330_v31 = vpop.f32.mrb[21].mxu1  ;;  %v1430_v28 = vld [vmem:[#allocation3 + $0x90] sm:$0xff] }
 0xc56   :  { %v1332_v33 = vpop.f32.mrb[22].mxu1  ;;  %v1356_v52 = vadd.f32 %v3718_v49, %v1330_v31 }
 0xc57   :  { %v2776_v37 = vmul.f32 -1.442695, %v1336_v29  ;;  %v1333_v34 = vpop.f32.mrb[23].mxu1 }
 0xc59   :  { %2995 = vpow2.f32 %v2776_v37 }
 0xc60   :  { %v1052_v38 = vpop.f32.mrb[28].mxu0 }
 0xc61   :  { %v1074_v39 = vadd.f32 %v3566_v58, %v1052_v38  ;;  %v1099_v40 = vadd.f32 %v3568_v59, %v1052_v38  ;;  %v1054_v41 = vpop.f32.mrb[29].mxu0 }
 0xc62   :  { %v1154_v42 = vadd.f32 %v3573_v61, %v1054_v41  ;;  %v3745_v43 = vpop.f32.mrb[30].mxu0 }
 0xc63   :  { %v2996_v45 = vpop.eup %2995  ;;  %1082 = vst.msk [vmem:[#allocation3 + $0x30] sm:$0xff] %vm147_vm0, %v1074_v39  ;;  %v1075_v46 = vadd.f32 %v3566_v58, %v3745_v43  ;;  %1121 = vrot.lane.b32.xlu1 %v1099_v40, %s3147_s5  ;;  %v1058_v48 = vpop.f32.mrb[31].mxu0 }
 0xc64   :  { %v1340_v50 = vadd.f32 1.0, %v2996_v45  ;;  %1162 = vst.msk [vmem:[#allocation3 + $0xb0] sm:$0xff] %vm147_vm0, %v1154_v42  ;;  %v1155_v51 = vadd.f32 %v3573_v61, %v1058_v48  ;;  %v1485_v45 = vld [vmem:[#allocation3 + $0x18] sm:$0xff] }
 0xc65   :  { %1083 = vst.msk [vmem:[#allocation3 + $0x38] sm:$0xff] %vm147_vm0, %v1075_v46 }
 0xc66   :  { %2997 = vrcp.f32 %v1340_v50  ;;  %1163 = vst.msk [vmem:[#allocation3 + $0xb8] sm:$0xff] %vm147_vm0, %v1155_v51 }
 0xc70   :  { %v2998_v53 = vpop.eup %2997 }
 0xc71   :  { %v1357_v54 = vmul.f32 %v2998_v53, %v1356_v52 }
 0xc73   :  { %v1358_v61 = vadd.f32 %v1357_v54, %v1355_v63 }
 0xcc7   :  { %v1346_v56 = vpop.permute.xlu0 %1345 }
 0xcc8   :  { %v1348_v58 = vadd.f32 %v1346_v56, %v1343_v55 }
 0xcca   :  { %v2777_v57 = vmul.f32 -1.442695, %v1348_v58 }
 0xccc   :  { %2999 = vpow2.f32 %v2777_v57  ;;  %v1493_v57 = vld [vmem:[#allocation3 + $0x58] sm:$0xff] }
 0xcd5   :  { %v1122_v60 = vpop.permute.xlu1 %1121 }
 0xcd6   :  { %v3000_v62 = vpop.eup %2999  ;;  %1139 = vst.msk [vmem:[#allocation3 + $0x70] sm:$0xff] %vm147_vm0, %v1122_v60 }
 0xcd7   :  { %v1352_v6 = vadd.f32 1.0, %v3000_v62 }
 0xcd9   :  { %3001 = vrcp.f32 %v1352_v6 }
 0xcda   :  { %3003 = vtanh.f32 %v1358_v61  ;;  %v1505_v61 = vld [vmem:[#allocation3 + $0x98] sm:$0xff] }
 0xce3   :  { %v3002_v2 = vpop.eup %3001 }
 0xce4   :  { %v1360_v16 = vsub.f32 1.0, %v3002_v2  ;;  %v3004_v17 = vpop.eup %3003  ;;  %v1362_v4 = vmul.f32 %v3002_v2, %v3721_v12 }
 0xce6   :  { %v1361_v3 = vmul.f32 %v3004_v17, %v1360_v16 }
 0xce8   :  { %v1363_v5 = vadd.f32 %v1362_v4, %v1361_v3 }
 0xcea   :  { %1364 = vst.msk [vmem:[#allocation2 + $0x8] sm:$0xff] %vm147_vm0, %v1363_v5  ;;  %v1365_v7 = vpack.c.bf16 %v1363_v5, %v1363_v5 }
 0xcec   :  { %2778 = vmatmul.mubr.msk.bf16.vlgmr.msra.gmra.mrb[32].mxu0 %vm147_vm0, %v1365_v7 }
 0xced   :  { %1520 = vmatpush1.bf16.msra.mxu0 %v3599_v20  ;;  %1551 = vmatprep.mubr.bf16.mxu0 %v3146_v1 }
 0xcee   :  { %1521 = vmatprep.subr.bf16.mxu0 %v3610_v26 }
 0xcf1   :  { %1522 = vmatpush1.bf16.msra.mxu0 %v3619_v30 }
 0xcf2   :  { %1523 = vmatprep.subr.bf16.mxu0 %v3631_v35 }
 0xcf5   :  { %1524 = vmatpush1.bf16.msra.mxu0 %v3637_v36 }
 0xcf6   :  { %1525 = vmatprep.subr.bf16.mxu0 %v3647_v44 }
 0xcf9   :  { %1526 = vmatpush1.bf16.msra.mxu0 %v3655_v47 }
 0xcfa   :  { %1669 = vmatprep.subr.bf16.mxu0 %v3597_v19 }
 0xdbf   :  { %v1403_v8 = vpop.f32.mrb[32].mxu0 }
 0xdc0   :  { %v1411_v32 = vadd.f32 %v1410_v9, %v1403_v8  ;;  %1420 = vrot.lane.b32.xlu0 %v1403_v8, %s3147_s5  ;;  %v1405_v21 = vpop.f32.mrb[33].mxu0 }
 0xdc1   :  { %v1407_v0 = vpop.f32.mrb[34].mxu0  ;;  %v1431_v14 = vadd.f32 %v3718_v49, %v1405_v21 }
 0xdc2   :  { %v2779_v10 = vmul.f32 -1.442695, %v1411_v32  ;;  %v1408_v11 = vpop.f32.mrb[35].mxu0  ;;  %v1560_v32 = vld [vmem:[#allocation3 + $0x20] sm:$0xff] }
 0xdc4   :  { %3005 = vpow2.f32 %v2779_v10 }
 0xdce   :  { %v3006_v12 = vpop.eup %3005 }
 0xdcf   :  { %v1415_v13 = vadd.f32 1.0, %v3006_v12 }
 0xdd1   :  { %3007 = vrcp.f32 %v1415_v13 }
 0xddb   :  { %v3008_v15 = vpop.eup %3007 }
 0xddc   :  { %v1432_v22 = vmul.f32 %v3008_v15, %v1431_v14 }
 0xdde   :  { %v1433_v29 = vadd.f32 %v1432_v22, %v1430_v28 }
 0xe32   :  { %v1421_v18 = vpop.permute.xlu0 %1420 }
 0xe33   :  { %v1423_v24 = vadd.f32 %v1421_v18, %v1418_v23  ;;  %v1568_v18 = vld [vmem:[#allocation3 + $0x60] sm:$0xff] }
 0xe35   :  { %v2780_v25 = vmul.f32 -1.442695, %v1423_v24 }
 0xe37   :  { %3009 = vpow2.f32 %v2780_v25 }
 0xe41   :  { %v3010_v27 = vpop.eup %3009 }
 0xe42   :  { %v1427_v31 = vadd.f32 1.0, %v3010_v27 }
 0xe44   :  { %3011 = vrcp.f32 %v1427_v31 }
 0xe45   :  { %3013 = vtanh.f32 %v1433_v29  ;;  %v1580_v29 = vld [vmem:[#allocation3 + $0xa0] sm:$0xff] }
 0xe4e   :  { %v3012_v33 = vpop.eup %3011 }
 0xe4f   :  { %v1435_v37 = vsub.f32 1.0, %v3012_v33  ;;  %v3014_v34 = vpop.eup %3013  ;;  %v1437_v39 = vmul.f32 %v3012_v33, %v1363_v5 }
 0xe51   :  { %v1436_v38 = vmul.f32 %v3014_v34, %v1435_v37 }
 0xe53   :  { %v1438_v40 = vadd.f32 %v1437_v39, %v1436_v38 }
 0xe55   :  { %1439 = vst.msk [vmem:[#allocation2 + $0x10] sm:$0xff] %vm147_vm0, %v1438_v40  ;;  %v1440_v41 = vpack.c.bf16 %v1438_v40, %v1438_v40 }
 0xe57   :  { %2781 = vmatmul.mubr.msk.bf16.vlgmr.msra.gmra.mrb[24].mxu1 %vm147_vm0, %v1440_v41 }
 0xe58   :  { %1595 = vmatpush1.bf16.msra.mxu1 %v3599_v20  ;;  %1626 = vmatprep.mubr.bf16.mxu1 %v3146_v1 }
 0xe59   :  { %1596 = vmatprep.subr.bf16.mxu1 %v3610_v26 }
 0xe5c   :  { %1597 = vmatpush1.bf16.msra.mxu1 %v3619_v30 }
 0xe5d   :  { %1598 = vmatprep.subr.bf16.mxu1 %v3631_v35 }
 0xe60   :  { %1599 = vmatpush1.bf16.msra.mxu1 %v3637_v36 }
 0xe61   :  { %1600 = vmatprep.subr.bf16.mxu1 %v3647_v44 }
 0xe64   :  { %1601 = vmatpush1.bf16.msra.mxu1 %v3655_v47 }
 0xe65   :  { %1744 = vmatprep.subr.bf16.mxu1 %v3597_v19 }
 0xf2a   :  { %v1478_v42 = vpop.f32.mrb[24].mxu1 }
 0xf2b   :  { %v1486_v46 = vadd.f32 %v1485_v45, %v1478_v42  ;;  %1495 = vrot.lane.b32.xlu0 %v1478_v42, %s3147_s5  ;;  %v1480_v48 = vpop.f32.mrb[25].mxu1 }
 0xf2c   :  { %v1482_v50 = vpop.f32.mrb[26].mxu1  ;;  %v1506_v55 = vadd.f32 %v3718_v49, %v1480_v48 }
 0xf2d   :  { %v2782_v51 = vmul.f32 -1.442695, %v1486_v46  ;;  %v1483_v52 = vpop.f32.mrb[27].mxu1  ;;  %v1635_v46 = vld [vmem:[#allocation3 + $0x28] sm:$0xff] }
 0xf2f   :  { %3015 = vpow2.f32 %v2782_v51 }
 0xf39   :  { %v3016_v53 = vpop.eup %3015 }
 0xf3a   :  { %v1490_v54 = vadd.f32 1.0, %v3016_v53  ;;  %v2809_v53 = vld [vmem:[%s4106_s18] ss:$0 sm:$0xff] }
 0xf3b   :  { %1989 = vrot.lane.b32.xlu1 %v2809_v53, %s3147_s5 }
 0xf3c   :  { %3017 = vrcp.f32 %v1490_v54  ;;  %v1643_v54 = vld [vmem:[#allocation3 + $0x68] sm:$0xff] }
 0xf46   :  { %v3018_v56 = vpop.eup %3017 }
 0xf47   :  { %v1507_v58 = vmul.f32 %v3018_v56, %v1506_v55 }
 0xf49   :  { %v1508_v6 = vadd.f32 %v1507_v58, %v1505_v61 }
 0xf9d   :  { %v1496_v60 = vpop.permute.xlu0 %1495 }
 0xf9e   :  { %v1498_v19 = vadd.f32 %v1496_v60, %v1493_v57  ;;  %v1655_v60 = vld [vmem:[#allocation3 + $0xa8] sm:$0xff] }
 0xfa0   :  { %v2783_v62 = vmul.f32 -1.442695, %v1498_v19 }
 0xfa2   :  { %3019 = vpow2.f32 %v2783_v62 }
 0xfac   :  { %v3020_v63 = vpop.eup %3019 }
 0xfad   :  { %v1502_v2 = vadd.f32 1.0, %v3020_v63 }
 0xfaf   :  { %3021 = vrcp.f32 %v1502_v2 }
 0xfb0   :  { %3023 = vtanh.f32 %v1508_v6 }
 0xfb9   :  { %v3022_v16 = vpop.eup %3021 }
 0xfba   :  { %v1510_v17 = vsub.f32 1.0, %v3022_v16  ;;  %v3024_v3 = vpop.eup %3023  ;;  %v1512_v5 = vmul.f32 %v3022_v16, %v1438_v40 }
 0xfbc   :  { %v1511_v4 = vmul.f32 %v3024_v3, %v1510_v17  ;;  %v2882_v3 = vld [vmem:[%s4105_s15] ss:$8 sps:$4 sm:$0xff]  }
 0xfbe   :  { %v1513_v7 = vadd.f32 %v1512_v5, %v1511_v4  ;;  %v2887_v5 = vld [vmem:[%s4105_s15 + $0x14] ss:$8 sps:$4 sm:$0xff]  }
 0xfc0   :  { %1514 = vst.msk [vmem:[#allocation2 + $0x18] sm:$0xff] %vm147_vm0, %v1513_v7  ;;  %v1515_v8 = vpack.c.bf16 %v1513_v7, %v1513_v7 }
 0xfc2   :  { %2784 = vmatmul.mubr.msk.bf16.vlgmr.msra.gmra.mrb[36].mxu0 %vm147_vm0, %v1515_v8  ;;  %v2890_v8 = vld [vmem:[%s4105_s15 + $0x24] ss:$8 sps:$4 sm:$0xff]  }
 0xfc3   :  { %1670 = vmatpush1.bf16.msra.mxu0 %v3599_v20  ;;  %1701 = vmatprep.mubr.bf16.mxu0 %v3146_v1 }
 0xfc4   :  { %1671 = vmatprep.subr.bf16.mxu0 %v3610_v26 }
 0xfc7   :  { %1672 = vmatpush1.bf16.msra.mxu0 %v3619_v30 }
 0xfc8   :  { %1673 = vmatprep.subr.bf16.mxu0 %v3631_v35 }
 0xfcb   :  { %1674 = vmatpush1.bf16.msra.mxu0 %v3637_v36 }
 0xfcc   :  { %1675 = vmatprep.subr.bf16.mxu0 %v3647_v44 }
 0xfcf   :  { %1676 = vmatpush1.bf16.msra.mxu0 %v3655_v47 }
0x1095   :  { %v1553_v9 = vpop.f32.mrb[36].mxu0 }
0x1096   :  { %v1561_v21 = vadd.f32 %v1560_v32, %v1553_v9  ;;  %1570 = vrot.lane.b32.xlu0 %v1553_v9, %s3147_s5  ;;  %v1555_v0 = vpop.f32.mrb[37].mxu0  ;;  %v2888_v9 = vld [vmem:[%s4105_s15 + $0x20] ss:$8 sps:$4 sm:$0xff]   ;;  %v2893_v32 = vld [vmem:[%s4105_s15 + $0x34] ss:$8 sps:$4 sm:$0xff]  }
0x1097   :  { %v1557_v10 = vpop.f32.mrb[38].mxu0  ;;  %v1581_v15 = vadd.f32 %v3718_v49, %v1555_v0  ;;  %v1816_v0 = vld [vmem:[#allocation2 + $0x8] sm:$0xff] }
0x1098   :  { %v2785_v11 = vmul.f32 -1.442695, %v1561_v21  ;;  %v1558_v12 = vpop.f32.mrb[39].mxu0  ;;  %v2891_v21 = vld [vmem:[%s4105_s15 + $0x30] ss:$8 sps:$4 sm:$0xff]   ;;  %v1815_v10 = vld [vmem:[#allocation2] sm:$0xff] }
0x1099   :  { %v1818_v12 = vld [vmem:[#allocation2 + $0x18] sm:$0xff] }
0x109a   :  { %3025 = vpow2.f32 %v2785_v11  ;;  %v1823_v11 = vpack.c.bf16 %v1816_v0, %v1815_v10  ;;  %v3943_v0 = vld [vmem:[%s4109_s16 + $0x30] ss:$8 sps:$4 sm:$0xff]  }
0x10a4   :  { %v3026_v13 = vpop.eup %3025 }
0x10a5   :  { %v1565_v14 = vadd.f32 1.0, %v3026_v13  ;;  %v1817_v13 = vld [vmem:[#allocation2 + $0x10] sm:$0xff] }
0x10a7   :  { %3027 = vrcp.f32 %v1565_v14  ;;  %v1824_v14 = vpack.c.bf16 %v1818_v12, %v1817_v13  ;;  %v1718_v13 = vld [vmem:[#allocation3 + $0x70] sm:$0xff] }
0x10b1   :  { %v3028_v22 = vpop.eup %3027 }
0x10b2   :  { %v1582_v23 = vmul.f32 %v3028_v22, %v1581_v15 }
0x10b4   :  { %v1583_v31 = vadd.f32 %v1582_v23, %v1580_v29 }
0x1108   :  { %v1571_v24 = vpop.permute.xlu0 %1570 }
0x1109   :  { %v1573_v25 = vadd.f32 %v1571_v24, %v1568_v18  ;;  %v1710_v24 = vld [vmem:[#allocation3 + $0x30] sm:$0xff] }
0x110b   :  { %v2786_v27 = vmul.f32 -1.442695, %v1573_v25 }
0x110d   :  { %3029 = vpow2.f32 %v2786_v27 }
0x1117   :  { %v3030_v28 = vpop.eup %3029 }
0x1118   :  { %v1577_v33 = vadd.f32 1.0, %v3030_v28 }
0x111a   :  { %3031 = vrcp.f32 %v1577_v33  ;;  %v3851_v33 = vpop.permute.xlu1 %1989 }
0x111b   :  { %3033 = vtanh.f32 %v1583_v31 }
0x1124   :  { %v3032_v37 = vpop.eup %3031 }
0x1125   :  { %v1585_v34 = vsub.f32 1.0, %v3032_v37  ;;  %v3034_v38 = vpop.eup %3033  ;;  %v1587_v40 = vmul.f32 %v3032_v37, %v1513_v7  ;;  %v2885_v7 = vld [vmem:[%s4105_s15 + $0x10] ss:$8 sps:$4 sm:$0xff]   ;;  %v3856_v37 = vld [vmem:[%s4107_s17] ss:$0 sm:$0xff] }
0x1127   :  { %v1586_v39 = vmul.f32 %v3034_v38, %v1585_v34  ;;  %v3861_v38 = vld [vmem:[%s4108_s19] ss:$0 sm:$0xff] }
0x1129   :  { %v1588_v41 = vadd.f32 %v1587_v40, %v1586_v39 }
0x112b   :  { %1589 = vst.msk [vmem:[#allocation2 + $0x20] sm:$0xff] %vm147_vm0, %v1588_v41  ;;  %v1590_v42 = vpack.c.bf16 %v1588_v41, %v1588_v41 }
0x112d   :  { %2787 = vmatmul.mubr.msk.bf16.vlgmr.msra.gmra.mrb[28].mxu1 %vm147_vm0, %v1590_v42 }
0x112e   :  { %1745 = vmatpush1.bf16.msra.mxu1 %v3599_v20  ;;  %1776 = vmatprep.mubr.bf16.mxu1 %v3146_v1 }
0x112f   :  { %1746 = vmatprep.subr.bf16.mxu1 %v3610_v26 }
0x1132   :  { %1747 = vmatpush1.bf16.msra.mxu1 %v3619_v30  ;;  %v1819_v22 = vld [vmem:[#allocation2 + $0x20] sm:$0xff] }
0x1133   :  { %1748 = vmatprep.subr.bf16.mxu1 %v3631_v35  ;;  %v2884_v35 = vld [vmem:[%s4105_s15 + $0x4] ss:$8 sps:$4 sm:$0xff]  }
0x1134   :  { %1887 = vmatprep.subr.bf16.mxu0 %v2884_v35  ;;  %v3884_v35 = vld [vmem:[%s4109_s16 + $0x4] ss:$8 sps:$4 sm:$0xff]  }
0x1136   :  { %1749 = vmatpush1.bf16.msra.mxu1 %v3637_v36 }
0x1137   :  { %1750 = vmatprep.subr.bf16.mxu1 %v3647_v44 }
0x113a   :  { %1751 = vmatpush1.bf16.msra.mxu1 %v3655_v47 }
0x113b   :  { %2118 = vmatprep.subr.bf16.mxu1 %v3884_v35 }
0x1200   :  { %v1628_v45 = vpop.f32.mrb[28].mxu1 }
0x1201   :  { %v1636_v48 = vadd.f32 %v1635_v46, %v1628_v45  ;;  %1645 = vrot.lane.b32.xlu0 %v1628_v45, %s3147_s5  ;;  %v1630_v20 = vpop.f32.mrb[29].mxu1 }
0x1202   :  { %v1632_v50 = vpop.f32.mrb[30].mxu1  ;;  %v1656_v36 = vadd.f32 %v3718_v49, %v1630_v20 }
0x1203   :  { %v2788_v51 = vmul.f32 -1.442695, %v1636_v48  ;;  %v1633_v52 = vpop.f32.mrb[31].mxu1 }
0x1204   :  { %v1100_v52 = vadd.f32 %v3568_v59, %v3745_v43 }
0x1205   :  { %3035 = vpow2.f32 %v2788_v51 }
0x120f   :  { %v3036_v26 = vpop.eup %3035 }
0x1210   :  { %v1640_v30 = vadd.f32 1.0, %v3036_v26  ;;  %v2063_v26 = vld [vmem:[%s4109_s16] sm:$0xff] }
0x1212   :  { %3037 = vrcp.f32 %v1640_v30  ;;  %v2064_v30 = vld [vmem:[%s4109_s16 + $0x8] sm:$0xff] }
0x1213   :  { %v3887_v59 = vcombine.low %v2063_v26, %v2064_v30 }
0x121c   :  { %v3038_v44 = vpop.eup %3037 }
0x121d   :  { %v1657_v47 = vmul.f32 %v3038_v44, %v1656_v36 }
0x121f   :  { %v1658_v19 = vadd.f32 %v1657_v47, %v1655_v60  ;;  %v3907_v60 = vld [vmem:[%s4109_s16 + $0x10] ss:$8 sps:$4 sm:$0xff]  }
0x1273   :  { %v1646_v55 = vpop.permute.xlu0 %1645 }
0x1274   :  { %v1648_v56 = vadd.f32 %v1646_v55, %v1643_v54  ;;  %v3898_v55 = vld [vmem:[%s4109_s16 + $0x14] ss:$8 sps:$4 sm:$0xff]  }
0x1276   :  { %v2789_v58 = vmul.f32 -1.442695, %v1648_v56 }
0x1278   :  { %3039 = vpow2.f32 %v2789_v58 }
0x1282   :  { %v3040_v57 = vpop.eup %3039 }
0x1283   :  { %v1652_v62 = vadd.f32 1.0, %v3040_v57 }
0x1285   :  { %3041 = vrcp.f32 %v1652_v62 }
0x1286   :  { %3043 = vtanh.f32 %v1658_v19 }
0x128f   :  { %v3042_v63 = vpop.eup %3041 }
0x1290   :  { %v1660_v61 = vsub.f32 1.0, %v3042_v63  ;;  %v3044_v6 = vpop.eup %3043  ;;  %v1662_v16 = vmul.f32 %v3042_v63, %v1588_v41 }
0x1292   :  { %v1661_v2 = vmul.f32 %v3044_v6, %v1660_v61  ;;  %v3919_v6 = vld [vmem:[%s4109_s16 + $0x24] ss:$8 sps:$4 sm:$0xff]  }
0x1294   :  { %v3815_v17 = vadd.f32 %v1662_v16, %v1661_v2  ;;  %v3925_v2 = vld [vmem:[%s4109_s16 + $0x20] ss:$8 sps:$4 sm:$0xff]  }
0x1296   :  { %1664 = vst.msk [vmem:[#allocation2 + $0x28] sm:$0xff] %vm147_vm0, %v3815_v17  ;;  %v1665_v4 = vpack.c.bf16 %v3815_v17, %v3815_v17 }
0x1298   :  { %2790 = vmatmul.mubr.msk.bf16.vlgmr.msra.gmra.mrb[40].mxu0 %vm147_vm0, %v1665_v4 }
0x1299   :  { %1888 = vmatpush1.bf16.msra.mxu0 %v2882_v3  ;;  %1919 = vmatprep.mubr.bf16.mxu0 %v3146_v1 }
0x129a   :  { %1889 = vmatprep.subr.bf16.mxu0 %v2887_v5 }
0x129d   :  { %1890 = vmatpush1.bf16.msra.mxu0 %v2885_v7  ;;  %v1820_v15 = vld [vmem:[#allocation2 + $0x28] sm:$0xff]  ;;  %v3933_v7 = vld [vmem:[%s4109_s16 + $0x34] ss:$8 sps:$4 sm:$0xff]  }
0x129e   :  { %1891 = vmatprep.subr.bf16.mxu0 %v2890_v8  ;;  %v1825_v23 = vpack.c.bf16 %v1820_v15, %v1819_v22 }
0x12a1   :  { %1892 = vmatpush1.bf16.msra.mxu0 %v2888_v9 }
0x12a2   :  { %1893 = vmatprep.subr.bf16.mxu0 %v2893_v32 }
0x12a5   :  { %1894 = vmatpush1.bf16.msra.mxu0 %v2891_v21 }
0x12a6   :  { %2266 = vmatprep.subr.bf16.mxu0 %v3884_v35 }
0x12a8   :  { %2804 = vmatmul.mubr.msk.bf16.vlgmr.msra.gmra.mrb[44].mxu0 %vm147_vm0, %v1823_v11 }
0x12a9   :  { %1929 = vmatprep.mubr.bf16.mxu0 %v3146_v1  ;;  %2267 = vmatpush1.bf16.msra.mxu0 %v3887_v59 }
0x12aa   :  { %2268 = vmatprep.subr.bf16.mxu0 %v3898_v55 }
0x12ad   :  { %2269 = vmatpush1.bf16.msra.mxu0 %v3907_v60 }
0x12ae   :  { %2270 = vmatprep.subr.bf16.mxu0 %v3919_v6 }
0x12b0   :  { %2805 = vmatmul.mubr.msk.bf16.gmra.mrb[48].mxu0 %vm147_vm0, %v1824_v14 }
0x12b1   :  { %1939 = vmatprep.mubr.bf16.mxu0 %v3146_v1  ;;  %2271 = vmatpush1.bf16.msra.mxu0 %v3925_v2 }
0x12b2   :  { %2272 = vmatprep.subr.bf16.mxu0 %v3933_v7 }
0x12b5   :  { %2273 = vmatpush1.bf16.msra.mxu0 %v3943_v0 }
0x12b6   :  { %2414 = vmatprep.subr.bf16.mxu0 %v3884_v35 }
0x12b8   :  { %2806 = vmatmul.mubr.msk.bf16.gmra.mrb[52].mxu0 %vm147_vm0, %v1825_v23 }
0x12b9   :  { %1949 = vmatprep.mubr.bf16.mxu0 %v3146_v1 }
0x136b   :  { %v1703_v18 = vpop.f32.mrb[40].mxu0 }
0x136c   :  { %v1711_v25 = vadd.f32 %v1710_v24, %v1703_v18  ;;  %1720 = vrot.lane.b32.xlu0 %v1703_v18, %s3147_s5  ;;  %v1705_v27 = vpop.f32.mrb[41].mxu0  ;;  %v1730_v18 = vld [vmem:[#allocation3 + $0xb0] sm:$0xff] }
0x136d   :  { %v1707_v28 = vpop.f32.mrb[42].mxu0  ;;  %v1731_v56 = vadd.f32 %v3718_v49, %v1705_v27 }
0x136e   :  { %v2791_v29 = vmul.f32 -1.442695, %v1711_v25  ;;  %v1708_v31 = vpop.f32.mrb[43].mxu0 }
0x1370   :  { %3045 = vpow2.f32 %v2791_v29 }
0x137a   :  { %v3046_v34 = vpop.eup %3045 }
0x137b   :  { %v1715_v39 = vadd.f32 1.0, %v3046_v34  ;;  %v1921_v40 = vpop.f32.mrb[44].mxu0 }
0x137c   :  { %v1967_v41 = vadd.f32 %v3856_v37, %v1921_v40  ;;  %v1992_v42 = vadd.f32 %v3851_v33, %v1921_v40  ;;  %v1923_v45 = vpop.f32.mrb[45].mxu0 }
0x137d   :  { %3047 = vrcp.f32 %v1715_v39  ;;  %v2047_v46 = vadd.f32 %v3861_v38, %v1923_v45  ;;  %v1925_v48 = vpop.f32.mrb[46].mxu0 }
0x137e   :  { %1975 = vst.msk [vmem:[#allocation3] sm:$0xff] %vm147_vm0, %v1967_v41  ;;  %v1968_v20 = vadd.f32 %v3856_v37, %v1925_v48  ;;  %2008 = vrot.lane.b32.xlu0 %v1992_v42, %s3147_s5  ;;  %v1927_v50 = vpop.f32.mrb[47].mxu0  ;;  %v1993_v36 = vadd.f32 %v3851_v33, %v1925_v48 }
0x137f   :  { %2055 = vst.msk [vmem:[#allocation3 + $0x80] sm:$0xff] %vm147_vm0, %v2047_v46  ;;  %v2048_v51 = vadd.f32 %v3861_v38, %v1927_v50 }
0x1380   :  { %1976 = vst.msk [vmem:[#allocation3 + $0x8] sm:$0xff] %vm147_vm0, %v1968_v20 }
0x1381   :  { %2056 = vst.msk [vmem:[#allocation3 + $0x88] sm:$0xff] %vm147_vm0, %v2048_v51  ;;  %v1785_v51 = vld [vmem:[#allocation3 + $0x38] sm:$0xff] }
0x1382   :  { %1123 = vrot.lane.b32.xlu0 %v1100_v52, %s3147_s5 }
0x1383   :  { %v1931_v43 = vpop.f32.mrb[48].mxu0 }
0x1384   :  { %v1969_v44 = vadd.f32 %v3856_v37, %v1931_v43  ;;  %v1933_v47 = vpop.f32.mrb[49].mxu0  ;;  %v1994_v61 = vadd.f32 %v3851_v33, %v1931_v43 }
0x1385   :  { %v2049_v53 = vadd.f32 %v3861_v38, %v1933_v47  ;;  %v1935_v54 = vpop.f32.mrb[50].mxu0 }
0x1386   :  { %1977 = vst.msk [vmem:[#allocation3 + $0x10] sm:$0xff] %vm147_vm0, %v1969_v44  ;;  %v1970_v58 = vadd.f32 %v3856_v37, %v1935_v54  ;;  %2010 = vrot.lane.b32.xlu0 %v1993_v36, %s3147_s5  ;;  %v1937_v57 = vpop.f32.mrb[51].mxu0  ;;  %v1995_v3 = vadd.f32 %v3851_v33, %v1935_v54  ;;  %v2159_v54 = vld [vmem:[#allocation3] sm:$0xff] }
0x1387   :  { %v3048_v19 = vpop.eup %3047  ;;  %2057 = vst.msk [vmem:[#allocation3 + $0x90] sm:$0xff] %vm147_vm0, %v2049_v53  ;;  %v2050_v62 = vadd.f32 %v3861_v38, %v1937_v57 }
0x1388   :  { %v1732_v63 = vmul.f32 %v3048_v19, %v1731_v56  ;;  %1978 = vst.msk [vmem:[#allocation3 + $0x18] sm:$0xff] %vm147_vm0, %v1970_v58 }
0x1389   :  { %2058 = vst.msk [vmem:[#allocation3 + $0x98] sm:$0xff] %vm147_vm0, %v2050_v62 }
0x138a   :  { %2012 = vrot.lane.b32.xlu0 %v1994_v61, %s3147_s5  ;;  %v1733_v24 = vadd.f32 %v1732_v63, %v1730_v18 }
0x138b   :  { %v1941_v16 = vpop.f32.mrb[52].mxu0 }
0x138c   :  { %v1971_v4 = vadd.f32 %v3856_v37, %v1941_v16  ;;  %v1943_v5 = vpop.f32.mrb[53].mxu0  ;;  %v1996_v11 = vadd.f32 %v3851_v33, %v1941_v16 }
0x138d   :  { %v2051_v8 = vadd.f32 %v3861_v38, %v1943_v5  ;;  %v1945_v9 = vpop.f32.mrb[54].mxu0  ;;  %v3996_v5 = vld [vmem:[%s4110_s20] ss:$0 sm:$0xff] }
0x138e   :  { %1979 = vst.msk [vmem:[#allocation3 + $0x20] sm:$0xff] %vm147_vm0, %v1971_v4  ;;  %v1972_v32 = vadd.f32 %v3856_v37, %v1945_v9  ;;  %2014 = vrot.lane.b32.xlu0 %v1995_v3, %s3147_s5  ;;  %v1947_v21 = vpop.f32.mrb[55].mxu0  ;;  %v1997_v12 = vadd.f32 %v3851_v33, %v1945_v9 }
0x138f   :  { %2059 = vst.msk [vmem:[#allocation3 + $0xa0] sm:$0xff] %vm147_vm0, %v2051_v8  ;;  %v2052_v10 = vadd.f32 %v3861_v38, %v1947_v21 }
0x1390   :  { %1980 = vst.msk [vmem:[#allocation3 + $0x28] sm:$0xff] %vm147_vm0, %v1972_v32 }
0x1391   :  { %2060 = vst.msk [vmem:[#allocation3 + $0xa8] sm:$0xff] %vm147_vm0, %v2052_v10 }
0x1392   :  { %2016 = vrot.lane.b32.xlu0 %v1996_v11, %s3147_s5 }
0x1396   :  { %2018 = vrot.lane.b32.xlu0 %v1997_v12, %s3147_s5 }
0x13de   :  { %v1721_v14 = vpop.permute.xlu0 %1720 }
0x13df   :  { %v1723_v15 = vadd.f32 %v1721_v14, %v1718_v13 }
0x13e1   :  { %v2792_v22 = vmul.f32 -1.442695, %v1723_v15 }
0x13e3   :  { %3049 = vpow2.f32 %v2792_v22 }
0x13ed   :  { %v3050_v23 = vpop.eup %3049 }
0x13ee   :  { %v1727_v25 = vadd.f32 1.0, %v3050_v23  ;;  %v2179_v23 = vld [vmem:[#allocation3 + $0x80] sm:$0xff] }
0x13f0   :  { %3051 = vrcp.f32 %v1727_v25  ;;  %v2009_v27 = vpop.permute.xlu0 %2008 }
0x13f1   :  { %2032 = vst.msk [vmem:[#allocation3 + $0x40] sm:$0xff] %vm147_vm0, %v2009_v27  ;;  %3053 = vtanh.f32 %v1733_v24  ;;  %v1805_v27 = vld [vmem:[#allocation3 + $0xb8] sm:$0xff] }
0x13f4   :  { %v1124_v28 = vpop.permute.xlu0 %1123 }
0x13f5   :  { %1140 = vst.msk [vmem:[#allocation3 + $0x78] sm:$0xff] %vm147_vm0, %v1124_v28 }
0x13f8   :  { %v2011_v29 = vpop.permute.xlu0 %2010  ;;  %v2167_v10 = vld [vmem:[#allocation3 + $0x40] sm:$0xff] }
0x13f9   :  { %2033 = vst.msk [vmem:[#allocation3 + $0x48] sm:$0xff] %vm147_vm0, %v2011_v29 }
0x13fa   :  { %v3052_v31 = vpop.eup %3051 }
0x13fb   :  { %v1735_v34 = vsub.f32 1.0, %v3052_v31  ;;  %v3054_v39 = vpop.eup %3053  ;;  %v1737_v42 = vmul.f32 %v3052_v31, %v3815_v17 }
0x13fc   :  { %v2013_v40 = vpop.permute.xlu0 %2012 }
0x13fd   :  { %v1736_v41 = vmul.f32 %v3054_v39, %v1735_v34  ;;  %2034 = vst.msk [vmem:[#allocation3 + $0x50] sm:$0xff] %vm147_vm0, %v2013_v40 }
0x13ff   :  { %v3961_v45 = vadd.f32 %v1737_v42, %v1736_v41 }
0x1400   :  { %v2015_v46 = vpop.permute.xlu0 %2014 }
0x1401   :  { %2035 = vst.msk [vmem:[#allocation3 + $0x58] sm:$0xff] %vm147_vm0, %v2015_v46  ;;  %1739 = vst.msk [vmem:[#allocation2 + $0x30] sm:$0xff] %vm147_vm0, %v3961_v45  ;;  %v1740_v48 = vpack.c.bf16 %v3961_v45, %v3961_v45 }
0x1403   :  { %2793 = vmatmul.mubr.msk.bf16.vlgmr.msra.gmra.mrb[32].mxu1 %vm147_vm0, %v1740_v48 }
0x1404   :  { %2119 = vmatpush1.bf16.msra.mxu1 %v3887_v59  ;;  %v2017_v20 = vpop.permute.xlu0 %2016  ;;  %2150 = vmatprep.mubr.bf16.mxu1 %v3146_v1 }
0x1405   :  { %2036 = vst.msk [vmem:[#allocation3 + $0x60] sm:$0xff] %vm147_vm0, %v2017_v20  ;;  %2120 = vmatprep.subr.bf16.mxu1 %v3898_v55 }
0x1408   :  { %2121 = vmatpush1.bf16.msra.mxu1 %v3907_v60  ;;  %v2019_v17 = vpop.permute.xlu0 %2018 }
0x1409   :  { %2037 = vst.msk [vmem:[#allocation3 + $0x68] sm:$0xff] %vm147_vm0, %v2019_v17  ;;  %2122 = vmatprep.subr.bf16.mxu1 %v3919_v6 }
0x140c   :  { %2123 = vmatpush1.bf16.msra.mxu1 %v3925_v2 }
0x140d   :  { %2124 = vmatprep.subr.bf16.mxu1 %v3933_v7 }
0x1410   :  { %2125 = vmatpush1.bf16.msra.mxu1 %v3943_v0 }
0x1411   :  { %2192 = vmatprep.subr.bf16.mxu1 %v3884_v35 }
0x1413   :  { %2151 = vmatmul.mubr.bf16.vlgmr.msra.gmra.mrb[36].mxu1 %v3146_v1 }
0x1414   :  { %2193 = vmatpush1.bf16.msra.mxu1 %v3887_v59  ;;  %2224 = vmatprep.mubr.bf16.mxu1 %v3146_v1 }
0x1415   :  { %2194 = vmatprep.subr.bf16.mxu1 %v3898_v55 }
0x1418   :  { %2195 = vmatpush1.bf16.msra.mxu1 %v3907_v60 }
0x1419   :  { %2196 = vmatprep.subr.bf16.mxu1 %v3919_v6 }
0x141c   :  { %2197 = vmatpush1.bf16.msra.mxu1 %v3925_v2 }
0x141d   :  { %2198 = vmatprep.subr.bf16.mxu1 %v3933_v7 }
0x1420   :  { %2199 = vmatpush1.bf16.msra.mxu1 %v3943_v0 }
0x1421   :  { %2340 = vmatprep.subr.bf16.mxu1 %v3884_v35 }
0x14d6   :  { %v1778_v50 = vpop.f32.mrb[32].mxu1 }
0x14d7   :  { %v1786_v52 = vadd.f32 %v1785_v51, %v1778_v50  ;;  %v1780_v26 = vpop.f32.mrb[33].mxu1 }
0x14d8   :  { %v1782_v30 = vpop.f32.mrb[34].mxu1  ;;  %v1806_v63 = vadd.f32 %v3718_v49, %v1780_v26  ;;  %v1793_v49 = vld [vmem:[#allocation3 + $0x78] sm:$0xff]  ;;  %v1821_v26 = vld [vmem:[#allocation2 + $0x30] sm:$0xff] }
0x14d9   :  { %v2794_v43 = vmul.f32 -1.442695, %v1786_v52  ;;  %v1783_v36 = vpop.f32.mrb[35].mxu1 }
0x14da   :  { %v2233_v36 = vld [vmem:[#allocation3 + $0x8] sm:$0xff] }
0x14db   :  { %3055 = vpow2.f32 %v2794_v43 }
0x14e5   :  { %v3056_v44 = vpop.eup %3055 }
0x14e6   :  { %v1790_v47 = vadd.f32 1.0, %v3056_v44  ;;  %v2152_v53 = vpop.f32.mrb[36].mxu1 }
0x14e7   :  { %v2160_v56 = vadd.f32 %v2159_v54, %v2152_v53  ;;  %2169 = vrot.lane.b32.xlu1 %v2152_v53, %s3147_s5  ;;  %v2154_v58 = vpop.f32.mrb[37].mxu1 }
0x14e8   :  { %3057 = vrcp.f32 %v1790_v47  ;;  %v2156_v57 = vpop.f32.mrb[38].mxu1  ;;  %v2180_v8 = vadd.f32 %v3996_v5, %v2154_v58 }
0x14e9   :  { %v2820_v19 = vmul.f32 -1.442695, %v2160_v56  ;;  %v2157_v62 = vpop.f32.mrb[39].mxu1 }
0x14eb   :  { %3059 = vpow2.f32 %v2820_v19  ;;  %1795 = vrot.lane.b32.xlu1 %v1778_v50, %s3147_s5 }
0x14f2   :  { %v3058_v61 = vpop.eup %3057 }
0x14f3   :  { %v1807_v16 = vmul.f32 %v3058_v61, %v1806_v63 }
0x14f5   :  { %v3060_v3 = vpop.eup %3059  ;;  %v1808_v28 = vadd.f32 %v1807_v16, %v1805_v27 }
0x14f6   :  { %v2164_v4 = vadd.f32 1.0, %v3060_v3 }
0x14f8   :  { %3061 = vrcp.f32 %v2164_v4 }
0x1502   :  { %v3062_v9 = vpop.eup %3061 }
0x1503   :  { %v2181_v32 = vmul.f32 %v3062_v9, %v2180_v8 }
0x1505   :  { %v2182_v18 = vadd.f32 %v2181_v32, %v2179_v23 }
0x1559   :  { %v2170_v21 = vpop.permute.xlu1 %2169 }
0x155a   :  { %v2172_v11 = vadd.f32 %v2170_v21, %v2167_v10 }
0x155c   :  { %v2821_v12 = vmul.f32 -1.442695, %v2172_v11 }
0x155d   :  { %v1796_v13 = vpop.permute.xlu1 %1795 }
0x155e   :  { %3063 = vpow2.f32 %v2821_v12  ;;  %v1798_v14 = vadd.f32 %v1796_v13, %v1793_v49  ;;  %v2241_v12 = vld [vmem:[#allocation3 + $0x48] sm:$0xff] }
0x1560   :  { %v2795_v15 = vmul.f32 -1.442695, %v1798_v14 }
0x1562   :  { %3065 = vpow2.f32 %v2795_v15  ;;  %v2253_v15 = vld [vmem:[#allocation3 + $0x88] sm:$0xff] }
0x1568   :  { %v3064_v22 = vpop.eup %3063 }
0x1569   :  { %v2176_v24 = vadd.f32 1.0, %v3064_v22 }
0x156b   :  { %3067 = vrcp.f32 %v2176_v24 }
0x156c   :  { %v3066_v25 = vpop.eup %3065  ;;  %3069 = vtanh.f32 %v2182_v18 }
0x156d   :  { %v1802_v29 = vadd.f32 1.0, %v3066_v25 }
0x156f   :  { %3071 = vrcp.f32 %v1802_v29 }
0x1570   :  { %3073 = vtanh.f32 %v1808_v28 }
0x1575   :  { %v3068_v31 = vpop.eup %3067 }
0x1576   :  { %v2184_v34 = vsub.f32 1.0, %v3068_v31  ;;  %v3070_v39 = vpop.eup %3069  ;;  %v2186_v40 = vmul.f32 0.0, %v3068_v31 }
0x1578   :  { %v2185_v41 = vmul.f32 %v3070_v39, %v2184_v34  ;;  %v2307_v39 = vld [vmem:[#allocation3 + $0x10] sm:$0xff] }
0x1579   :  { %v3072_v42 = vpop.eup %3071 }
0x157a   :  { %v1810_v46 = vsub.f32 1.0, %v3072_v42  ;;  %v3999_v48 = vadd.f32 %v2186_v40, %v2185_v41  ;;  %v3074_v20 = vpop.eup %3073  ;;  %v1812_v50 = vmul.f32 %v3072_v42, %v3961_v45 }
0x157c   :  { %v1811_v17 = vmul.f32 %v3074_v20, %v1810_v46  ;;  %v2188_v51 = vpack.c.bf16 %v3999_v48, %v3999_v48 }
0x157e   :  { %v1813_v52 = vadd.f32 %v1812_v50, %v1811_v17  ;;  %2822 = vmatmul.mubr.msk.bf16.vlgmr.msra.gmra.mrb[40].mxu1 %vm147_vm0, %v2188_v51 }
0x157f   :  { %2341 = vmatpush1.bf16.msra.mxu1 %v3887_v59  ;;  %2372 = vmatprep.mubr.bf16.mxu1 %v3146_v1 }
0x1580   :  { %1814 = vst.msk [vmem:[#allocation2 + $0x38] sm:$0xff] %vm147_vm0, %v1813_v52  ;;  %2342 = vmatprep.subr.bf16.mxu1 %v3898_v55 }
0x1583   :  { %2343 = vmatpush1.bf16.msra.mxu1 %v3907_v60 }
0x1584   :  { %2344 = vmatprep.subr.bf16.mxu1 %v3919_v6 }
0x1587   :  { %v1822_v45 = vld [vmem:[#allocation2 + $0x38] sm:$0xff]  ;;  %2345 = vmatpush1.bf16.msra.mxu1 %v3925_v2 }
0x1588   :  { %v1826_v30 = vpack.c.bf16 %v1822_v45, %v1821_v26  ;;  %2346 = vmatprep.subr.bf16.mxu1 %v3933_v7  ;;  %v2315_v26 = vld [vmem:[#allocation3 + $0x50] sm:$0xff] }
0x158a   :  { %2807 = vmatmul.mubr.msk.bf16.gmra.mrb[56].mxu0 %vm147_vm0, %v1826_v30 }
0x158b   :  { %2298 = vmatprep.mubr.bf16.mxu0 %v3146_v1  ;;  %2347 = vmatpush1.bf16.msra.mxu1 %v3943_v0 }
0x158c   :  { %2488 = vmatprep.subr.bf16.mxu1 %v3884_v35 }
0x1651   :  { %v2226_v43 = vpop.f32.mrb[40].mxu1 }
0x1652   :  { %v2234_v44 = vadd.f32 %v2233_v36, %v2226_v43  ;;  %2243 = vrot.lane.b32.xlu1 %v2226_v43, %s3147_s5  ;;  %v2228_v47 = vpop.f32.mrb[41].mxu1 }
0x1653   :  { %v2230_v53 = vpop.f32.mrb[42].mxu1  ;;  %v2254_v21 = vadd.f32 %v3996_v5, %v2228_v47 }
0x1654   :  { %v2823_v54 = vmul.f32 -1.442695, %v2234_v44  ;;  %v2231_v56 = vpop.f32.mrb[43].mxu1  ;;  %v2327_v44 = vld [vmem:[#allocation3 + $0x90] sm:$0xff] }
0x1656   :  { %3075 = vpow2.f32 %v2823_v54 }
0x165d   :  { %v1951_v58 = vpop.f32.mrb[56].mxu0 }
0x165e   :  { %v1973_v57 = vadd.f32 %v3856_v37, %v1951_v58  ;;  %v1998_v19 = vadd.f32 %v3851_v33, %v1951_v58  ;;  %v1953_v62 = vpop.f32.mrb[57].mxu0 }
0x165f   :  { %v2053_v63 = vadd.f32 %v3861_v38, %v1953_v62  ;;  %v1955_v61 = vpop.f32.mrb[58].mxu0 }
0x1660   :  { %v3076_v16 = vpop.eup %3075  ;;  %1981 = vst.msk [vmem:[#allocation3 + $0x30] sm:$0xff] %vm147_vm0, %v1973_v57  ;;  %v1974_v3 = vadd.f32 %v3856_v37, %v1955_v61  ;;  %2020 = vrot.lane.b32.xlu0 %v1998_v19, %s3147_s5  ;;  %v1957_v4 = vpop.f32.mrb[59].mxu0  ;;  %v1999_v32 = vadd.f32 %v3851_v33, %v1955_v61 }
0x1661   :  { %v2238_v8 = vadd.f32 1.0, %v3076_v16  ;;  %2061 = vst.msk [vmem:[#allocation3 + $0xb0] sm:$0xff] %vm147_vm0, %v2053_v63  ;;  %v2054_v9 = vadd.f32 %v3861_v38, %v1957_v4  ;;  %v2381_v16 = vld [vmem:[#allocation3 + $0x18] sm:$0xff] }
0x1662   :  { %1982 = vst.msk [vmem:[#allocation3 + $0x38] sm:$0xff] %vm147_vm0, %v1974_v3 }
0x1663   :  { %3077 = vrcp.f32 %v2238_v8  ;;  %2062 = vst.msk [vmem:[#allocation3 + $0xb8] sm:$0xff] %vm147_vm0, %v2054_v9 }
0x1664   :  { %2022 = vrot.lane.b32.xlu0 %v1999_v32, %s3147_s5 }
0x166d   :  { %v3078_v37 = vpop.eup %3077 }
0x166e   :  { %v2255_v10 = vmul.f32 %v3078_v37, %v2254_v21 }
0x1670   :  { %v2256_v33 = vadd.f32 %v2255_v10, %v2253_v15  ;;  %v2401_v15 = vld [vmem:[#allocation3 + $0x98] sm:$0xff] }
0x16c4   :  { %v2244_v11 = vpop.permute.xlu1 %2243 }
0x16c5   :  { %v2246_v13 = vadd.f32 %v2244_v11, %v2241_v12 }
0x16c7   :  { %v2824_v49 = vmul.f32 -1.442695, %v2246_v13  ;;  %v2389_v13 = vld [vmem:[#allocation3 + $0x58] sm:$0xff] }
0x16c9   :  { %3079 = vpow2.f32 %v2824_v49 }
0x16d2   :  { %v2021_v14 = vpop.permute.xlu0 %2020 }
0x16d3   :  { %v3080_v38 = vpop.eup %3079  ;;  %2038 = vst.msk [vmem:[#allocation3 + $0x70] sm:$0xff] %vm147_vm0, %v2021_v14 }
0x16d4   :  { %v2250_v22 = vadd.f32 1.0, %v3080_v38 }
0x16d6   :  { %3081 = vrcp.f32 %v2250_v22  ;;  %v2023_v23 = vpop.permute.xlu0 %2022 }
0x16d7   :  { %2039 = vst.msk [vmem:[#allocation3 + $0x78] sm:$0xff] %vm147_vm0, %v2023_v23  ;;  %3083 = vtanh.f32 %v2256_v33 }
0x16e0   :  { %v3082_v18 = vpop.eup %3081 }
0x16e1   :  { %v2258_v24 = vsub.f32 1.0, %v3082_v18  ;;  %v3084_v25 = vpop.eup %3083  ;;  %v2260_v28 = vmul.f32 %v3082_v18, %v3999_v48 }
0x16e3   :  { %v2259_v27 = vmul.f32 %v3084_v25, %v2258_v24 }
0x16e5   :  { %v2261_v29 = vadd.f32 %v2260_v28, %v2259_v27 }
0x16e7   :  { %v2262_v31 = vpack.c.bf16 %v2261_v29, %v2261_v29 }
0x16e9   :  { %2825 = vmatmul.mubr.msk.bf16.vlgmr.msra.gmra.mrb[60].mxu0 %vm147_vm0, %v2262_v31 }
0x16ea   :  { %2415 = vmatpush1.bf16.msra.mxu0 %v3887_v59  ;;  %2446 = vmatprep.mubr.bf16.mxu0 %v3146_v1 }
0x16eb   :  { %2416 = vmatprep.subr.bf16.mxu0 %v3898_v55 }
0x16ee   :  { %2417 = vmatpush1.bf16.msra.mxu0 %v3907_v60 }
0x16ef   :  { %2418 = vmatprep.subr.bf16.mxu0 %v3919_v6 }
0x16f2   :  { %2419 = vmatpush1.bf16.msra.mxu0 %v3925_v2 }
0x16f3   :  { %2420 = vmatprep.subr.bf16.mxu0 %v3933_v7 }
0x16f6   :  { %2421 = vmatpush1.bf16.msra.mxu0 %v3943_v0 }
0x16f7   :  { %2562 = vmatprep.subr.bf16.mxu0 %v3884_v35 }
0x17bc   :  { %v2300_v34 = vpop.f32.mrb[60].mxu0 }
0x17bd   :  { %v2308_v40 = vadd.f32 %v2307_v39, %v2300_v34  ;;  %2317 = vrot.lane.b32.xlu1 %v2300_v34, %s3147_s5  ;;  %v2302_v41 = vpop.f32.mrb[61].mxu0  ;;  %v2455_v34 = vld [vmem:[#allocation3 + $0x20] sm:$0xff] }
0x17be   :  { %v2304_v42 = vpop.f32.mrb[62].mxu0  ;;  %v2328_v50 = vadd.f32 %v3996_v5, %v2302_v41 }
0x17bf   :  { %v2826_v46 = vmul.f32 -1.442695, %v2308_v40  ;;  %v2305_v48 = vpop.f32.mrb[63].mxu0 }
0x17c1   :  { %3085 = vpow2.f32 %v2826_v46 }
0x17cb   :  { %v3086_v20 = vpop.eup %3085 }
0x17cc   :  { %v2312_v17 = vadd.f32 1.0, %v3086_v20 }
0x17ce   :  { %3087 = vrcp.f32 %v2312_v17 }
0x17d8   :  { %v3088_v51 = vpop.eup %3087 }
0x17d9   :  { %v2329_v52 = vmul.f32 %v3088_v51, %v2328_v50 }
0x17db   :  { %v2330_v47 = vadd.f32 %v2329_v52, %v2327_v44  ;;  %v2463_v52 = vld [vmem:[#allocation3 + $0x60] sm:$0xff] }
0x182f   :  { %v2318_v45 = vpop.permute.xlu1 %2317 }
0x1830   :  { %v2320_v30 = vadd.f32 %v2318_v45, %v2315_v26 }
0x1832   :  { %v2827_v43 = vmul.f32 -1.442695, %v2320_v30 }
0x1834   :  { %3089 = vpow2.f32 %v2827_v43 }
0x183e   :  { %v3090_v36 = vpop.eup %3089 }
0x183f   :  { %v2324_v53 = vadd.f32 1.0, %v3090_v36  ;;  %v2475_v36 = vld [vmem:[#allocation3 + $0xa0] sm:$0xff] }
0x1841   :  { %3091 = vrcp.f32 %v2324_v53 }
0x1842   :  { %3093 = vtanh.f32 %v2330_v47 }
0x184b   :  { %v3092_v54 = vpop.eup %3091 }
0x184c   :  { %v2332_v56 = vsub.f32 1.0, %v3092_v54  ;;  %v3094_v58 = vpop.eup %3093  ;;  %v2334_v57 = vmul.f32 %v3092_v54, %v2261_v29 }
0x184e   :  { %v2333_v19 = vmul.f32 %v3094_v58, %v2332_v56 }
0x1850   :  { %v2335_v62 = vadd.f32 %v2334_v57, %v2333_v19 }
0x1852   :  { %v2336_v63 = vpack.c.bf16 %v2335_v62, %v2335_v62 }
0x1854   :  { %2828 = vmatmul.mubr.msk.bf16.vlgmr.msra.gmra.mrb[44].mxu1 %vm147_vm0, %v2336_v63 }
0x1855   :  { %2489 = vmatpush1.bf16.msra.mxu1 %v3887_v59  ;;  %2520 = vmatprep.mubr.bf16.mxu1 %v3146_v1 }
0x1856   :  { %2490 = vmatprep.subr.bf16.mxu1 %v3898_v55 }
0x1859   :  { %2491 = vmatpush1.bf16.msra.mxu1 %v3907_v60 }
0x185a   :  { %2492 = vmatprep.subr.bf16.mxu1 %v3919_v6 }
0x185d   :  { %2493 = vmatpush1.bf16.msra.mxu1 %v3925_v2 }
0x185e   :  { %2494 = vmatprep.subr.bf16.mxu1 %v3933_v7 }
0x1861   :  { %2495 = vmatpush1.bf16.msra.mxu1 %v3943_v0 }
0x1862   :  { %2636 = vmatprep.subr.bf16.mxu1 %v3884_v35 }
0x1927   :  { %v2374_v61 = vpop.f32.mrb[44].mxu1 }
0x1928   :  { %v2382_v3 = vadd.f32 %v2381_v16, %v2374_v61  ;;  %2391 = vrot.lane.b32.xlu1 %v2374_v61, %s3147_s5  ;;  %v2376_v4 = vpop.f32.mrb[45].mxu1  ;;  %v2529_v61 = vld [vmem:[#allocation3 + $0x28] sm:$0xff] }
0x1929   :  { %v2378_v8 = vpop.f32.mrb[46].mxu1  ;;  %v2402_v10 = vadd.f32 %v3996_v5, %v2376_v4 }
0x192a   :  { %v2829_v9 = vmul.f32 -1.442695, %v2382_v3  ;;  %v2379_v32 = vpop.f32.mrb[47].mxu1 }
0x192c   :  { %3095 = vpow2.f32 %v2829_v9 }
0x1936   :  { %v3096_v21 = vpop.eup %3095 }
0x1937   :  { %v2386_v37 = vadd.f32 1.0, %v3096_v21 }
0x1939   :  { %3097 = vrcp.f32 %v2386_v37  ;;  %v2549_v37 = vld [vmem:[#allocation3 + $0xa8] sm:$0xff] }
0x1943   :  { %v3098_v11 = vpop.eup %3097 }
0x1944   :  { %v2403_v12 = vmul.f32 %v3098_v11, %v2402_v10 }
0x1946   :  { %v2404_v33 = vadd.f32 %v2403_v12, %v2401_v15 }
0x199a   :  { %v2392_v49 = vpop.permute.xlu1 %2391 }
0x199b   :  { %v2394_v35 = vadd.f32 %v2392_v49, %v2389_v13 }
0x199d   :  { %v2830_v14 = vmul.f32 -1.442695, %v2394_v35 }
0x199f   :  { %3099 = vpow2.f32 %v2830_v14 }
0x19a9   :  { %v3100_v38 = vpop.eup %3099 }
0x19aa   :  { %v2398_v22 = vadd.f32 1.0, %v3100_v38 }
0x19ac   :  { %3101 = vrcp.f32 %v2398_v22  ;;  %v2603_v22 = vld [vmem:[#allocation3 + $0x30] sm:$0xff] }
0x19ad   :  { %3103 = vtanh.f32 %v2404_v33 }
0x19b6   :  { %v3102_v23 = vpop.eup %3101 }
0x19b7   :  { %v2406_v18 = vsub.f32 1.0, %v3102_v23  ;;  %v3104_v24 = vpop.eup %3103  ;;  %v2408_v25 = vmul.f32 %v3102_v23, %v2335_v62 }
0x19b9   :  { %v2407_v27 = vmul.f32 %v3104_v24, %v2406_v18 }
0x19bb   :  { %v2409_v28 = vadd.f32 %v2408_v25, %v2407_v27 }
0x19bd   :  { %v2410_v29 = vpack.c.bf16 %v2409_v28, %v2409_v28 }
0x19bf   :  { %2831 = vmatmul.mubr.msk.bf16.vlgmr.msra.gmra.mrb[64].mxu0 %vm147_vm0, %v2410_v29 }
0x19c0   :  { %2563 = vmatpush1.bf16.msra.mxu0 %v3887_v59  ;;  %2594 = vmatprep.mubr.bf16.mxu0 %v3146_v1 }
0x19c1   :  { %2564 = vmatprep.subr.bf16.mxu0 %v3898_v55 }
0x19c4   :  { %2565 = vmatpush1.bf16.msra.mxu0 %v3907_v60 }
0x19c5   :  { %2566 = vmatprep.subr.bf16.mxu0 %v3919_v6 }
0x19c8   :  { %2567 = vmatpush1.bf16.msra.mxu0 %v3925_v2 }
0x19c9   :  { %2568 = vmatprep.subr.bf16.mxu0 %v3933_v7 }
0x19cc   :  { %2569 = vmatpush1.bf16.msra.mxu0 %v3943_v0 }
0x1a92   :  { %v2448_v31 = vpop.f32.mrb[64].mxu0 }
0x1a93   :  { %v2456_v39 = vadd.f32 %v2455_v34, %v2448_v31  ;;  %2465 = vrot.lane.b32.xlu1 %v2448_v31, %s3147_s5  ;;  %v2450_v40 = vpop.f32.mrb[65].mxu0 }
0x1a94   :  { %v2452_v41 = vpop.f32.mrb[66].mxu0  ;;  %v2476_v17 = vadd.f32 %v3996_v5, %v2450_v40  ;;  %v2611_v40 = vld [vmem:[#allocation3 + $0x70] sm:$0xff] }
0x1a95   :  { %v2832_v42 = vmul.f32 -1.442695, %v2456_v39  ;;  %v2453_v46 = vpop.f32.mrb[67].mxu0 }
0x1a97   :  { %3105 = vpow2.f32 %v2832_v42 }
0x1aa1   :  { %v3106_v48 = vpop.eup %3105 }
0x1aa2   :  { %v2460_v20 = vadd.f32 1.0, %v3106_v48 }
0x1aa4   :  { %3107 = vrcp.f32 %v2460_v20  ;;  %v2623_v20 = vld [vmem:[#allocation3 + $0xb0] sm:$0xff] }
0x1aae   :  { %v3108_v50 = vpop.eup %3107 }
0x1aaf   :  { %v2477_v51 = vmul.f32 %v3108_v50, %v2476_v17 }
0x1ab1   :  { %v2478_v44 = vadd.f32 %v2477_v51, %v2475_v36 }
0x1b05   :  { %v2466_v26 = vpop.permute.xlu1 %2465 }
0x1b06   :  { %v2468_v45 = vadd.f32 %v2466_v26, %v2463_v52 }
0x1b08   :  { %v2833_v30 = vmul.f32 -1.442695, %v2468_v45 }
0x1b0a   :  { %3109 = vpow2.f32 %v2833_v30 }
0x1b14   :  { %v3110_v43 = vpop.eup %3109 }
0x1b15   :  { %v2472_v47 = vadd.f32 1.0, %v3110_v43 }
0x1b17   :  { %3111 = vrcp.f32 %v2472_v47  ;;  %v2677_v47 = vld [vmem:[#allocation3 + $0x38] sm:$0xff] }
0x1b18   :  { %3113 = vtanh.f32 %v2478_v44 }
0x1b21   :  { %v3112_v53 = vpop.eup %3111 }
0x1b22   :  { %v2480_v54 = vsub.f32 1.0, %v3112_v53  ;;  %v3114_v56 = vpop.eup %3113  ;;  %v2482_v58 = vmul.f32 %v3112_v53, %v2409_v28 }
0x1b24   :  { %v2481_v57 = vmul.f32 %v3114_v56, %v2480_v54 }
0x1b26   :  { %v2483_v19 = vadd.f32 %v2482_v58, %v2481_v57 }
0x1b28   :  { %v2484_v62 = vpack.c.bf16 %v2483_v19, %v2483_v19 }
0x1b2a   :  { %2834 = vmatmul.mubr.msk.bf16.vlgmr.msra.gmra.mrb[48].mxu1 %vm147_vm0, %v2484_v62 }
0x1b2b   :  { %2637 = vmatpush1.bf16.msra.mxu1 %v3887_v59  ;;  %2668 = vmatprep.mubr.bf16.mxu1 %v3146_v1 }
0x1b2c   :  { %2638 = vmatprep.subr.bf16.mxu1 %v3898_v55 }
0x1b2f   :  { %2639 = vmatpush1.bf16.msra.mxu1 %v3907_v60 }
0x1b30   :  { %2640 = vmatprep.subr.bf16.mxu1 %v3919_v6 }
0x1b33   :  { %2641 = vmatpush1.bf16.msra.mxu1 %v3925_v2 }
0x1b34   :  { %2642 = vmatprep.subr.bf16.mxu1 %v3933_v7  ;;  %v2537_v7 = vld [vmem:[#allocation3 + $0x68] sm:$0xff] }
0x1b37   :  { %2643 = vmatpush1.bf16.msra.mxu1 %v3943_v0 }
0x1bfd   :  { %v2522_v63 = vpop.f32.mrb[48].mxu1 }
0x1bfe   :  { %v2530_v16 = vadd.f32 %v2529_v61, %v2522_v63  ;;  %2539 = vrot.lane.b32.xlu1 %v2522_v63, %s3147_s5  ;;  %v2524_v59 = vpop.f32.mrb[49].mxu1 }
0x1bff   :  { %v2526_v3 = vpop.f32.mrb[50].mxu1  ;;  %v2550_v6 = vadd.f32 %v3996_v5, %v2524_v59  ;;  %v2685_v59 = vld [vmem:[#allocation3 + $0x78] sm:$0xff] }
0x1c00   :  { %v2835_v1 = vmul.f32 -1.442695, %v2530_v16  ;;  %v2527_v4 = vpop.f32.mrb[51].mxu1 }
0x1c02   :  { %3115 = vpow2.f32 %v2835_v1 }
0x1c0c   :  { %v3116_v55 = vpop.eup %3115 }
0x1c0d   :  { %v2534_v60 = vadd.f32 1.0, %v3116_v55 }
0x1c0f   :  { %3117 = vrcp.f32 %v2534_v60  ;;  %v2697_v60 = vld [vmem:[#allocation3 + $0xb8] sm:$0xff] }
0x1c19   :  { %v3118_v2 = vpop.eup %3117 }
0x1c1a   :  { %v2551_v8 = vmul.f32 %v3118_v2, %v2550_v6 }
0x1c1c   :  { %v2552_v10 = vadd.f32 %v2551_v8, %v2549_v37 }
0x1c70   :  { %v2540_v9 = vpop.permute.xlu1 %2539 }
0x1c71   :  { %v2542_v0 = vadd.f32 %v2540_v9, %v2537_v7 }
0x1c73   :  { %v2836_v32 = vmul.f32 -1.442695, %v2542_v0 }
0x1c75   :  { %3119 = vpow2.f32 %v2836_v32 }
0x1c7f   :  { %v3120_v21 = vpop.eup %3119 }
0x1c80   :  { %v2546_v11 = vadd.f32 1.0, %v3120_v21 }
0x1c82   :  { %3121 = vrcp.f32 %v2546_v11 }
0x1c83   :  { %3123 = vtanh.f32 %v2552_v10 }
0x1c8c   :  { %v3122_v12 = vpop.eup %3121 }
0x1c8d   :  { %v2554_v13 = vsub.f32 1.0, %v3122_v12  ;;  %v3124_v49 = vpop.eup %3123  ;;  %v2556_v35 = vmul.f32 %v3122_v12, %v2483_v19 }
0x1c8f   :  { %v2555_v14 = vmul.f32 %v3124_v49, %v2554_v13 }
0x1c91   :  { %v2557_v38 = vadd.f32 %v2556_v35, %v2555_v14 }
0x1c93   :  { %v2558_v15 = vpack.c.bf16 %v2557_v38, %v2557_v38 }
0x1c95   :  { %2837 = vmatmul.mubr.msk.bf16.vlgmr.msra.gmra.mrb[68].mxu0 %vm147_vm0, %v2558_v15 }
0x1d68   :  { %v2596_v33 = vpop.f32.mrb[68].mxu0 }
0x1d69   :  { %v2604_v23 = vadd.f32 %v2603_v22, %v2596_v33  ;;  %2613 = vrot.lane.b32.xlu1 %v2596_v33, %s3147_s5  ;;  %v2598_v18 = vpop.f32.mrb[69].mxu0 }
0x1d6a   :  { %v2600_v24 = vpop.f32.mrb[70].mxu0  ;;  %v2624_v31 = vadd.f32 %v3996_v5, %v2598_v18 }
0x1d6b   :  { %v2838_v25 = vmul.f32 -1.442695, %v2604_v23  ;;  %v2601_v27 = vpop.f32.mrb[71].mxu0 }
0x1d6d   :  { %3125 = vpow2.f32 %v2838_v25 }
0x1d77   :  { %v3126_v28 = vpop.eup %3125 }
0x1d78   :  { %v2608_v29 = vadd.f32 1.0, %v3126_v28 }
0x1d7a   :  { %3127 = vrcp.f32 %v2608_v29 }
0x1d84   :  { %v3128_v34 = vpop.eup %3127 }
0x1d85   :  { %v2625_v39 = vmul.f32 %v3128_v34, %v2624_v31 }
0x1d87   :  { %v2626_v17 = vadd.f32 %v2625_v39, %v2623_v20 }
0x1ddb   :  { %v2614_v41 = vpop.permute.xlu1 %2613 }
0x1ddc   :  { %v2616_v42 = vadd.f32 %v2614_v41, %v2611_v40 }
0x1dde   :  { %v2839_v46 = vmul.f32 -1.442695, %v2616_v42 }
0x1de0   :  { %3129 = vpow2.f32 %v2839_v46 }
0x1dea   :  { %v3130_v48 = vpop.eup %3129 }
0x1deb   :  { %v2620_v50 = vadd.f32 1.0, %v3130_v48 }
0x1ded   :  { %3131 = vrcp.f32 %v2620_v50 }
0x1dee   :  { %3133 = vtanh.f32 %v2626_v17 }
0x1df7   :  { %v3132_v51 = vpop.eup %3131 }
0x1df8   :  { %v2628_v52 = vsub.f32 1.0, %v3132_v51  ;;  %v3134_v26 = vpop.eup %3133  ;;  %v2630_v45 = vmul.f32 %v3132_v51, %v2557_v38 }
0x1dfa   :  { %v2629_v30 = vmul.f32 %v3134_v26, %v2628_v52 }
0x1dfc   :  { %v2631_v43 = vadd.f32 %v2630_v45, %v2629_v30 }
0x1dfe   :  { %v2632_v36 = vpack.c.bf16 %v2631_v43, %v2631_v43 }
0x1e00   :  { %2840 = vmatmul.mubr.msk.bf16.vlgmr.msra.gmra.mrb[52].mxu1 %vm147_vm0, %v2632_v36 }
0x1ed3   :  { %v2670_v44 = vpop.f32.mrb[52].mxu1 }
0x1ed4   :  { %v2678_v53 = vadd.f32 %v2677_v47, %v2670_v44  ;;  %2687 = vrot.lane.b32.xlu1 %v2670_v44, %s3147_s5  ;;  %v2672_v54 = vpop.f32.mrb[53].mxu1 }
0x1ed5   :  { %v2674_v56 = vpop.f32.mrb[54].mxu1  ;;  %v2698_v63 = vadd.f32 %v3996_v5, %v2672_v54 }
0x1ed6   :  { %v2841_v58 = vmul.f32 -1.442695, %v2678_v53  ;;  %v2675_v57 = vpop.f32.mrb[55].mxu1 }
0x1ed8   :  { %3135 = vpow2.f32 %v2841_v58 }
0x1ee2   :  { %v3136_v19 = vpop.eup %3135 }
0x1ee3   :  { %v2682_v62 = vadd.f32 1.0, %v3136_v19 }
0x1ee5   :  { %3137 = vrcp.f32 %v2682_v62 }
0x1eef   :  { %v3138_v61 = vpop.eup %3137 }
0x1ef0   :  { %v2699_v16 = vmul.f32 %v3138_v61, %v2698_v63 }
0x1ef2   :  { %v2700_v6 = vadd.f32 %v2699_v16, %v2697_v60 }
0x1f46   :  { %v2688_v3 = vpop.permute.xlu1 %2687 }
0x1f47   :  { %v2690_v1 = vadd.f32 %v2688_v3, %v2685_v59 }
0x1f49   :  { %v2842_v4 = vmul.f32 -1.442695, %v2690_v1 }
0x1f4b   :  { %3139 = vpow2.f32 %v2842_v4 }
0x1f55   :  { %v3140_v55 = vpop.eup %3139 }
0x1f56   :  { %v2694_v2 = vadd.f32 1.0, %v3140_v55 }
0x1f58   :  { %3141 = vrcp.f32 %v2694_v2 }
0x1f59   :  { %3143 = vtanh.f32 %v2700_v6 }
0x1f62   :  { %v3142_v8 = vpop.eup %3141 }
0x1f63   :  { %v2702_v7 = vsub.f32 1.0, %v3142_v8  ;;  %v3144_v9 = vpop.eup %3143  ;;  %v2704_v32 = vmul.f32 %v3142_v8, %v2631_v43 }
0x1f65   :  { %v2703_v0 = vmul.f32 %v3144_v9, %v2702_v7 }
0x1f67   :  { %v2705_v21 = vadd.f32 %v2704_v32, %v2703_v0 }
0x1f69   :  { %2706 = vst.msk [vmem:[%s4111_s21] sm:$0xff] %vm147_vm0, %v2705_v21 }

</bundles_post_ra>
